<compile_context>
chip_gen: v7x
topology: tpu7x:2x2x1
jax: 0.10.0
libtpu: 0.0.40
codegen_flags: <defaults>
</compile_context>

<pallas_src>
import functools

import jax
import jax.numpy as jnp
from jax.experimental import pallas as pl
from jax.experimental.pallas import tpu as pltpu


# ------------------------------- small helpers ------------------------------ #

def _tile_rows(n, pref=512):
    """Largest sublane-friendly tile (multiple of 8) that divides n, else full n."""
    for t in (pref, 1024, 512, 256, 128, 64, 32, 16, 8):
        if t <= n and n % t == 0:
            return t
    return n


def _tile_lanes(n, pref=512):
    """Largest lane-friendly tile (multiple of 128) that divides n, else full n."""
    for t in (pref, 1024, 512, 256, 128):
        if t <= n and n % t == 0:
            return t
    return n


def _head_block(n_heads, d_head):
    """Heads processed per flash-attention grid step: fill 128 lanes when dh < 128."""
    cap = max(1, 128 // max(1, d_head))
    for hb in range(min(n_heads, cap), 0, -1):
        if n_heads % hb == 0:
            return hb
    return 1


def _cparams(semantics):
    # Explicit VMEM budget: below v7x's 64 MiB physical, above the scoped defaults.
    return pltpu.CompilerParams(dimension_semantics=semantics,
                                vmem_limit_bytes=48 * 1024 * 1024)


def _layernorm_f32(x, gamma, beta):
    # PyTorch LayerNorm: biased variance, eps=1e-5, stats in f32.
    x = x.astype(jnp.float32)
    mu = jnp.mean(x, axis=-1, keepdims=True)
    xc = x - mu
    var = jnp.mean(xc * xc, axis=-1, keepdims=True)
    return (xc * jax.lax.rsqrt(var + 1e-5)) * gamma + beta


def _erf(x):
    # Abramowitz & Stegun 7.1.26 (|err| < 1.5e-7): exact-erf GELU semantics without
    # relying on an lax.erf Mosaic lowering. The divide runs on the EUP (approx recip).
    a1, a2, a3, a4, a5 = 0.254829592, -0.284496736, 1.421413741, -1.453152027, 1.061405429
    p = 0.3275911
    s = jnp.where(x < 0.0, -1.0, 1.0)
    ax = jnp.abs(x)
    t = pl.reciprocal(1.0 + p * ax, approx=True)
    poly = ((((a5 * t + a4) * t + a3) * t + a2) * t + a1) * t
    return s * (1.0 - poly * jnp.exp(-ax * ax))


def _gelu_exact(x):
    return 0.5 * x * (1.0 + _erf(x * 0.7071067811865476))


# ----------------------------- Pallas kernel bodies ------------------------- #

def ln_qkv_kernel(x_ref, g_ref, b_ref, w_ref, q_ref, k_ref, v_ref, *, scale):
    """Fused LayerNorm + concatenated QKV projection (self-attention).
    One LN + one (tr, D) @ (D, 3*inner) matmul per step; per-head head-major writes."""
    H, dh = q_ref.shape[1], q_ref.shape[3]
    inner = H * dh
    xn = _layernorm_f32(x_ref[...], g_ref[...], b_ref[...]).astype(jnp.bfloat16)
    qkv = jnp.dot(xn, w_ref[...], preferred_element_type=jnp.float32)   # (tr, 3*inner)
    qp = qkv[:, :inner] * scale                                          # scale folded into Q
    kp = qkv[:, inner:2 * inner]
    vp = qkv[:, 2 * inner:]
    for h in range(H):
        sl = slice(h * dh, (h + 1) * dh)
        q_ref[0, h] = qp[:, sl].astype(q_ref.dtype)
        k_ref[0, h] = kp[:, sl].astype(k_ref.dtype)
        v_ref[0, h] = vp[:, sl].astype(v_ref.dtype)


def ln_q_kernel(x_ref, g_ref, b_ref, w_ref, q_ref, *, scale):
    """Fused LayerNorm + Q projection (cross-attention query path)."""
    H, dh = q_ref.shape[1], q_ref.shape[3]
    xn = _layernorm_f32(x_ref[...], g_ref[...], b_ref[...]).astype(jnp.bfloat16)
    q = jnp.dot(xn, w_ref[...], preferred_element_type=jnp.float32) * scale
    for h in range(H):
        q_ref[0, h] = q[:, h * dh:(h + 1) * dh].astype(q_ref.dtype)


def kv_kernel(c_ref, w_ref, k_ref, v_ref):
    """Concatenated K/V projection of the (un-normalized) context."""
    H, dh = k_ref.shape[1], k_ref.shape[3]
    inner = H * dh
    c = c_ref[...].astype(jnp.bfloat16)
    kv = jnp.dot(c, w_ref[...], preferred_element_type=jnp.float32)      # (tr, 2*inner)
    for h in range(H):
        sl = slice(h * dh, (h + 1) * dh)
        k_ref[0, h] = kv[:, sl].astype(k_ref.dtype)
        v_ref[0, h] = kv[:, inner + h * dh: inner + (h + 1) * dh].astype(v_ref.dtype)


def flash_attn_kernel(q_ref, k_ref, v_ref, o_ref, m_sc, l_sc, acc_sc):
    """Online-softmax attention over a group of heads per step.
    Grid: (B, H//hb, q_tiles, kv_tiles); the kv axis is the reduction (last)."""
    ki = pl.program_id(3)

    @pl.when(ki == 0)
    def _():
        m_sc[...] = jnp.full_like(m_sc, -jnp.inf)
        l_sc[...] = jnp.zeros_like(l_sc)
        acc_sc[...] = jnp.zeros_like(acc_sc)

    q = q_ref[0]                                   # (hb, tq, dh) bf16, scale pre-folded
    k = k_ref[0]                                   # (hb, tk, dh) bf16
    s = jax.lax.dot_general(q, k, (((2,), (2,)), ((0,), (0,))),
                            preferred_element_type=jnp.float32)          # (hb, tq, tk)

    m_prev = m_sc[...]
    m_new = jnp.maximum(m_prev, jnp.max(s, axis=-1, keepdims=True))
    alpha = jnp.exp(m_prev - m_new)
    p = jnp.exp(s - m_new)
    l_sc[...] = alpha * l_sc[...] + jnp.sum(p, axis=-1, keepdims=True)
    pv = jax.lax.dot_general(p.astype(jnp.bfloat16), v_ref[0],
                             (((2,), (1,)), ((0,), (0,))),
                             preferred_element_type=jnp.float32)          # (hb, tq, dh)
    acc_sc[...] = alpha * acc_sc[...] + pv
    m_sc[...] = m_new

    @pl.when(ki == pl.num_programs(3) - 1)
    def _():
        inv_l = pl.reciprocal(l_sc[...], approx=True)
        o_ref[0] = (acc_sc[...] * inv_l).astype(o_ref.dtype)


def attn_out_kernel(a_ref, wo_ref, bo_ref, r_ref, o_ref):
    """to_out projection: unrolled head reduction against a fully resident (H, dh, D)
    weight; fuses bias + residual. Also performs (b h) n d -> b n (h d) for free."""
    H = a_ref.shape[1]
    acc = r_ref[...] + bo_ref[...]                                        # (tr, D) f32
    for h in range(H):
        acc = acc + jnp.dot(a_ref[0, h], wo_ref[h],
                            preferred_element_type=jnp.float32)
    o_ref[...] = acc.astype(o_ref.dtype)


def ln_geglu_kernel(x_ref, g_ref, b_ref, wa_ref, wg_ref, ba_ref, bg_ref, o_ref):
    """Fused LayerNorm + GEGLU: value/gate matmuls + exact-GELU gating in one pass."""
    xn = _layernorm_f32(x_ref[...], g_ref[...], b_ref[...]).astype(jnp.bfloat16)
    a = jnp.dot(xn, wa_ref[...], preferred_element_type=jnp.float32) + ba_ref[...]
    gate = jnp.dot(xn, wg_ref[...], preferred_element_type=jnp.float32) + bg_ref[...]
    o_ref[...] = (a * _gelu_exact(gate)).astype(o_ref.dtype)


def ff_out_kernel(g_ref, w_ref, b_ref, r_ref, o_ref, acc_ref):
    """K-tiled matmul with f32 accumulator and full-D lane-dense output;
    fuses bias + residual at finalize."""
    k = pl.program_id(1)

    @pl.when(k == 0)
    def _():
        acc_ref[...] = jnp.zeros_like(acc_ref)

    acc_ref[...] += jnp.dot(g_ref[...], w_ref[...], preferred_element_type=jnp.float32)

    @pl.when(k == pl.num_programs(1) - 1)
    def _():
        o_ref[...] = (acc_ref[...] + b_ref[...] + r_ref[...]).astype(o_ref.dtype)


# ------------------------------ kernel wrappers ------------------------------ #

def _ln_qkv(x2d, B, N, gamma, beta, wqkv, H, dh, scale):
    D = x2d.shape[1]
    tr = _tile_rows(N, 512)
    nN = N // tr
    kern = functools.partial(ln_qkv_kernel, scale=scale)
    q, k, v = pl.pallas_call(
        kern,
        grid=(B, nN),
        in_specs=[
            pl.BlockSpec((tr, D), lambda b, i: (b * nN + i, 0)),
            pl.BlockSpec((1, D), lambda b, i: (0, 0)),
            pl.BlockSpec((1, D), lambda b, i: (0, 0)),
            pl.BlockSpec((D, 3 * H * dh), lambda b, i: (0, 0)),   # resident weight
        ],
        out_specs=[pl.BlockSpec((1, H, tr, dh), lambda b, i: (b, 0, i, 0))] * 3,
        out_shape=[jax.ShapeDtypeStruct((B, H, N, dh), jnp.bfloat16)] * 3,
        compiler_params=_cparams(("parallel", "parallel")),
    )(x2d, gamma, beta, wqkv)
    return q, k, v


def _ln_q(x2d, B, N, gamma, beta, wq, H, dh, scale):
    D = x2d.shape[1]
    tr = _tile_rows(N, 512)
    nN = N // tr
    kern = functools.partial(ln_q_kernel, scale=scale)
    return pl.pallas_call(
        kern,
        grid=(B, nN),
        in_specs=[
            pl.BlockSpec((tr, D), lambda b, i: (b * nN + i, 0)),
            pl.BlockSpec((1, D), lambda b, i: (0, 0)),
            pl.BlockSpec((1, D), lambda b, i: (0, 0)),
            pl.BlockSpec((D, H * dh), lambda b, i: (0, 0)),
        ],
        out_specs=pl.BlockSpec((1, H, tr, dh), lambda b, i: (b, 0, i, 0)),
        out_shape=jax.ShapeDtypeStruct((B, H, N, dh), jnp.bfloat16),
        compiler_params=_cparams(("parallel", "parallel")),
    )(x2d, gamma, beta, wq)


def _kv(ctx2d, B, M, wkv, H, dh):
    Dc = ctx2d.shape[1]
    tr = _tile_rows(M, 512)
    nM = M // tr
    k, v = pl.pallas_call(
        kv_kernel,
        grid=(B, nM),
        in_specs=[
            pl.BlockSpec((tr, Dc), lambda b, i: (b * nM + i, 0)),
            pl.BlockSpec((Dc, 2 * H * dh), lambda b, i: (0, 0)),
        ],
        out_specs=[pl.BlockSpec((1, H, tr, dh), lambda b, i: (b, 0, i, 0))] * 2,
        out_shape=[jax.ShapeDtypeStruct((B, H, M, dh), jnp.bfloat16)] * 2,
        compiler_params=_cparams(("parallel", "parallel")),
    )(ctx2d, wkv)
    return k, v


def _flash_attention(q, k, v):
    B, H, N, dh = q.shape
    M = k.shape[2]
    tq = _tile_rows(N, 256)
    tk = _tile_rows(M, 512)
    hb = _head_block(H, dh)
    return pl.pallas_call(
        flash_attn_kernel,
        grid=(B, H // hb, N // tq, M // tk),
        in_specs=[
            pl.BlockSpec((1, hb, tq, dh), lambda b, h, qi, ki: (b, h, qi, 0)),
            pl.BlockSpec((1, hb, tk, dh), lambda b, h, qi, ki: (b, h, ki, 0)),
            pl.BlockSpec((1, hb, tk, dh), lambda b, h, qi, ki: (b, h, ki, 0)),
        ],
        out_specs=pl.BlockSpec((1, hb, tq, dh), lambda b, h, qi, ki: (b, h, qi, 0)),
        out_shape=jax.ShapeDtypeStruct((B, H, N, dh), jnp.bfloat16),
        scratch_shapes=[
            pltpu.VMEM((hb, tq, 1), jnp.float32),    # running max
            pltpu.VMEM((hb, tq, 1), jnp.float32),    # running denom
            pltpu.VMEM((hb, tq, dh), jnp.float32),   # running accumulator
        ],
        compiler_params=_cparams(("parallel", "parallel", "parallel", "arbitrary")),
    )(q, k, v)


def _attn_out(a, wo, bo, res2d):
    B, H, N, dh = a.shape
    D = wo.shape[2]
    tr = _tile_rows(N, 512)
    nN = N // tr
    return pl.pallas_call(
        attn_out_kernel,
        grid=(B, nN),
        in_specs=[
            pl.BlockSpec((1, H, tr, dh), lambda b, i: (b, 0, i, 0)),
            pl.BlockSpec((H, dh, D), lambda b, i: (0, 0, 0)),     # resident weight
            pl.BlockSpec((1, D), lambda b, i: (0, 0)),
            pl.BlockSpec((tr, D), lambda b, i: (b * nN + i, 0)),  # residual
        ],
        out_specs=pl.BlockSpec((tr, D), lambda b, i: (b * nN + i, 0)),
        out_shape=jax.ShapeDtypeStruct(res2d.shape, res2d.dtype),
        input_output_aliases={3: 0},                              # residual -> output
        compiler_params=_cparams(("parallel", "parallel")),
    )(a, wo, bo, res2d)


def _ln_geglu(x2d, gamma, beta, wa, wg, ba, bg):
    R, D = x2d.shape
    F = wa.shape[1]
    tr = _tile_rows(R, 512)
    tn = _tile_lanes(F, 512)
    return pl.pallas_call(
        ln_geglu_kernel,
        grid=(R // tr, F // tn),
        in_specs=[
            pl.BlockSpec((tr, D), lambda i, j: (i, 0)),
            pl.BlockSpec((1, D), lambda i, j: (0, 0)),
            pl.BlockSpec((1, D), lambda i, j: (0, 0)),
            pl.BlockSpec((D, tn), lambda i, j: (0, j)),
            pl.BlockSpec((D, tn), lambda i, j: (0, j)),
            pl.BlockSpec((1, tn), lambda i, j: (0, j)),
            pl.BlockSpec((1, tn), lambda i, j: (0, j)),
        ],
        out_specs=pl.BlockSpec((tr, tn), lambda i, j: (i, j)),
        out_shape=jax.ShapeDtypeStruct((R, F), jnp.bfloat16),
        compiler_params=_cparams(("parallel", "parallel")),
    )(x2d, gamma, beta, wa, wg, ba, bg)


def _ff_out(g, w2, b2, res2d):
    R, F = g.shape
    D = w2.shape[1]
    tr = _tile_rows(R, 512)
    tk = _tile_lanes(F, 1024)
    return pl.pallas_call(
        ff_out_kernel,
        grid=(R // tr, F // tk),
        in_specs=[
            pl.BlockSpec((tr, tk), lambda i, k: (i, k)),
            pl.BlockSpec((tk, D), lambda i, k: (k, 0)),
            pl.BlockSpec((1, D), lambda i, k: (0, 0)),
            pl.BlockSpec((tr, D), lambda i, k: (i, 0)),           # residual
        ],
        out_specs=pl.BlockSpec((tr, D), lambda i, k: (i, 0)),
        out_shape=jax.ShapeDtypeStruct(res2d.shape, res2d.dtype),
        scratch_shapes=[pltpu.VMEM((tr, D), jnp.float32)],
        input_output_aliases={3: 0},                              # residual -> output
        compiler_params=_cparams(("parallel", "arbitrary")),
    )(g, w2, b2, res2d)


# ------------------------------ module forward ------------------------------ #

def basic_transformer_block(x, context, p, n_heads, d_head):
    B, N, D = x.shape
    M, Dc = context.shape[1], context.shape[2]
    x2 = x.reshape(B * N, D)              # contiguous reshape, no transpose
    ctx2 = context.reshape(B * M, Dc)
    scale = float(d_head) ** -0.5

    # --- attn1: self attention on norm1(x), residual ---
    q, k, v = _ln_qkv(x2, B, N, p["norm1_w"], p["norm1_b"], p["attn1_wqkv"],
                      n_heads, d_head, scale)
    a = _flash_attention(q, k, v)
    x2 = _attn_out(a, p["attn1_wo"], p["attn1_bo"], x2)

    # --- attn2: cross attention on norm2(x) with (un-normalized) context, residual ---
    q = _ln_q(x2, B, N, p["norm2_w"], p["norm2_b"], p["attn2_wq"], n_heads, d_head, scale)
    k, v = _kv(ctx2, B, M, p["attn2_wkv"], n_heads, d_head)
    a = _flash_attention(q, k, v)
    x2 = _attn_out(a, p["attn2_wo"], p["attn2_bo"], x2)

    # --- GEGLU feed-forward on norm3(x), residual ---
    g = _ln_geglu(x2, p["norm3_w"], p["norm3_b"],
                  p["ff_w1a"], p["ff_w1g"], p["ff_b1a"], p["ff_b1g"])
    x2 = _ff_out(g, p["ff_w2"], p["ff_b2"], x2)

    return x2.reshape(B, N, D)


# ------------------------------ parameter init ------------------------------ #

def init_params(key, dim, n_heads, d_head, ff_mult=4, context_dim=None):
    inner = n_heads * d_head
    ff_inner = dim * ff_mult
    context_dim = dim if context_dim is None else context_dim
    keys = iter(jax.random.split(key, 32))

    def u(shape, fan_in):
        bound = 1.0 / (fan_in ** 0.5)
        return jax.random.uniform(next(keys), shape, jnp.float32, -bound, bound)

    p = {}
    # attn1 (self): torch weight (inner, din) used as x @ W.T -> store W.T = (din, inner),
    # columns already in (h d) order; Q/K/V concatenated along the output dim.
    wq = u((dim, inner), dim); wk = u((dim, inner), dim); wv = u((dim, inner), dim)
    p["attn1_wqkv"] = jnp.concatenate([wq, wk, wv], axis=1).astype(jnp.bfloat16)
    wo = u((inner, dim), inner)                                  # = torch to_out weight .T
    p["attn1_wo"] = wo.reshape(n_heads, d_head, dim).astype(jnp.bfloat16)
    p["attn1_bo"] = u((1, dim), inner)
    # attn2 (cross)
    p["attn2_wq"] = u((dim, inner), dim).astype(jnp.bfloat16)
    wk = u((context_dim, inner), context_dim); wv = u((context_dim, inner), context_dim)
    p["attn2_wkv"] = jnp.concatenate([wk, wv], axis=1).astype(jnp.bfloat16)
    wo = u((inner, dim), inner)
    p["attn2_wo"] = wo.reshape(n_heads, d_head, dim).astype(jnp.bfloat16)
    p["attn2_bo"] = u((1, dim), inner)
    # GEGLU FF: proj weight split into value | gate halves.
    w1 = u((dim, 2 * ff_inner), dim)
    b1 = u((1, 2 * ff_inner), dim)
    p["ff_w1a"] = w1[:, :ff_inner].astype(jnp.bfloat16)
    p["ff_w1g"] = w1[:, ff_inner:].astype(jnp.bfloat16)
    p["ff_b1a"] = b1[:, :ff_inner]
    p["ff_b1g"] = b1[:, ff_inner:]
    p["ff_w2"] = u((ff_inner, dim), ff_inner).astype(jnp.bfloat16)
    p["ff_b2"] = u((1, dim), ff_inner)
    for i in (1, 2, 3):                                          # PyTorch LayerNorm default init
        p[f"norm{i}_w"] = jnp.ones((1, dim), jnp.float32)
        p[f"norm{i}_b"] = jnp.zeros((1, dim), jnp.float32)
    return p


# ----------------------------------- main ----------------------------------- #

if __name__ == "__main__":
    dim, n_heads, d_head = 32, 4, 8     # inner_dim = 32, ff_inner = 128
    B, N, M = 2, 8, 16                  # x: (B, N, dim); context: (B, M, dim)

    key = jax.random.PRNGKey(0)
    kx, kc, kp = jax.random.split(key, 3)
    x = jax.random.normal(kx, (B, N, dim), jnp.float32)
    context = jax.random.normal(kc, (B, M, dim), jnp.float32)
    params = init_params(kp, dim, n_heads, d_head)

    fwd = jax.jit(functools.partial(basic_transformer_block,
                                    n_heads=n_heads, d_head=d_head))
    out = fwd(x, context, params)
    jax.block_until_ready(out)
    assert out.shape == (B, N, dim) and out.dtype == jnp.float32
    print("KERNEL_OK")
</pallas_src>

<mosaic_0001>
module attributes {stable_mosaic.version = 11 : i64} {
  func.func @flash_attn_kernel(%arg0: i32, %arg1: i32, %arg2: i32, %arg3: i32, %arg4: memref<1x4x8x8xbf16, #tpu.memory_space<vmem>>, %arg5: memref<1x4x8x8xbf16, #tpu.memory_space<vmem>>, %arg6: memref<1x4x8x8xbf16, #tpu.memory_space<vmem>>, %arg7: memref<1x4x8x8xbf16, #tpu.memory_space<vmem>>, %arg8: memref<4x8x1xf32, #tpu.memory_space<vmem>>, %arg9: memref<4x8x1xf32, #tpu.memory_space<vmem>>, %arg10: memref<4x8x8xf32, #tpu.memory_space<vmem>>) attributes {dimension_semantics = [#tpu.dimension_semantics<parallel>, #tpu.dimension_semantics<parallel>, #tpu.dimension_semantics<parallel>, #tpu.dimension_semantics<arbitrary>], iteration_bounds = array<i64: 2, 1, 1, 1>, scalar_prefetch = 0 : i64, scratch_operands = 3 : i64, tpu.core_type = #tpu.core_type<tc>, window_params = [{transform_indices = @transform_0, window_bounds = array<i64: 1, 4, 8, 8>}, {transform_indices = @transform_1, window_bounds = array<i64: 1, 4, 8, 8>}, {transform_indices = @transform_2, window_bounds = array<i64: 1, 4, 8, 8>}, {transform_indices = @transform_3, window_bounds = array<i64: 1, 4, 8, 8>}]} {
    %c0_i32 = arith.constant 0 : i32
    %0 = arith.cmpi eq, %arg3, %c0_i32 : i32
    %1 = arith.extui %0 : i1 to i32
    %c0_i32_0 = arith.constant 0 : i32
    %2 = arith.cmpi ne, %1, %c0_i32_0 : i32
    scf.if %2 {
      %cst_35 = arith.constant 0xFF800000 : f32
      %36 = vector.broadcast %cst_35 : f32 to vector<4x8x1xf32>
      %c0_36 = arith.constant 0 : index
      %c0_37 = arith.constant 0 : index
      %c0_38 = arith.constant 0 : index
      %37 = vector.load %arg8[%c0_36, %c0_37, %c0_38] : memref<4x8x1xf32, #tpu.memory_space<vmem>>, vector<4x8x1xf32>
      tpu.vector_store %arg8[%c0_36, %c0_37, %c0_38], %36 {strides = array<i32>} : memref<4x8x1xf32, #tpu.memory_space<vmem>>, vector<4x8x1xf32>,
      %cst_39 = arith.constant 0.000000e+00 : f32
      %38 = vector.broadcast %cst_39 : f32 to vector<4x8x1xf32>
      %c0_40 = arith.constant 0 : index
      %c0_41 = arith.constant 0 : index
      %c0_42 = arith.constant 0 : index
      %39 = vector.load %arg9[%c0_40, %c0_41, %c0_42] : memref<4x8x1xf32, #tpu.memory_space<vmem>>, vector<4x8x1xf32>
      tpu.vector_store %arg9[%c0_40, %c0_41, %c0_42], %38 {strides = array<i32>} : memref<4x8x1xf32, #tpu.memory_space<vmem>>, vector<4x8x1xf32>,
      %cst_43 = arith.constant 0.000000e+00 : f32
      %40 = vector.broadcast %cst_43 : f32 to vector<4x8x8xf32>
      %c0_44 = arith.constant 0 : index
      %c0_45 = arith.constant 0 : index
      %c0_46 = arith.constant 0 : index
      %41 = vector.load %arg10[%c0_44, %c0_45, %c0_46] : memref<4x8x8xf32, #tpu.memory_space<vmem>>, vector<4x8x8xf32>
      tpu.vector_store %arg10[%c0_44, %c0_45, %c0_46], %40 {strides = array<i32>} : memref<4x8x8xf32, #tpu.memory_space<vmem>>, vector<4x8x8xf32>,
    } else {
    }
    %c0 = arith.constant 0 : index
    %c0_1 = arith.constant 0 : index
    %c0_2 = arith.constant 0 : index
    %c0_3 = arith.constant 0 : index
    %3 = vector.load %arg4[%c0, %c0_1, %c0_2, %c0_3] : memref<1x4x8x8xbf16, #tpu.memory_space<vmem>>, vector<1x4x8x8xbf16>
    %4 = vector.shape_cast %3 : vector<1x4x8x8xbf16> to vector<4x8x8xbf16>
    %c0_4 = arith.constant 0 : index
    %c0_5 = arith.constant 0 : index
    %c0_6 = arith.constant 0 : index
    %c0_7 = arith.constant 0 : index
    %5 = vector.load %arg5[%c0_4, %c0_5, %c0_6, %c0_7] : memref<1x4x8x8xbf16, #tpu.memory_space<vmem>>, vector<1x4x8x8xbf16>
    %6 = vector.shape_cast %5 : vector<1x4x8x8xbf16> to vector<4x8x8xbf16>
    %cst = arith.constant dense<0.000000e+00> : vector<4x8x8xf32>
    %7 = tpu.matmul %4, %6, %cst {dimension_numbers = #tpu.dot_dimension_numbers<[2], [2], [1], [1], [0, 0, 0, 1, 1, 1], [0], [0]>} : vector<4x8x8xbf16>, vector<4x8x8xbf16>, vector<4x8x8xf32> -> vector<4x8x8xf32>
    %c0_8 = arith.constant 0 : index
    %c0_9 = arith.constant 0 : index
    %c0_10 = arith.constant 0 : index
    %8 = vector.load %arg8[%c0_8, %c0_9, %c0_10] : memref<4x8x1xf32, #tpu.memory_space<vmem>>, vector<4x8x1xf32>
    %cst_11 = arith.constant dense<0xFF800000> : vector<4x8xf32>
    %9 = vector.multi_reduction <maximumf>, %7, %cst_11 [2] : vector<4x8x8xf32> to vector<4x8xf32>
    %10 = vector.shape_cast %9 : vector<4x8xf32> to vector<4x8x1xf32>
    %11 = arith.maximumf %8, %10 : vector<4x8x1xf32>
    %12 = arith.subf %8, %11 : vector<4x8x1xf32>
    %13 = math.exp %12 : vector<4x8x1xf32>
    %14 = vector.broadcast %11 : vector<4x8x1xf32> to vector<4x8x8xf32>
    %15 = arith.subf %7, %14 : vector<4x8x8xf32>
    %16 = math.exp %15 : vector<4x8x8xf32>
    %c0_12 = arith.constant 0 : index
    %c0_13 = arith.constant 0 : index
    %c0_14 = arith.constant 0 : index
    %17 = vector.load %arg9[%c0_12, %c0_13, %c0_14] : memref<4x8x1xf32, #tpu.memory_space<vmem>>, vector<4x8x1xf32>
    %18 = arith.mulf %13, %17 : vector<4x8x1xf32>
    %cst_15 = arith.constant dense<0.000000e+00> : vector<4x8xf32>
    %19 = vector.multi_reduction <add>, %16, %cst_15 [2] : vector<4x8x8xf32> to vector<4x8xf32>
    %20 = vector.shape_cast %19 : vector<4x8xf32> to vector<4x8x1xf32>
    %21 = arith.addf %18, %20 : vector<4x8x1xf32>
    %c0_16 = arith.constant 0 : index
    %c0_17 = arith.constant 0 : index
    %c0_18 = arith.constant 0 : index
    %22 = vector.load %arg9[%c0_16, %c0_17, %c0_18] : memref<4x8x1xf32, #tpu.memory_space<vmem>>, vector<4x8x1xf32>
    tpu.vector_store %arg9[%c0_16, %c0_17, %c0_18], %21 {strides = array<i32>} : memref<4x8x1xf32, #tpu.memory_space<vmem>>, vector<4x8x1xf32>,
    %23 = arith.truncf %16 : vector<4x8x8xf32> to vector<4x8x8xbf16>
    %c0_19 = arith.constant 0 : index
    %c0_20 = arith.constant 0 : index
    %c0_21 = arith.constant 0 : index
    %c0_22 = arith.constant 0 : index
    %24 = vector.load %arg6[%c0_19, %c0_20, %c0_21, %c0_22] : memref<1x4x8x8xbf16, #tpu.memory_space<vmem>>, vector<1x4x8x8xbf16>
    %25 = vector.shape_cast %24 : vector<1x4x8x8xbf16> to vector<4x8x8xbf16>
    %cst_23 = arith.constant dense<0.000000e+00> : vector<4x8x8xf32>
    %26 = tpu.matmul %23, %25, %cst_23 {dimension_numbers = #tpu.dot_dimension_numbers<[2], [1], [1], [2], [0, 0, 0, 1, 1, 2], [0], [0]>} : vector<4x8x8xbf16>, vector<4x8x8xbf16>, vector<4x8x8xf32> -> vector<4x8x8xf32>
    %c0_24 = arith.constant 0 : index
    %c0_25 = arith.constant 0 : index
    %c0_26 = arith.constant 0 : index
    %27 = vector.load %arg10[%c0_24, %c0_25, %c0_26] : memref<4x8x8xf32, #tpu.memory_space<vmem>>, vector<4x8x8xf32>
    %28 = vector.broadcast %13 : vector<4x8x1xf32> to vector<4x8x8xf32>
    %29 = arith.mulf %28, %27 : vector<4x8x8xf32>
    %30 = arith.addf %29, %26 : vector<4x8x8xf32>
    %c0_27 = arith.constant 0 : index
    %c0_28 = arith.constant 0 : index
    %c0_29 = arith.constant 0 : index
    %31 = vector.load %arg10[%c0_27, %c0_28, %c0_29] : memref<4x8x8xf32, #tpu.memory_space<vmem>>, vector<4x8x8xf32>
    tpu.vector_store %arg10[%c0_27, %c0_28, %c0_29], %30 {strides = array<i32>} : memref<4x8x8xf32, #tpu.memory_space<vmem>>, vector<4x8x8xf32>,
    %c0_30 = arith.constant 0 : index
    %c0_31 = arith.constant 0 : index
    %c0_32 = arith.constant 0 : index
    %32 = vector.load %arg8[%c0_30, %c0_31, %c0_32] : memref<4x8x1xf32, #tpu.memory_space<vmem>>, vector<4x8x1xf32>
    tpu.vector_store %arg8[%c0_30, %c0_31, %c0_32], %11 {strides = array<i32>} : memref<4x8x1xf32, #tpu.memory_space<vmem>>, vector<4x8x1xf32>,
    %c0_i32_33 = arith.constant 0 : i32
    %33 = arith.cmpi eq, %arg3, %c0_i32_33 : i32
    %34 = arith.extui %33 : i1 to i32
    %c0_i32_34 = arith.constant 0 : i32
    %35 = arith.cmpi ne, %34, %c0_i32_34 : i32
    scf.if %35 {
      %c0_35 = arith.constant 0 : index
      %c0_36 = arith.constant 0 : index
      %c0_37 = arith.constant 0 : index
      %36 = vector.load %arg9[%c0_35, %c0_36, %c0_37] : memref<4x8x1xf32, #tpu.memory_space<vmem>>, vector<4x8x1xf32>
      %37 = tpu.reciprocal %36 {approx = true} : vector<4x8x1xf32> -> vector<4x8x1xf32>
      %c0_38 = arith.constant 0 : index
      %c0_39 = arith.constant 0 : index
      %c0_40 = arith.constant 0 : index
      %38 = vector.load %arg10[%c0_38, %c0_39, %c0_40] : memref<4x8x8xf32, #tpu.memory_space<vmem>>, vector<4x8x8xf32>
      %39 = vector.broadcast %37 : vector<4x8x1xf32> to vector<4x8x8xf32>
      %40 = arith.mulf %38, %39 : vector<4x8x8xf32>
      %41 = arith.truncf %40 : vector<4x8x8xf32> to vector<4x8x8xbf16>
      %c0_41 = arith.constant 0 : index
      %c0_42 = arith.constant 0 : index
      %c0_43 = arith.constant 0 : index
      %c0_44 = arith.constant 0 : index
      %42 = vector.load %arg7[%c0_41, %c0_42, %c0_43, %c0_44] : memref<1x4x8x8xbf16, #tpu.memory_space<vmem>>, vector<1x4x8x8xbf16>
      %43 = vector.shape_cast %42 : vector<1x4x8x8xbf16> to vector<4x8x8xbf16>
      %44 = vector.shape_cast %41 : vector<4x8x8xbf16> to vector<1x4x8x8xbf16>
      tpu.vector_store %arg7[%c0_41, %c0_42, %c0_43, %c0_44], %44 {strides = array<i32>} : memref<1x4x8x8xbf16, #tpu.memory_space<vmem>>, vector<1x4x8x8xbf16>,
    } else {
    }
    return
  }
  func.func @transform_0(%arg0: i32, %arg1: i32, %arg2: i32, %arg3: i32) -> (i32, i32, i32, i32) {
    %c0_i32 = arith.constant 0 : i32
    %c0_i32_0 = arith.constant 0 : i32
    return %arg0, %arg1, %arg2, %c0_i32 : i32, i32, i32, i32
  }
  func.func @transform_1(%arg0: i32, %arg1: i32, %arg2: i32, %arg3: i32) -> (i32, i32, i32, i32) {
    %c0_i32 = arith.constant 0 : i32
    %c0_i32_0 = arith.constant 0 : i32
    return %arg0, %arg1, %arg3, %c0_i32 : i32, i32, i32, i32
  }
  func.func @transform_2(%arg0: i32, %arg1: i32, %arg2: i32, %arg3: i32) -> (i32, i32, i32, i32) {
    %c0_i32 = arith.constant 0 : i32
    %c0_i32_0 = arith.constant 0 : i32
    return %arg0, %arg1, %arg3, %c0_i32 : i32, i32, i32, i32
  }
  func.func @transform_3(%arg0: i32, %arg1: i32, %arg2: i32, %arg3: i32) -> (i32, i32, i32, i32) {
    %c0_i32 = arith.constant 0 : i32
    %c0_i32_0 = arith.constant 0 : i32
    return %arg0, %arg1, %arg2, %c0_i32 : i32, i32, i32, i32
  }
}

module attributes {stable_mosaic.version = 11 : i64} {
  func.func @attn_out_kernel(%arg0: i32, %arg1: i32, %arg2: memref<1x4x8x8xbf16, #tpu.memory_space<vmem>>, %arg3: memref<4x8x32xbf16, #tpu.memory_space<vmem>>, %arg4: memref<1x32xf32, #tpu.memory_space<vmem>>, %arg5: memref<8x32xf32, #tpu.memory_space<vmem>>, %arg6: memref<8x32xf32, #tpu.memory_space<vmem>>) attributes {dimension_semantics = [#tpu.dimension_semantics<parallel>, #tpu.dimension_semantics<parallel>], iteration_bounds = array<i64: 2, 1>, scalar_prefetch = 0 : i64, scratch_operands = 0 : i64, tpu.core_type = #tpu.core_type<tc>, window_params = [{transform_indices = @transform_0, window_bounds = array<i64: 1, 4, 8, 8>}, {pipeline_mode = #tpu.pipeline_mode<synchronous>, transform_indices = @transform_1, window_bounds = array<i64: 4, 8, 32>}, {pipeline_mode = #tpu.pipeline_mode<synchronous>, transform_indices = @transform_2, window_bounds = array<i64: 1, 32>}, {transform_indices = @transform_3, window_bounds = array<i64: 8, 32>}, {transform_indices = @transform_4, window_bounds = array<i64: 8, 32>}]} {
    %c0 = arith.constant 0 : index
    %c0_0 = arith.constant 0 : index
    %0 = vector.load %arg5[%c0, %c0_0] : memref<8x32xf32, #tpu.memory_space<vmem>>, vector<8x32xf32>
    %c0_1 = arith.constant 0 : index
    %c0_2 = arith.constant 0 : index
    %1 = vector.load %arg4[%c0_1, %c0_2] : memref<1x32xf32, #tpu.memory_space<vmem>>, vector<1x32xf32>
    %2 = vector.broadcast %1 : vector<1x32xf32> to vector<8x32xf32>
    %3 = arith.addf %0, %2 : vector<8x32xf32>
    %c0_3 = arith.constant 0 : index
    %c0_4 = arith.constant 0 : index
    %c0_5 = arith.constant 0 : index
    %c0_6 = arith.constant 0 : index
    %4 = vector.load %arg2[%c0_3, %c0_4, %c0_5, %c0_6] : memref<1x4x8x8xbf16, #tpu.memory_space<vmem>>, vector<1x1x8x8xbf16>
    %5 = vector.shape_cast %4 : vector<1x1x8x8xbf16> to vector<8x8xbf16>
    %c0_7 = arith.constant 0 : index
    %c0_8 = arith.constant 0 : index
    %c0_9 = arith.constant 0 : index
    %6 = vector.load %arg3[%c0_7, %c0_8, %c0_9] : memref<4x8x32xbf16, #tpu.memory_space<vmem>>, vector<1x8x32xbf16>
    %7 = vector.shape_cast %6 : vector<1x8x32xbf16> to vector<8x32xbf16>
    %cst = arith.constant dense<0.000000e+00> : vector<8x32xf32>
    %8 = tpu.matmul %5, %7, %cst {dimension_numbers = #tpu.dot_dimension_numbers<[1], [0], [0], [1], [0, 0, 1, 1], [], []>} : vector<8x8xbf16>, vector<8x32xbf16>, vector<8x32xf32> -> vector<8x32xf32>
    %9 = arith.addf %3, %8 : vector<8x32xf32>
    %c0_10 = arith.constant 0 : index
    %c1 = arith.constant 1 : index
    %c0_11 = arith.constant 0 : index
    %c0_12 = arith.constant 0 : index
    %10 = vector.load %arg2[%c0_10, %c1, %c0_11, %c0_12] : memref<1x4x8x8xbf16, #tpu.memory_space<vmem>>, vector<1x1x8x8xbf16>
    %11 = vector.shape_cast %10 : vector<1x1x8x8xbf16> to vector<8x8xbf16>
    %c1_13 = arith.constant 1 : index
    %c0_14 = arith.constant 0 : index
    %c0_15 = arith.constant 0 : index
    %12 = vector.load %arg3[%c1_13, %c0_14, %c0_15] : memref<4x8x32xbf16, #tpu.memory_space<vmem>>, vector<1x8x32xbf16>
    %13 = vector.shape_cast %12 : vector<1x8x32xbf16> to vector<8x32xbf16>
    %cst_16 = arith.constant dense<0.000000e+00> : vector<8x32xf32>
    %14 = tpu.matmul %11, %13, %cst_16 {dimension_numbers = #tpu.dot_dimension_numbers<[1], [0], [0], [1], [0, 0, 1, 1], [], []>} : vector<8x8xbf16>, vector<8x32xbf16>, vector<8x32xf32> -> vector<8x32xf32>
    %15 = arith.addf %9, %14 : vector<8x32xf32>
    %c0_17 = arith.constant 0 : index
    %c2 = arith.constant 2 : index
    %c0_18 = arith.constant 0 : index
    %c0_19 = arith.constant 0 : index
    %16 = vector.load %arg2[%c0_17, %c2, %c0_18, %c0_19] : memref<1x4x8x8xbf16, #tpu.memory_space<vmem>>, vector<1x1x8x8xbf16>
    %17 = vector.shape_cast %16 : vector<1x1x8x8xbf16> to vector<8x8xbf16>
    %c2_20 = arith.constant 2 : index
    %c0_21 = arith.constant 0 : index
    %c0_22 = arith.constant 0 : index
    %18 = vector.load %arg3[%c2_20, %c0_21, %c0_22] : memref<4x8x32xbf16, #tpu.memory_space<vmem>>, vector<1x8x32xbf16>
    %19 = vector.shape_cast %18 : vector<1x8x32xbf16> to vector<8x32xbf16>
    %cst_23 = arith.constant dense<0.000000e+00> : vector<8x32xf32>
    %20 = tpu.matmul %17, %19, %cst_23 {dimension_numbers = #tpu.dot_dimension_numbers<[1], [0], [0], [1], [0, 0, 1, 1], [], []>} : vector<8x8xbf16>, vector<8x32xbf16>, vector<8x32xf32> -> vector<8x32xf32>
    %21 = arith.addf %15, %20 : vector<8x32xf32>
    %c0_24 = arith.constant 0 : index
    %c3 = arith.constant 3 : index
    %c0_25 = arith.constant 0 : index
    %c0_26 = arith.constant 0 : index
    %22 = vector.load %arg2[%c0_24, %c3, %c0_25, %c0_26] : memref<1x4x8x8xbf16, #tpu.memory_space<vmem>>, vector<1x1x8x8xbf16>
    %23 = vector.shape_cast %22 : vector<1x1x8x8xbf16> to vector<8x8xbf16>
    %c3_27 = arith.constant 3 : index
    %c0_28 = arith.constant 0 : index
    %c0_29 = arith.constant 0 : index
    %24 = vector.load %arg3[%c3_27, %c0_28, %c0_29] : memref<4x8x32xbf16, #tpu.memory_space<vmem>>, vector<1x8x32xbf16>
    %25 = vector.shape_cast %24 : vector<1x8x32xbf16> to vector<8x32xbf16>
    %cst_30 = arith.constant dense<0.000000e+00> : vector<8x32xf32>
    %26 = tpu.matmul %23, %25, %cst_30 {dimension_numbers = #tpu.dot_dimension_numbers<[1], [0], [0], [1], [0, 0, 1, 1], [], []>} : vector<8x8xbf16>, vector<8x32xbf16>, vector<8x32xf32> -> vector<8x32xf32>
    %27 = arith.addf %21, %26 : vector<8x32xf32>
    %c0_31 = arith.constant 0 : index
    %c0_32 = arith.constant 0 : index
    %28 = vector.load %arg6[%c0_31, %c0_32] : memref<8x32xf32, #tpu.memory_space<vmem>>, vector<8x32xf32>
    tpu.vector_store %arg6[%c0_31, %c0_32], %27 {strides = array<i32>} : memref<8x32xf32, #tpu.memory_space<vmem>>, vector<8x32xf32>,
    return
  }
  func.func @transform_0(%arg0: i32, %arg1: i32) -> (i32, i32, i32, i32) {
    %c0_i32 = arith.constant 0 : i32
    %c0_i32_0 = arith.constant 0 : i32
    %c0_i32_1 = arith.constant 0 : i32
    return %arg0, %c0_i32, %arg1, %c0_i32_0 : i32, i32, i32, i32
  }
  func.func @transform_1(%arg0: i32, %arg1: i32) -> (i32, i32, i32) {
    %c0_i32 = arith.constant 0 : i32
    %c0_i32_0 = arith.constant 0 : i32
    %c0_i32_1 = arith.constant 0 : i32
    %c0_i32_2 = arith.constant 0 : i32
    return %c0_i32, %c0_i32_0, %c0_i32_1 : i32, i32, i32
  }
  func.func @transform_2(%arg0: i32, %arg1: i32) -> (i32, i32) {
    %c0_i32 = arith.constant 0 : i32
    %c0_i32_0 = arith.constant 0 : i32
    %c0_i32_1 = arith.constant 0 : i32
    return %c0_i32, %c0_i32_0 : i32, i32
  }
  func.func @transform_3(%arg0: i32, %arg1: i32) -> (i32, i32) {
    %c1_i32 = arith.constant 1 : i32
    %0 = arith.muli %arg0, %c1_i32 : i32
    %1 = arith.addi %0, %arg1 : i32
    %c0_i32 = arith.constant 0 : i32
    %c0_i32_0 = arith.constant 0 : i32
    return %1, %c0_i32 : i32, i32
  }
  func.func @transform_4(%arg0: i32, %arg1: i32) -> (i32, i32) {
    %c1_i32 = arith.constant 1 : i32
    %0 = arith.muli %arg0, %c1_i32 : i32
    %1 = arith.addi %0, %arg1 : i32
    %c0_i32 = arith.constant 0 : i32
    %c0_i32_0 = arith.constant 0 : i32
    return %1, %c0_i32 : i32, i32
  }
}

module attributes {stable_mosaic.version = 11 : i64} {
  func.func @ln_qkv_kernel(%arg0: i32, %arg1: i32, %arg2: memref<8x32xf32, #tpu.memory_space<vmem>>, %arg3: memref<1x32xf32, #tpu.memory_space<vmem>>, %arg4: memref<1x32xf32, #tpu.memory_space<vmem>>, %arg5: memref<32x96xbf16, #tpu.memory_space<vmem>>, %arg6: memref<1x4x8x8xbf16, #tpu.memory_space<vmem>>, %arg7: memref<1x4x8x8xbf16, #tpu.memory_space<vmem>>, %arg8: memref<1x4x8x8xbf16, #tpu.memory_space<vmem>>) attributes {dimension_semantics = [#tpu.dimension_semantics<parallel>, #tpu.dimension_semantics<parallel>], iteration_bounds = array<i64: 2, 1>, scalar_prefetch = 0 : i64, scratch_operands = 0 : i64, tpu.core_type = #tpu.core_type<tc>, window_params = [{transform_indices = @transform_0, window_bounds = array<i64: 8, 32>}, {pipeline_mode = #tpu.pipeline_mode<synchronous>, transform_indices = @transform_1, window_bounds = array<i64: 1, 32>}, {pipeline_mode = #tpu.pipeline_mode<synchronous>, transform_indices = @transform_2, window_bounds = array<i64: 1, 32>}, {pipeline_mode = #tpu.pipeline_mode<synchronous>, transform_indices = @transform_3, window_bounds = array<i64: 32, 96>}, {transform_indices = @transform_4, window_bounds = array<i64: 1, 4, 8, 8>}, {transform_indices = @transform_5, window_bounds = array<i64: 1, 4, 8, 8>}, {transform_indices = @transform_6, window_bounds = array<i64: 1, 4, 8, 8>}]} {
    %c0 = arith.constant 0 : index
    %c0_0 = arith.constant 0 : index
    %0 = vector.load %arg2[%c0, %c0_0] : memref<8x32xf32, #tpu.memory_space<vmem>>, vector<8x32xf32>
    %c0_1 = arith.constant 0 : index
    %c0_2 = arith.constant 0 : index
    %1 = vector.load %arg3[%c0_1, %c0_2] : memref<1x32xf32, #tpu.memory_space<vmem>>, vector<1x32xf32>
    %c0_3 = arith.constant 0 : index
    %c0_4 = arith.constant 0 : index
    %2 = vector.load %arg4[%c0_3, %c0_4] : memref<1x32xf32, #tpu.memory_space<vmem>>, vector<1x32xf32>
    %cst = arith.constant dense<0.000000e+00> : vector<8xf32>
    %3 = vector.multi_reduction <add>, %0, %cst [1] : vector<8x32xf32> to vector<8xf32>
    %4 = vector.shape_cast %3 : vector<8xf32> to vector<8x1xf32>
    %cst_5 = arith.constant 3.200000e+01 : f32
    %5 = vector.broadcast %cst_5 : f32 to vector<8x1xf32>
    %6 = arith.divf %4, %5 : vector<8x1xf32>
    %7 = vector.broadcast %6 : vector<8x1xf32> to vector<8x32xf32>
    %8 = arith.subf %0, %7 : vector<8x32xf32>
    %9 = arith.mulf %8, %8 : vector<8x32xf32>
    %cst_6 = arith.constant dense<0.000000e+00> : vector<8xf32>
    %10 = vector.multi_reduction <add>, %9, %cst_6 [1] : vector<8x32xf32> to vector<8xf32>
    %11 = vector.shape_cast %10 : vector<8xf32> to vector<8x1xf32>
    %cst_7 = arith.constant 3.200000e+01 : f32
    %12 = vector.broadcast %cst_7 : f32 to vector<8x1xf32>
    %13 = arith.divf %11, %12 : vector<8x1xf32>
    %cst_8 = arith.constant 9.99999974E-6 : f32
    %14 = vector.broadcast %cst_8 : f32 to vector<8x1xf32>
    %15 = arith.addf %13, %14 : vector<8x1xf32>
    %16 = math.rsqrt %15 : vector<8x1xf32>
    %17 = vector.broadcast %16 : vector<8x1xf32> to vector<8x32xf32>
    %18 = arith.mulf %8, %17 : vector<8x32xf32>
    %19 = vector.broadcast %1 : vector<1x32xf32> to vector<8x32xf32>
    %20 = arith.mulf %18, %19 : vector<8x32xf32>
    %21 = vector.broadcast %2 : vector<1x32xf32> to vector<8x32xf32>
    %22 = arith.addf %20, %21 : vector<8x32xf32>
    %23 = arith.truncf %22 : vector<8x32xf32> to vector<8x32xbf16>
    %c0_9 = arith.constant 0 : index
    %c0_10 = arith.constant 0 : index
    %24 = vector.load %arg5[%c0_9, %c0_10] : memref<32x96xbf16, #tpu.memory_space<vmem>>, vector<32x96xbf16>
    %cst_11 = arith.constant dense<0.000000e+00> : vector<8x96xf32>
    %25 = tpu.matmul %23, %24, %cst_11 {dimension_numbers = #tpu.dot_dimension_numbers<[1], [0], [0], [1], [0, 0, 1, 1], [], []>} : vector<8x32xbf16>, vector<32x96xbf16>, vector<8x96xf32> -> vector<8x96xf32>
    %26 = vector.extract_strided_slice %25 {offsets = [0, 0], sizes = [8, 32], strides = [1, 1]} : vector<8x96xf32> to vector<8x32xf32>
    %cst_12 = arith.constant 0.353553385 : f32
    %27 = vector.broadcast %cst_12 : f32 to vector<8x32xf32>
    %28 = arith.mulf %26, %27 : vector<8x32xf32>
    %29 = vector.extract_strided_slice %25 {offsets = [0, 32], sizes = [8, 32], strides = [1, 1]} : vector<8x96xf32> to vector<8x32xf32>
    %30 = vector.extract_strided_slice %25 {offsets = [0, 64], sizes = [8, 32], strides = [1, 1]} : vector<8x96xf32> to vector<8x32xf32>
    %31 = vector.extract_strided_slice %28 {offsets = [0, 0], sizes = [8, 8], strides = [1, 1]} : vector<8x32xf32> to vector<8x8xf32>
    %32 = arith.truncf %31 : vector<8x8xf32> to vector<8x8xbf16>
    %c0_13 = arith.constant 0 : index
    %c0_14 = arith.constant 0 : index
    %c0_15 = arith.constant 0 : index
    %c0_16 = arith.constant 0 : index
    %33 = vector.load %arg6[%c0_13, %c0_14, %c0_15, %c0_16] : memref<1x4x8x8xbf16, #tpu.memory_space<vmem>>, vector<1x1x8x8xbf16>
    %34 = vector.shape_cast %33 : vector<1x1x8x8xbf16> to vector<8x8xbf16>
    %35 = vector.shape_cast %32 : vector<8x8xbf16> to vector<1x1x8x8xbf16>
    tpu.vector_store %arg6[%c0_13, %c0_14, %c0_15, %c0_16], %35 {strides = array<i32>} : memref<1x4x8x8xbf16, #tpu.memory_space<vmem>>, vector<1x1x8x8xbf16>,
    %36 = vector.extract_strided_slice %29 {offsets = [0, 0], sizes = [8, 8], strides = [1, 1]} : vector<8x32xf32> to vector<8x8xf32>
    %37 = arith.truncf %36 : vector<8x8xf32> to vector<8x8xbf16>
    %c0_17 = arith.constant 0 : index
    %c0_18 = arith.constant 0 : index
    %c0_19 = arith.constant 0 : index
    %c0_20 = arith.constant 0 : index
    %38 = vector.load %arg7[%c0_17, %c0_18, %c0_19, %c0_20] : memref<1x4x8x8xbf16, #tpu.memory_space<vmem>>, vector<1x1x8x8xbf16>
    %39 = vector.shape_cast %38 : vector<1x1x8x8xbf16> to vector<8x8xbf16>
    %40 = vector.shape_cast %37 : vector<8x8xbf16> to vector<1x1x8x8xbf16>
    tpu.vector_store %arg7[%c0_17, %c0_18, %c0_19, %c0_20], %40 {strides = array<i32>} : memref<1x4x8x8xbf16, #tpu.memory_space<vmem>>, vector<1x1x8x8xbf16>,
    %41 = vector.extract_strided_slice %30 {offsets = [0, 0], sizes = [8, 8], strides = [1, 1]} : vector<8x32xf32> to vector<8x8xf32>
    %42 = arith.truncf %41 : vector<8x8xf32> to vector<8x8xbf16>
    %c0_21 = arith.constant 0 : index
    %c0_22 = arith.constant 0 : index
    %c0_23 = arith.constant 0 : index
    %c0_24 = arith.constant 0 : index
    %43 = vector.load %arg8[%c0_21, %c0_22, %c0_23, %c0_24] : memref<1x4x8x8xbf16, #tpu.memory_space<vmem>>, vector<1x1x8x8xbf16>
    %44 = vector.shape_cast %43 : vector<1x1x8x8xbf16> to vector<8x8xbf16>
    %45 = vector.shape_cast %42 : vector<8x8xbf16> to vector<1x1x8x8xbf16>
    tpu.vector_store %arg8[%c0_21, %c0_22, %c0_23, %c0_24], %45 {strides = array<i32>} : memref<1x4x8x8xbf16, #tpu.memory_space<vmem>>, vector<1x1x8x8xbf16>,
    %46 = vector.extract_strided_slice %28 {offsets = [0, 8], sizes = [8, 8], strides = [1, 1]} : vector<8x32xf32> to vector<8x8xf32>
    %47 = arith.truncf %46 : vector<8x8xf32> to vector<8x8xbf16>
    %c0_25 = arith.constant 0 : index
    %c1 = arith.constant 1 : index
    %c0_26 = arith.constant 0 : index
    %c0_27 = arith.constant 0 : index
    %48 = vector.load %arg6[%c0_25, %c1, %c0_26, %c0_27] : memref<1x4x8x8xbf16, #tpu.memory_space<vmem>>, vector<1x1x8x8xbf16>
    %49 = vector.shape_cast %48 : vector<1x1x8x8xbf16> to vector<8x8xbf16>
    %50 = vector.shape_cast %47 : vector<8x8xbf16> to vector<1x1x8x8xbf16>
    tpu.vector_store %arg6[%c0_25, %c1, %c0_26, %c0_27], %50 {strides = array<i32>} : memref<1x4x8x8xbf16, #tpu.memory_space<vmem>>, vector<1x1x8x8xbf16>,
    %51 = vector.extract_strided_slice %29 {offsets = [0, 8], sizes = [8, 8], strides = [1, 1]} : vector<8x32xf32> to vector<8x8xf32>
    %52 = arith.truncf %51 : vector<8x8xf32> to vector<8x8xbf16>
    %c0_28 = arith.constant 0 : index
    %c1_29 = arith.constant 1 : index
    %c0_30 = arith.constant 0 : index
    %c0_31 = arith.constant 0 : index
    %53 = vector.load %arg7[%c0_28, %c1_29, %c0_30, %c0_31] : memref<1x4x8x8xbf16, #tpu.memory_space<vmem>>, vector<1x1x8x8xbf16>
    %54 = vector.shape_cast %53 : vector<1x1x8x8xbf16> to vector<8x8xbf16>
    %55 = vector.shape_cast %52 : vector<8x8xbf16> to vector<1x1x8x8xbf16>
    tpu.vector_store %arg7[%c0_28, %c1_29, %c0_30, %c0_31], %55 {strides = array<i32>} : memref<1x4x8x8xbf16, #tpu.memory_space<vmem>>, vector<1x1x8x8xbf16>,
    %56 = vector.extract_strided_slice %30 {offsets = [0, 8], sizes = [8, 8], strides = [1, 1]} : vector<8x32xf32> to vector<8x8xf32>
    %57 = arith.truncf %56 : vector<8x8xf32> to vector<8x8xbf16>
    %c0_32 = arith.constant 0 : index
    %c1_33 = arith.constant 1 : index
    %c0_34 = arith.constant 0 : index
    %c0_35 = arith.constant 0 : index
    %58 = vector.load %arg8[%c0_32, %c1_33, %c0_34, %c0_35] : memref<1x4x8x8xbf16, #tpu.memory_space<vmem>>, vector<1x1x8x8xbf16>
    %59 = vector.shape_cast %58 : vector<1x1x8x8xbf16> to vector<8x8xbf16>
    %60 = vector.shape_cast %57 : vector<8x8xbf16> to vector<1x1x8x8xbf16>
    tpu.vector_store %arg8[%c0_32, %c1_33, %c0_34, %c0_35], %60 {strides = array<i32>} : memref<1x4x8x8xbf16, #tpu.memory_space<vmem>>, vector<1x1x8x8xbf16>,
    %61 = vector.extract_strided_slice %28 {offsets = [0, 16], sizes = [8, 8], strides = [1, 1]} : vector<8x32xf32> to vector<8x8xf32>
    %62 = arith.truncf %61 : vector<8x8xf32> to vector<8x8xbf16>
    %c0_36 = arith.constant 0 : index
    %c2 = arith.constant 2 : index
    %c0_37 = arith.constant 0 : index
    %c0_38 = arith.constant 0 : index
    %63 = vector.load %arg6[%c0_36, %c2, %c0_37, %c0_38] : memref<1x4x8x8xbf16, #tpu.memory_space<vmem>>, vector<1x1x8x8xbf16>
    %64 = vector.shape_cast %63 : vector<1x1x8x8xbf16> to vector<8x8xbf16>
    %65 = vector.shape_cast %62 : vector<8x8xbf16> to vector<1x1x8x8xbf16>
    tpu.vector_store %arg6[%c0_36, %c2, %c0_37, %c0_38], %65 {strides = array<i32>} : memref<1x4x8x8xbf16, #tpu.memory_space<vmem>>, vector<1x1x8x8xbf16>,
    %66 = vector.extract_strided_slice %29 {offsets = [0, 16], sizes = [8, 8], strides = [1, 1]} : vector<8x32xf32> to vector<8x8xf32>
    %67 = arith.truncf %66 : vector<8x8xf32> to vector<8x8xbf16>
    %c0_39 = arith.constant 0 : index
    %c2_40 = arith.constant 2 : index
    %c0_41 = arith.constant 0 : index
    %c0_42 = arith.constant 0 : index
    %68 = vector.load %arg7[%c0_39, %c2_40, %c0_41, %c0_42] : memref<1x4x8x8xbf16, #tpu.memory_space<vmem>>, vector<1x1x8x8xbf16>
    %69 = vector.shape_cast %68 : vector<1x1x8x8xbf16> to vector<8x8xbf16>
    %70 = vector.shape_cast %67 : vector<8x8xbf16> to vector<1x1x8x8xbf16>
    tpu.vector_store %arg7[%c0_39, %c2_40, %c0_41, %c0_42], %70 {strides = array<i32>} : memref<1x4x8x8xbf16, #tpu.memory_space<vmem>>, vector<1x1x8x8xbf16>,
    %71 = vector.extract_strided_slice %30 {offsets = [0, 16], sizes = [8, 8], strides = [1, 1]} : vector<8x32xf32> to vector<8x8xf32>
    %72 = arith.truncf %71 : vector<8x8xf32> to vector<8x8xbf16>
    %c0_43 = arith.constant 0 : index
    %c2_44 = arith.constant 2 : index
    %c0_45 = arith.constant 0 : index
    %c0_46 = arith.constant 0 : index
    %73 = vector.load %arg8[%c0_43, %c2_44, %c0_45, %c0_46] : memref<1x4x8x8xbf16, #tpu.memory_space<vmem>>, vector<1x1x8x8xbf16>
    %74 = vector.shape_cast %73 : vector<1x1x8x8xbf16> to vector<8x8xbf16>
    %75 = vector.shape_cast %72 : vector<8x8xbf16> to vector<1x1x8x8xbf16>
    tpu.vector_store %arg8[%c0_43, %c2_44, %c0_45, %c0_46], %75 {strides = array<i32>} : memref<1x4x8x8xbf16, #tpu.memory_space<vmem>>, vector<1x1x8x8xbf16>,
    %76 = vector.extract_strided_slice %28 {offsets = [0, 24], sizes = [8, 8], strides = [1, 1]} : vector<8x32xf32> to vector<8x8xf32>
    %77 = arith.truncf %76 : vector<8x8xf32> to vector<8x8xbf16>
    %c0_47 = arith.constant 0 : index
    %c3 = arith.constant 3 : index
    %c0_48 = arith.constant 0 : index
    %c0_49 = arith.constant 0 : index
    %78 = vector.load %arg6[%c0_47, %c3, %c0_48, %c0_49] : memref<1x4x8x8xbf16, #tpu.memory_space<vmem>>, vector<1x1x8x8xbf16>
    %79 = vector.shape_cast %78 : vector<1x1x8x8xbf16> to vector<8x8xbf16>
    %80 = vector.shape_cast %77 : vector<8x8xbf16> to vector<1x1x8x8xbf16>
    tpu.vector_store %arg6[%c0_47, %c3, %c0_48, %c0_49], %80 {strides = array<i32>} : memref<1x4x8x8xbf16, #tpu.memory_space<vmem>>, vector<1x1x8x8xbf16>,
    %81 = vector.extract_strided_slice %29 {offsets = [0, 24], sizes = [8, 8], strides = [1, 1]} : vector<8x32xf32> to vector<8x8xf32>
    %82 = arith.truncf %81 : vector<8x8xf32> to vector<8x8xbf16>
    %c0_50 = arith.constant 0 : index
    %c3_51 = arith.constant 3 : index
    %c0_52 = arith.constant 0 : index
    %c0_53 = arith.constant 0 : index
    %83 = vector.load %arg7[%c0_50, %c3_51, %c0_52, %c0_53] : memref<1x4x8x8xbf16, #tpu.memory_space<vmem>>, vector<1x1x8x8xbf16>
    %84 = vector.shape_cast %83 : vector<1x1x8x8xbf16> to vector<8x8xbf16>
    %85 = vector.shape_cast %82 : vector<8x8xbf16> to vector<1x1x8x8xbf16>
    tpu.vector_store %arg7[%c0_50, %c3_51, %c0_52, %c0_53], %85 {strides = array<i32>} : memref<1x4x8x8xbf16, #tpu.memory_space<vmem>>, vector<1x1x8x8xbf16>,
    %86 = vector.extract_strided_slice %30 {offsets = [0, 24], sizes = [8, 8], strides = [1, 1]} : vector<8x32xf32> to vector<8x8xf32>
    %87 = arith.truncf %86 : vector<8x8xf32> to vector<8x8xbf16>
    %c0_54 = arith.constant 0 : index
    %c3_55 = arith.constant 3 : index
    %c0_56 = arith.constant 0 : index
    %c0_57 = arith.constant 0 : index
    %88 = vector.load %arg8[%c0_54, %c3_55, %c0_56, %c0_57] : memref<1x4x8x8xbf16, #tpu.memory_space<vmem>>, vector<1x1x8x8xbf16>
    %89 = vector.shape_cast %88 : vector<1x1x8x8xbf16> to vector<8x8xbf16>
    %90 = vector.shape_cast %87 : vector<8x8xbf16> to vector<1x1x8x8xbf16>
    tpu.vector_store %arg8[%c0_54, %c3_55, %c0_56, %c0_57], %90 {strides = array<i32>} : memref<1x4x8x8xbf16, #tpu.memory_space<vmem>>, vector<1x1x8x8xbf16>,
    return
  }
  func.func @transform_0(%arg0: i32, %arg1: i32) -> (i32, i32) {
    %c1_i32 = arith.constant 1 : i32
    %0 = arith.muli %arg0, %c1_i32 : i32
    %1 = arith.addi %0, %arg1 : i32
    %c0_i32 = arith.constant 0 : i32
    %c0_i32_0 = arith.constant 0 : i32
    return %1, %c0_i32 : i32, i32
  }
  func.func @transform_1(%arg0: i32, %arg1: i32) -> (i32, i32) {
    %c0_i32 = arith.constant 0 : i32
    %c0_i32_0 = arith.constant 0 : i32
    %c0_i32_1 = arith.constant 0 : i32
    return %c0_i32, %c0_i32_0 : i32, i32
  }
  func.func @transform_2(%arg0: i32, %arg1: i32) -> (i32, i32) {
    %c0_i32 = arith.constant 0 : i32
    %c0_i32_0 = arith.constant 0 : i32
    %c0_i32_1 = arith.constant 0 : i32
    return %c0_i32, %c0_i32_0 : i32, i32
  }
  func.func @transform_3(%arg0: i32, %arg1: i32) -> (i32, i32) {
    %c0_i32 = arith.constant 0 : i32
    %c0_i32_0 = arith.constant 0 : i32
    %c0_i32_1 = arith.constant 0 : i32
    return %c0_i32, %c0_i32_0 : i32, i32
  }
  func.func @transform_4(%arg0: i32, %arg1: i32) -> (i32, i32, i32, i32) {
    %c0_i32 = arith.constant 0 : i32
    %c0_i32_0 = arith.constant 0 : i32
    %c0_i32_1 = arith.constant 0 : i32
    return %arg0, %c0_i32, %arg1, %c0_i32_0 : i32, i32, i32, i32
  }
  func.func @transform_5(%arg0: i32, %arg1: i32) -> (i32, i32, i32, i32) {
    %c0_i32 = arith.constant 0 : i32
    %c0_i32_0 = arith.constant 0 : i32
    %c0_i32_1 = arith.constant 0 : i32
    return %arg0, %c0_i32, %arg1, %c0_i32_0 : i32, i32, i32, i32
  }
  func.func @transform_6(%arg0: i32, %arg1: i32) -> (i32, i32, i32, i32) {
    %c0_i32 = arith.constant 0 : i32
    %c0_i32_0 = arith.constant 0 : i32
    %c0_i32_1 = arith.constant 0 : i32
    return %arg0, %c0_i32, %arg1, %c0_i32_0 : i32, i32, i32, i32
  }
}

module attributes {stable_mosaic.version = 11 : i64} {
  func.func @ln_q_kernel(%arg0: i32, %arg1: i32, %arg2: memref<8x32xf32, #tpu.memory_space<vmem>>, %arg3: memref<1x32xf32, #tpu.memory_space<vmem>>, %arg4: memref<1x32xf32, #tpu.memory_space<vmem>>, %arg5: memref<32x32xbf16, #tpu.memory_space<vmem>>, %arg6: memref<1x4x8x8xbf16, #tpu.memory_space<vmem>>) attributes {dimension_semantics = [#tpu.dimension_semantics<parallel>, #tpu.dimension_semantics<parallel>], iteration_bounds = array<i64: 2, 1>, scalar_prefetch = 0 : i64, scratch_operands = 0 : i64, tpu.core_type = #tpu.core_type<tc>, window_params = [{transform_indices = @transform_0, window_bounds = array<i64: 8, 32>}, {pipeline_mode = #tpu.pipeline_mode<synchronous>, transform_indices = @transform_1, window_bounds = array<i64: 1, 32>}, {pipeline_mode = #tpu.pipeline_mode<synchronous>, transform_indices = @transform_2, window_bounds = array<i64: 1, 32>}, {pipeline_mode = #tpu.pipeline_mode<synchronous>, transform_indices = @transform_3, window_bounds = array<i64: 32, 32>}, {transform_indices = @transform_4, window_bounds = array<i64: 1, 4, 8, 8>}]} {
    %c0 = arith.constant 0 : index
    %c0_0 = arith.constant 0 : index
    %0 = vector.load %arg2[%c0, %c0_0] : memref<8x32xf32, #tpu.memory_space<vmem>>, vector<8x32xf32>
    %c0_1 = arith.constant 0 : index
    %c0_2 = arith.constant 0 : index
    %1 = vector.load %arg3[%c0_1, %c0_2] : memref<1x32xf32, #tpu.memory_space<vmem>>, vector<1x32xf32>
    %c0_3 = arith.constant 0 : index
    %c0_4 = arith.constant 0 : index
    %2 = vector.load %arg4[%c0_3, %c0_4] : memref<1x32xf32, #tpu.memory_space<vmem>>, vector<1x32xf32>
    %cst = arith.constant dense<0.000000e+00> : vector<8xf32>
    %3 = vector.multi_reduction <add>, %0, %cst [1] : vector<8x32xf32> to vector<8xf32>
    %4 = vector.shape_cast %3 : vector<8xf32> to vector<8x1xf32>
    %cst_5 = arith.constant 3.200000e+01 : f32
    %5 = vector.broadcast %cst_5 : f32 to vector<8x1xf32>
    %6 = arith.divf %4, %5 : vector<8x1xf32>
    %7 = vector.broadcast %6 : vector<8x1xf32> to vector<8x32xf32>
    %8 = arith.subf %0, %7 : vector<8x32xf32>
    %9 = arith.mulf %8, %8 : vector<8x32xf32>
    %cst_6 = arith.constant dense<0.000000e+00> : vector<8xf32>
    %10 = vector.multi_reduction <add>, %9, %cst_6 [1] : vector<8x32xf32> to vector<8xf32>
    %11 = vector.shape_cast %10 : vector<8xf32> to vector<8x1xf32>
    %cst_7 = arith.constant 3.200000e+01 : f32
    %12 = vector.broadcast %cst_7 : f32 to vector<8x1xf32>
    %13 = arith.divf %11, %12 : vector<8x1xf32>
    %cst_8 = arith.constant 9.99999974E-6 : f32
    %14 = vector.broadcast %cst_8 : f32 to vector<8x1xf32>
    %15 = arith.addf %13, %14 : vector<8x1xf32>
    %16 = math.rsqrt %15 : vector<8x1xf32>
    %17 = vector.broadcast %16 : vector<8x1xf32> to vector<8x32xf32>
    %18 = arith.mulf %8, %17 : vector<8x32xf32>
    %19 = vector.broadcast %1 : vector<1x32xf32> to vector<8x32xf32>
    %20 = arith.mulf %18, %19 : vector<8x32xf32>
    %21 = vector.broadcast %2 : vector<1x32xf32> to vector<8x32xf32>
    %22 = arith.addf %20, %21 : vector<8x32xf32>
    %23 = arith.truncf %22 : vector<8x32xf32> to vector<8x32xbf16>
    %c0_9 = arith.constant 0 : index
    %c0_10 = arith.constant 0 : index
    %24 = vector.load %arg5[%c0_9, %c0_10] : memref<32x32xbf16, #tpu.memory_space<vmem>>, vector<32x32xbf16>
    %cst_11 = arith.constant dense<0.000000e+00> : vector<8x32xf32>
    %25 = tpu.matmul %23, %24, %cst_11 {dimension_numbers = #tpu.dot_dimension_numbers<[1], [0], [0], [1], [0, 0, 1, 1], [], []>} : vector<8x32xbf16>, vector<32x32xbf16>, vector<8x32xf32> -> vector<8x32xf32>
    %cst_12 = arith.constant 0.353553385 : f32
    %26 = vector.broadcast %cst_12 : f32 to vector<8x32xf32>
    %27 = arith.mulf %25, %26 : vector<8x32xf32>
    %28 = vector.extract_strided_slice %27 {offsets = [0, 0], sizes = [8, 8], strides = [1, 1]} : vector<8x32xf32> to vector<8x8xf32>
    %29 = arith.truncf %28 : vector<8x8xf32> to vector<8x8xbf16>
    %c0_13 = arith.constant 0 : index
    %c0_14 = arith.constant 0 : index
    %c0_15 = arith.constant 0 : index
    %c0_16 = arith.constant 0 : index
    %30 = vector.load %arg6[%c0_13, %c0_14, %c0_15, %c0_16] : memref<1x4x8x8xbf16, #tpu.memory_space<vmem>>, vector<1x1x8x8xbf16>
    %31 = vector.shape_cast %30 : vector<1x1x8x8xbf16> to vector<8x8xbf16>
    %32 = vector.shape_cast %29 : vector<8x8xbf16> to vector<1x1x8x8xbf16>
    tpu.vector_store %arg6[%c0_13, %c0_14, %c0_15, %c0_16], %32 {strides = array<i32>} : memref<1x4x8x8xbf16, #tpu.memory_space<vmem>>, vector<1x1x8x8xbf16>,
    %33 = vector.extract_strided_slice %27 {offsets = [0, 8], sizes = [8, 8], strides = [1, 1]} : vector<8x32xf32> to vector<8x8xf32>
    %34 = arith.truncf %33 : vector<8x8xf32> to vector<8x8xbf16>
    %c0_17 = arith.constant 0 : index
    %c1 = arith.constant 1 : index
    %c0_18 = arith.constant 0 : index
    %c0_19 = arith.constant 0 : index
    %35 = vector.load %arg6[%c0_17, %c1, %c0_18, %c0_19] : memref<1x4x8x8xbf16, #tpu.memory_space<vmem>>, vector<1x1x8x8xbf16>
    %36 = vector.shape_cast %35 : vector<1x1x8x8xbf16> to vector<8x8xbf16>
    %37 = vector.shape_cast %34 : vector<8x8xbf16> to vector<1x1x8x8xbf16>
    tpu.vector_store %arg6[%c0_17, %c1, %c0_18, %c0_19], %37 {strides = array<i32>} : memref<1x4x8x8xbf16, #tpu.memory_space<vmem>>, vector<1x1x8x8xbf16>,
    %38 = vector.extract_strided_slice %27 {offsets = [0, 16], sizes = [8, 8], strides = [1, 1]} : vector<8x32xf32> to vector<8x8xf32>
    %39 = arith.truncf %38 : vector<8x8xf32> to vector<8x8xbf16>
    %c0_20 = arith.constant 0 : index
    %c2 = arith.constant 2 : index
    %c0_21 = arith.constant 0 : index
    %c0_22 = arith.constant 0 : index
    %40 = vector.load %arg6[%c0_20, %c2, %c0_21, %c0_22] : memref<1x4x8x8xbf16, #tpu.memory_space<vmem>>, vector<1x1x8x8xbf16>
    %41 = vector.shape_cast %40 : vector<1x1x8x8xbf16> to vector<8x8xbf16>
    %42 = vector.shape_cast %39 : vector<8x8xbf16> to vector<1x1x8x8xbf16>
    tpu.vector_store %arg6[%c0_20, %c2, %c0_21, %c0_22], %42 {strides = array<i32>} : memref<1x4x8x8xbf16, #tpu.memory_space<vmem>>, vector<1x1x8x8xbf16>,
    %43 = vector.extract_strided_slice %27 {offsets = [0, 24], sizes = [8, 8], strides = [1, 1]} : vector<8x32xf32> to vector<8x8xf32>
    %44 = arith.truncf %43 : vector<8x8xf32> to vector<8x8xbf16>
    %c0_23 = arith.constant 0 : index
    %c3 = arith.constant 3 : index
    %c0_24 = arith.constant 0 : index
    %c0_25 = arith.constant 0 : index
    %45 = vector.load %arg6[%c0_23, %c3, %c0_24, %c0_25] : memref<1x4x8x8xbf16, #tpu.memory_space<vmem>>, vector<1x1x8x8xbf16>
    %46 = vector.shape_cast %45 : vector<1x1x8x8xbf16> to vector<8x8xbf16>
    %47 = vector.shape_cast %44 : vector<8x8xbf16> to vector<1x1x8x8xbf16>
    tpu.vector_store %arg6[%c0_23, %c3, %c0_24, %c0_25], %47 {strides = array<i32>} : memref<1x4x8x8xbf16, #tpu.memory_space<vmem>>, vector<1x1x8x8xbf16>,
    return
  }
  func.func @transform_0(%arg0: i32, %arg1: i32) -> (i32, i32) {
    %c1_i32 = arith.constant 1 : i32
    %0 = arith.muli %arg0, %c1_i32 : i32
    %1 = arith.addi %0, %arg1 : i32
    %c0_i32 = arith.constant 0 : i32
    %c0_i32_0 = arith.constant 0 : i32
    return %1, %c0_i32 : i32, i32
  }
  func.func @transform_1(%arg0: i32, %arg1: i32) -> (i32, i32) {
    %c0_i32 = arith.constant 0 : i32
    %c0_i32_0 = arith.constant 0 : i32
    %c0_i32_1 = arith.constant 0 : i32
    return %c0_i32, %c0_i32_0 : i32, i32
  }
  func.func @transform_2(%arg0: i32, %arg1: i32) -> (i32, i32) {
    %c0_i32 = arith.constant 0 : i32
    %c0_i32_0 = arith.constant 0 : i32
    %c0_i32_1 = arith.constant 0 : i32
    return %c0_i32, %c0_i32_0 : i32, i32
  }
  func.func @transform_3(%arg0: i32, %arg1: i32) -> (i32, i32) {
    %c0_i32 = arith.constant 0 : i32
    %c0_i32_0 = arith.constant 0 : i32
    %c0_i32_1 = arith.constant 0 : i32
    return %c0_i32, %c0_i32_0 : i32, i32
  }
  func.func @transform_4(%arg0: i32, %arg1: i32) -> (i32, i32, i32, i32) {
    %c0_i32 = arith.constant 0 : i32
    %c0_i32_0 = arith.constant 0 : i32
    %c0_i32_1 = arith.constant 0 : i32
    return %arg0, %c0_i32, %arg1, %c0_i32_0 : i32, i32, i32, i32
  }
}

module attributes {stable_mosaic.version = 11 : i64} {
  func.func @flash_attn_kernel(%arg0: i32, %arg1: i32, %arg2: i32, %arg3: i32, %arg4: memref<1x4x8x8xbf16, #tpu.memory_space<vmem>>, %arg5: memref<1x4x16x8xbf16, #tpu.memory_space<vmem>>, %arg6: memref<1x4x16x8xbf16, #tpu.memory_space<vmem>>, %arg7: memref<1x4x8x8xbf16, #tpu.memory_space<vmem>>, %arg8: memref<4x8x1xf32, #tpu.memory_space<vmem>>, %arg9: memref<4x8x1xf32, #tpu.memory_space<vmem>>, %arg10: memref<4x8x8xf32, #tpu.memory_space<vmem>>) attributes {dimension_semantics = [#tpu.dimension_semantics<parallel>, #tpu.dimension_semantics<parallel>, #tpu.dimension_semantics<parallel>, #tpu.dimension_semantics<arbitrary>], iteration_bounds = array<i64: 2, 1, 1, 1>, scalar_prefetch = 0 : i64, scratch_operands = 3 : i64, tpu.core_type = #tpu.core_type<tc>, window_params = [{transform_indices = @transform_0, window_bounds = array<i64: 1, 4, 8, 8>}, {transform_indices = @transform_1, window_bounds = array<i64: 1, 4, 16, 8>}, {transform_indices = @transform_2, window_bounds = array<i64: 1, 4, 16, 8>}, {transform_indices = @transform_3, window_bounds = array<i64: 1, 4, 8, 8>}]} {
    %c0_i32 = arith.constant 0 : i32
    %0 = arith.cmpi eq, %arg3, %c0_i32 : i32
    %1 = arith.extui %0 : i1 to i32
    %c0_i32_0 = arith.constant 0 : i32
    %2 = arith.cmpi ne, %1, %c0_i32_0 : i32
    scf.if %2 {
      %cst_35 = arith.constant 0xFF800000 : f32
      %36 = vector.broadcast %cst_35 : f32 to vector<4x8x1xf32>
      %c0_36 = arith.constant 0 : index
      %c0_37 = arith.constant 0 : index
      %c0_38 = arith.constant 0 : index
      %37 = vector.load %arg8[%c0_36, %c0_37, %c0_38] : memref<4x8x1xf32, #tpu.memory_space<vmem>>, vector<4x8x1xf32>
      tpu.vector_store %arg8[%c0_36, %c0_37, %c0_38], %36 {strides = array<i32>} : memref<4x8x1xf32, #tpu.memory_space<vmem>>, vector<4x8x1xf32>,
      %cst_39 = arith.constant 0.000000e+00 : f32
      %38 = vector.broadcast %cst_39 : f32 to vector<4x8x1xf32>
      %c0_40 = arith.constant 0 : index
      %c0_41 = arith.constant 0 : index
      %c0_42 = arith.constant 0 : index
      %39 = vector.load %arg9[%c0_40, %c0_41, %c0_42] : memref<4x8x1xf32, #tpu.memory_space<vmem>>, vector<4x8x1xf32>
      tpu.vector_store %arg9[%c0_40, %c0_41, %c0_42], %38 {strides = array<i32>} : memref<4x8x1xf32, #tpu.memory_space<vmem>>, vector<4x8x1xf32>,
      %cst_43 = arith.constant 0.000000e+00 : f32
      %40 = vector.broadcast %cst_43 : f32 to vector<4x8x8xf32>
      %c0_44 = arith.constant 0 : index
      %c0_45 = arith.constant 0 : index
      %c0_46 = arith.constant 0 : index
      %41 = vector.load %arg10[%c0_44, %c0_45, %c0_46] : memref<4x8x8xf32, #tpu.memory_space<vmem>>, vector<4x8x8xf32>
      tpu.vector_store %arg10[%c0_44, %c0_45, %c0_46], %40 {strides = array<i32>} : memref<4x8x8xf32, #tpu.memory_space<vmem>>, vector<4x8x8xf32>,
    } else {
    }
    %c0 = arith.constant 0 : index
    %c0_1 = arith.constant 0 : index
    %c0_2 = arith.constant 0 : index
    %c0_3 = arith.constant 0 : index
    %3 = vector.load %arg4[%c0, %c0_1, %c0_2, %c0_3] : memref<1x4x8x8xbf16, #tpu.memory_space<vmem>>, vector<1x4x8x8xbf16>
    %4 = vector.shape_cast %3 : vector<1x4x8x8xbf16> to vector<4x8x8xbf16>
    %c0_4 = arith.constant 0 : index
    %c0_5 = arith.constant 0 : index
    %c0_6 = arith.constant 0 : index
    %c0_7 = arith.constant 0 : index
    %5 = vector.load %arg5[%c0_4, %c0_5, %c0_6, %c0_7] : memref<1x4x16x8xbf16, #tpu.memory_space<vmem>>, vector<1x4x16x8xbf16>
    %6 = vector.shape_cast %5 : vector<1x4x16x8xbf16> to vector<4x16x8xbf16>
    %cst = arith.constant dense<0.000000e+00> : vector<4x8x16xf32>
    %7 = tpu.matmul %4, %6, %cst {dimension_numbers = #tpu.dot_dimension_numbers<[2], [2], [1], [1], [0, 0, 0, 1, 1, 1], [0], [0]>} : vector<4x8x8xbf16>, vector<4x16x8xbf16>, vector<4x8x16xf32> -> vector<4x8x16xf32>
    %c0_8 = arith.constant 0 : index
    %c0_9 = arith.constant 0 : index
    %c0_10 = arith.constant 0 : index
    %8 = vector.load %arg8[%c0_8, %c0_9, %c0_10] : memref<4x8x1xf32, #tpu.memory_space<vmem>>, vector<4x8x1xf32>
    %cst_11 = arith.constant dense<0xFF800000> : vector<4x8xf32>
    %9 = vector.multi_reduction <maximumf>, %7, %cst_11 [2] : vector<4x8x16xf32> to vector<4x8xf32>
    %10 = vector.shape_cast %9 : vector<4x8xf32> to vector<4x8x1xf32>
    %11 = arith.maximumf %8, %10 : vector<4x8x1xf32>
    %12 = arith.subf %8, %11 : vector<4x8x1xf32>
    %13 = math.exp %12 : vector<4x8x1xf32>
    %14 = vector.broadcast %11 : vector<4x8x1xf32> to vector<4x8x16xf32>
    %15 = arith.subf %7, %14 : vector<4x8x16xf32>
    %16 = math.exp %15 : vector<4x8x16xf32>
    %c0_12 = arith.constant 0 : index
    %c0_13 = arith.constant 0 : index
    %c0_14 = arith.constant 0 : index
    %17 = vector.load %arg9[%c0_12, %c0_13, %c0_14] : memref<4x8x1xf32, #tpu.memory_space<vmem>>, vector<4x8x1xf32>
    %18 = arith.mulf %13, %17 : vector<4x8x1xf32>
    %cst_15 = arith.constant dense<0.000000e+00> : vector<4x8xf32>
    %19 = vector.multi_reduction <add>, %16, %cst_15 [2] : vector<4x8x16xf32> to vector<4x8xf32>
    %20 = vector.shape_cast %19 : vector<4x8xf32> to vector<4x8x1xf32>
    %21 = arith.addf %18, %20 : vector<4x8x1xf32>
    %c0_16 = arith.constant 0 : index
    %c0_17 = arith.constant 0 : index
    %c0_18 = arith.constant 0 : index
    %22 = vector.load %arg9[%c0_16, %c0_17, %c0_18] : memref<4x8x1xf32, #tpu.memory_space<vmem>>, vector<4x8x1xf32>
    tpu.vector_store %arg9[%c0_16, %c0_17, %c0_18], %21 {strides = array<i32>} : memref<4x8x1xf32, #tpu.memory_space<vmem>>, vector<4x8x1xf32>,
    %23 = arith.truncf %16 : vector<4x8x16xf32> to vector<4x8x16xbf16>
    %c0_19 = arith.constant 0 : index
    %c0_20 = arith.constant 0 : index
    %c0_21 = arith.constant 0 : index
    %c0_22 = arith.constant 0 : index
    %24 = vector.load %arg6[%c0_19, %c0_20, %c0_21, %c0_22] : memref<1x4x16x8xbf16, #tpu.memory_space<vmem>>, vector<1x4x16x8xbf16>
    %25 = vector.shape_cast %24 : vector<1x4x16x8xbf16> to vector<4x16x8xbf16>
    %cst_23 = arith.constant dense<0.000000e+00> : vector<4x8x8xf32>
    %26 = tpu.matmul %23, %25, %cst_23 {dimension_numbers = #tpu.dot_dimension_numbers<[2], [1], [1], [2], [0, 0, 0, 1, 1, 2], [0], [0]>} : vector<4x8x16xbf16>, vector<4x16x8xbf16>, vector<4x8x8xf32> -> vector<4x8x8xf32>
    %c0_24 = arith.constant 0 : index
    %c0_25 = arith.constant 0 : index
    %c0_26 = arith.constant 0 : index
    %27 = vector.load %arg10[%c0_24, %c0_25, %c0_26] : memref<4x8x8xf32, #tpu.memory_space<vmem>>, vector<4x8x8xf32>
    %28 = vector.broadcast %13 : vector<4x8x1xf32> to vector<4x8x8xf32>
    %29 = arith.mulf %28, %27 : vector<4x8x8xf32>
    %30 = arith.addf %29, %26 : vector<4x8x8xf32>
    %c0_27 = arith.constant 0 : index
    %c0_28 = arith.constant 0 : index
    %c0_29 = arith.constant 0 : index
    %31 = vector.load %arg10[%c0_27, %c0_28, %c0_29] : memref<4x8x8xf32, #tpu.memory_space<vmem>>, vector<4x8x8xf32>
    tpu.vector_store %arg10[%c0_27, %c0_28, %c0_29], %30 {strides = array<i32>} : memref<4x8x8xf32, #tpu.memory_space<vmem>>, vector<4x8x8xf32>,
    %c0_30 = arith.constant 0 : index
    %c0_31 = arith.constant 0 : index
    %c0_32 = arith.constant 0 : index
    %32 = vector.load %arg8[%c0_30, %c0_31, %c0_32] : memref<4x8x1xf32, #tpu.memory_space<vmem>>, vector<4x8x1xf32>
    tpu.vector_store %arg8[%c0_30, %c0_31, %c0_32], %11 {strides = array<i32>} : memref<4x8x1xf32, #tpu.memory_space<vmem>>, vector<4x8x1xf32>,
    %c0_i32_33 = arith.constant 0 : i32
    %33 = arith.cmpi eq, %arg3, %c0_i32_33 : i32
    %34 = arith.extui %33 : i1 to i32
    %c0_i32_34 = arith.constant 0 : i32
    %35 = arith.cmpi ne, %34, %c0_i32_34 : i32
    scf.if %35 {
      %c0_35 = arith.constant 0 : index
      %c0_36 = arith.constant 0 : index
      %c0_37 = arith.constant 0 : index
      %36 = vector.load %arg9[%c0_35, %c0_36, %c0_37] : memref<4x8x1xf32, #tpu.memory_space<vmem>>, vector<4x8x1xf32>
      %37 = tpu.reciprocal %36 {approx = true} : vector<4x8x1xf32> -> vector<4x8x1xf32>
      %c0_38 = arith.constant 0 : index
      %c0_39 = arith.constant 0 : index
      %c0_40 = arith.constant 0 : index
      %38 = vector.load %arg10[%c0_38, %c0_39, %c0_40] : memref<4x8x8xf32, #tpu.memory_space<vmem>>, vector<4x8x8xf32>
      %39 = vector.broadcast %37 : vector<4x8x1xf32> to vector<4x8x8xf32>
      %40 = arith.mulf %38, %39 : vector<4x8x8xf32>
      %41 = arith.truncf %40 : vector<4x8x8xf32> to vector<4x8x8xbf16>
      %c0_41 = arith.constant 0 : index
      %c0_42 = arith.constant 0 : index
      %c0_43 = arith.constant 0 : index
      %c0_44 = arith.constant 0 : index
      %42 = vector.load %arg7[%c0_41, %c0_42, %c0_43, %c0_44] : memref<1x4x8x8xbf16, #tpu.memory_space<vmem>>, vector<1x4x8x8xbf16>
      %43 = vector.shape_cast %42 : vector<1x4x8x8xbf16> to vector<4x8x8xbf16>
      %44 = vector.shape_cast %41 : vector<4x8x8xbf16> to vector<1x4x8x8xbf16>
      tpu.vector_store %arg7[%c0_41, %c0_42, %c0_43, %c0_44], %44 {strides = array<i32>} : memref<1x4x8x8xbf16, #tpu.memory_space<vmem>>, vector<1x4x8x8xbf16>,
    } else {
    }
    return
  }
  func.func @transform_0(%arg0: i32, %arg1: i32, %arg2: i32, %arg3: i32) -> (i32, i32, i32, i32) {
    %c0_i32 = arith.constant 0 : i32
    %c0_i32_0 = arith.constant 0 : i32
    return %arg0, %arg1, %arg2, %c0_i32 : i32, i32, i32, i32
  }
  func.func @transform_1(%arg0: i32, %arg1: i32, %arg2: i32, %arg3: i32) -> (i32, i32, i32, i32) {
    %c0_i32 = arith.constant 0 : i32
    %c0_i32_0 = arith.constant 0 : i32
    return %arg0, %arg1, %arg3, %c0_i32 : i32, i32, i32, i32
  }
  func.func @transform_2(%arg0: i32, %arg1: i32, %arg2: i32, %arg3: i32) -> (i32, i32, i32, i32) {
    %c0_i32 = arith.constant 0 : i32
    %c0_i32_0 = arith.constant 0 : i32
    return %arg0, %arg1, %arg3, %c0_i32 : i32, i32, i32, i32
  }
  func.func @transform_3(%arg0: i32, %arg1: i32, %arg2: i32, %arg3: i32) -> (i32, i32, i32, i32) {
    %c0_i32 = arith.constant 0 : i32
    %c0_i32_0 = arith.constant 0 : i32
    return %arg0, %arg1, %arg2, %c0_i32 : i32, i32, i32, i32
  }
}

module attributes {stable_mosaic.version = 11 : i64} {
  func.func @kv_kernel(%arg0: i32, %arg1: i32, %arg2: memref<16x32xf32, #tpu.memory_space<vmem>>, %arg3: memref<32x64xbf16, #tpu.memory_space<vmem>>, %arg4: memref<1x4x16x8xbf16, #tpu.memory_space<vmem>>, %arg5: memref<1x4x16x8xbf16, #tpu.memory_space<vmem>>) attributes {dimension_semantics = [#tpu.dimension_semantics<parallel>, #tpu.dimension_semantics<parallel>], iteration_bounds = array<i64: 2, 1>, scalar_prefetch = 0 : i64, scratch_operands = 0 : i64, tpu.core_type = #tpu.core_type<tc>, window_params = [{transform_indices = @transform_0, window_bounds = array<i64: 16, 32>}, {pipeline_mode = #tpu.pipeline_mode<synchronous>, transform_indices = @transform_1, window_bounds = array<i64: 32, 64>}, {transform_indices = @transform_2, window_bounds = array<i64: 1, 4, 16, 8>}, {transform_indices = @transform_3, window_bounds = array<i64: 1, 4, 16, 8>}]} {
    %c0 = arith.constant 0 : index
    %c0_0 = arith.constant 0 : index
    %0 = vector.load %arg2[%c0, %c0_0] : memref<16x32xf32, #tpu.memory_space<vmem>>, vector<16x32xf32>
    %1 = arith.truncf %0 : vector<16x32xf32> to vector<16x32xbf16>
    %c0_1 = arith.constant 0 : index
    %c0_2 = arith.constant 0 : index
    %2 = vector.load %arg3[%c0_1, %c0_2] : memref<32x64xbf16, #tpu.memory_space<vmem>>, vector<32x64xbf16>
    %cst = arith.constant dense<0.000000e+00> : vector<16x64xf32>
    %3 = tpu.matmul %1, %2, %cst {dimension_numbers = #tpu.dot_dimension_numbers<[1], [0], [0], [1], [0, 0, 1, 1], [], []>} : vector<16x32xbf16>, vector<32x64xbf16>, vector<16x64xf32> -> vector<16x64xf32>
    %4 = vector.extract_strided_slice %3 {offsets = [0, 0], sizes = [16, 8], strides = [1, 1]} : vector<16x64xf32> to vector<16x8xf32>
    %5 = arith.truncf %4 : vector<16x8xf32> to vector<16x8xbf16>
    %c0_3 = arith.constant 0 : index
    %c0_4 = arith.constant 0 : index
    %c0_5 = arith.constant 0 : index
    %c0_6 = arith.constant 0 : index
    %6 = vector.load %arg4[%c0_3, %c0_4, %c0_5, %c0_6] : memref<1x4x16x8xbf16, #tpu.memory_space<vmem>>, vector<1x1x16x8xbf16>
    %7 = vector.shape_cast %6 : vector<1x1x16x8xbf16> to vector<16x8xbf16>
    %8 = vector.shape_cast %5 : vector<16x8xbf16> to vector<1x1x16x8xbf16>
    tpu.vector_store %arg4[%c0_3, %c0_4, %c0_5, %c0_6], %8 {strides = array<i32>} : memref<1x4x16x8xbf16, #tpu.memory_space<vmem>>, vector<1x1x16x8xbf16>,
    %9 = vector.extract_strided_slice %3 {offsets = [0, 32], sizes = [16, 8], strides = [1, 1]} : vector<16x64xf32> to vector<16x8xf32>
    %10 = arith.truncf %9 : vector<16x8xf32> to vector<16x8xbf16>
    %c0_7 = arith.constant 0 : index
    %c0_8 = arith.constant 0 : index
    %c0_9 = arith.constant 0 : index
    %c0_10 = arith.constant 0 : index
    %11 = vector.load %arg5[%c0_7, %c0_8, %c0_9, %c0_10] : memref<1x4x16x8xbf16, #tpu.memory_space<vmem>>, vector<1x1x16x8xbf16>
    %12 = vector.shape_cast %11 : vector<1x1x16x8xbf16> to vector<16x8xbf16>
    %13 = vector.shape_cast %10 : vector<16x8xbf16> to vector<1x1x16x8xbf16>
    tpu.vector_store %arg5[%c0_7, %c0_8, %c0_9, %c0_10], %13 {strides = array<i32>} : memref<1x4x16x8xbf16, #tpu.memory_space<vmem>>, vector<1x1x16x8xbf16>,
    %14 = vector.extract_strided_slice %3 {offsets = [0, 8], sizes = [16, 8], strides = [1, 1]} : vector<16x64xf32> to vector<16x8xf32>
    %15 = arith.truncf %14 : vector<16x8xf32> to vector<16x8xbf16>
    %c0_11 = arith.constant 0 : index
    %c1 = arith.constant 1 : index
    %c0_12 = arith.constant 0 : index
    %c0_13 = arith.constant 0 : index
    %16 = vector.load %arg4[%c0_11, %c1, %c0_12, %c0_13] : memref<1x4x16x8xbf16, #tpu.memory_space<vmem>>, vector<1x1x16x8xbf16>
    %17 = vector.shape_cast %16 : vector<1x1x16x8xbf16> to vector<16x8xbf16>
    %18 = vector.shape_cast %15 : vector<16x8xbf16> to vector<1x1x16x8xbf16>
    tpu.vector_store %arg4[%c0_11, %c1, %c0_12, %c0_13], %18 {strides = array<i32>} : memref<1x4x16x8xbf16, #tpu.memory_space<vmem>>, vector<1x1x16x8xbf16>,
    %19 = vector.extract_strided_slice %3 {offsets = [0, 40], sizes = [16, 8], strides = [1, 1]} : vector<16x64xf32> to vector<16x8xf32>
    %20 = arith.truncf %19 : vector<16x8xf32> to vector<16x8xbf16>
    %c0_14 = arith.constant 0 : index
    %c1_15 = arith.constant 1 : index
    %c0_16 = arith.constant 0 : index
    %c0_17 = arith.constant 0 : index
    %21 = vector.load %arg5[%c0_14, %c1_15, %c0_16, %c0_17] : memref<1x4x16x8xbf16, #tpu.memory_space<vmem>>, vector<1x1x16x8xbf16>
    %22 = vector.shape_cast %21 : vector<1x1x16x8xbf16> to vector<16x8xbf16>
    %23 = vector.shape_cast %20 : vector<16x8xbf16> to vector<1x1x16x8xbf16>
    tpu.vector_store %arg5[%c0_14, %c1_15, %c0_16, %c0_17], %23 {strides = array<i32>} : memref<1x4x16x8xbf16, #tpu.memory_space<vmem>>, vector<1x1x16x8xbf16>,
    %24 = vector.extract_strided_slice %3 {offsets = [0, 16], sizes = [16, 8], strides = [1, 1]} : vector<16x64xf32> to vector<16x8xf32>
    %25 = arith.truncf %24 : vector<16x8xf32> to vector<16x8xbf16>
    %c0_18 = arith.constant 0 : index
    %c2 = arith.constant 2 : index
    %c0_19 = arith.constant 0 : index
    %c0_20 = arith.constant 0 : index
    %26 = vector.load %arg4[%c0_18, %c2, %c0_19, %c0_20] : memref<1x4x16x8xbf16, #tpu.memory_space<vmem>>, vector<1x1x16x8xbf16>
    %27 = vector.shape_cast %26 : vector<1x1x16x8xbf16> to vector<16x8xbf16>
    %28 = vector.shape_cast %25 : vector<16x8xbf16> to vector<1x1x16x8xbf16>
    tpu.vector_store %arg4[%c0_18, %c2, %c0_19, %c0_20], %28 {strides = array<i32>} : memref<1x4x16x8xbf16, #tpu.memory_space<vmem>>, vector<1x1x16x8xbf16>,
    %29 = vector.extract_strided_slice %3 {offsets = [0, 48], sizes = [16, 8], strides = [1, 1]} : vector<16x64xf32> to vector<16x8xf32>
    %30 = arith.truncf %29 : vector<16x8xf32> to vector<16x8xbf16>
    %c0_21 = arith.constant 0 : index
    %c2_22 = arith.constant 2 : index
    %c0_23 = arith.constant 0 : index
    %c0_24 = arith.constant 0 : index
    %31 = vector.load %arg5[%c0_21, %c2_22, %c0_23, %c0_24] : memref<1x4x16x8xbf16, #tpu.memory_space<vmem>>, vector<1x1x16x8xbf16>
    %32 = vector.shape_cast %31 : vector<1x1x16x8xbf16> to vector<16x8xbf16>
    %33 = vector.shape_cast %30 : vector<16x8xbf16> to vector<1x1x16x8xbf16>
    tpu.vector_store %arg5[%c0_21, %c2_22, %c0_23, %c0_24], %33 {strides = array<i32>} : memref<1x4x16x8xbf16, #tpu.memory_space<vmem>>, vector<1x1x16x8xbf16>,
    %34 = vector.extract_strided_slice %3 {offsets = [0, 24], sizes = [16, 8], strides = [1, 1]} : vector<16x64xf32> to vector<16x8xf32>
    %35 = arith.truncf %34 : vector<16x8xf32> to vector<16x8xbf16>
    %c0_25 = arith.constant 0 : index
    %c3 = arith.constant 3 : index
    %c0_26 = arith.constant 0 : index
    %c0_27 = arith.constant 0 : index
    %36 = vector.load %arg4[%c0_25, %c3, %c0_26, %c0_27] : memref<1x4x16x8xbf16, #tpu.memory_space<vmem>>, vector<1x1x16x8xbf16>
    %37 = vector.shape_cast %36 : vector<1x1x16x8xbf16> to vector<16x8xbf16>
    %38 = vector.shape_cast %35 : vector<16x8xbf16> to vector<1x1x16x8xbf16>
    tpu.vector_store %arg4[%c0_25, %c3, %c0_26, %c0_27], %38 {strides = array<i32>} : memref<1x4x16x8xbf16, #tpu.memory_space<vmem>>, vector<1x1x16x8xbf16>,
    %39 = vector.extract_strided_slice %3 {offsets = [0, 56], sizes = [16, 8], strides = [1, 1]} : vector<16x64xf32> to vector<16x8xf32>
    %40 = arith.truncf %39 : vector<16x8xf32> to vector<16x8xbf16>
    %c0_28 = arith.constant 0 : index
    %c3_29 = arith.constant 3 : index
    %c0_30 = arith.constant 0 : index
    %c0_31 = arith.constant 0 : index
    %41 = vector.load %arg5[%c0_28, %c3_29, %c0_30, %c0_31] : memref<1x4x16x8xbf16, #tpu.memory_space<vmem>>, vector<1x1x16x8xbf16>
    %42 = vector.shape_cast %41 : vector<1x1x16x8xbf16> to vector<16x8xbf16>
    %43 = vector.shape_cast %40 : vector<16x8xbf16> to vector<1x1x16x8xbf16>
    tpu.vector_store %arg5[%c0_28, %c3_29, %c0_30, %c0_31], %43 {strides = array<i32>} : memref<1x4x16x8xbf16, #tpu.memory_space<vmem>>, vector<1x1x16x8xbf16>,
    return
  }
  func.func @transform_0(%arg0: i32, %arg1: i32) -> (i32, i32) {
    %c1_i32 = arith.constant 1 : i32
    %0 = arith.muli %arg0, %c1_i32 : i32
    %1 = arith.addi %0, %arg1 : i32
    %c0_i32 = arith.constant 0 : i32
    %c0_i32_0 = arith.constant 0 : i32
    return %1, %c0_i32 : i32, i32
  }
  func.func @transform_1(%arg0: i32, %arg1: i32) -> (i32, i32) {
    %c0_i32 = arith.constant 0 : i32
    %c0_i32_0 = arith.constant 0 : i32
    %c0_i32_1 = arith.constant 0 : i32
    return %c0_i32, %c0_i32_0 : i32, i32
  }
  func.func @transform_2(%arg0: i32, %arg1: i32) -> (i32, i32, i32, i32) {
    %c0_i32 = arith.constant 0 : i32
    %c0_i32_0 = arith.constant 0 : i32
    %c0_i32_1 = arith.constant 0 : i32
    return %arg0, %c0_i32, %arg1, %c0_i32_0 : i32, i32, i32, i32
  }
  func.func @transform_3(%arg0: i32, %arg1: i32) -> (i32, i32, i32, i32) {
    %c0_i32 = arith.constant 0 : i32
    %c0_i32_0 = arith.constant 0 : i32
    %c0_i32_1 = arith.constant 0 : i32
    return %arg0, %c0_i32, %arg1, %c0_i32_0 : i32, i32, i32, i32
  }
}

module attributes {stable_mosaic.version = 11 : i64} {
  func.func @ln_geglu_kernel(%arg0: i32, %arg1: i32, %arg2: memref<16x32xf32, #tpu.memory_space<vmem>>, %arg3: memref<1x32xf32, #tpu.memory_space<vmem>>, %arg4: memref<1x32xf32, #tpu.memory_space<vmem>>, %arg5: memref<32x128xbf16, #tpu.memory_space<vmem>>, %arg6: memref<32x128xbf16, #tpu.memory_space<vmem>>, %arg7: memref<1x128xf32, #tpu.memory_space<vmem>>, %arg8: memref<1x128xf32, #tpu.memory_space<vmem>>, %arg9: memref<16x128xbf16, #tpu.memory_space<vmem>>) attributes {dimension_semantics = [#tpu.dimension_semantics<parallel>, #tpu.dimension_semantics<parallel>], iteration_bounds = array<i64: 1, 1>, scalar_prefetch = 0 : i64, scratch_operands = 0 : i64, tpu.core_type = #tpu.core_type<tc>, window_params = [{transform_indices = @transform_0, window_bounds = array<i64: 16, 32>}, {pipeline_mode = #tpu.pipeline_mode<synchronous>, transform_indices = @transform_1, window_bounds = array<i64: 1, 32>}, {pipeline_mode = #tpu.pipeline_mode<synchronous>, transform_indices = @transform_2, window_bounds = array<i64: 1, 32>}, {transform_indices = @transform_3, window_bounds = array<i64: 32, 128>}, {transform_indices = @transform_4, window_bounds = array<i64: 32, 128>}, {transform_indices = @transform_5, window_bounds = array<i64: 1, 128>}, {transform_indices = @transform_6, window_bounds = array<i64: 1, 128>}, {transform_indices = @transform_7, window_bounds = array<i64: 16, 128>}]} {
    %c0 = arith.constant 0 : index
    %c0_0 = arith.constant 0 : index
    %0 = vector.load %arg2[%c0, %c0_0] : memref<16x32xf32, #tpu.memory_space<vmem>>, vector<16x32xf32>
    %c0_1 = arith.constant 0 : index
    %c0_2 = arith.constant 0 : index
    %1 = vector.load %arg3[%c0_1, %c0_2] : memref<1x32xf32, #tpu.memory_space<vmem>>, vector<1x32xf32>
    %c0_3 = arith.constant 0 : index
    %c0_4 = arith.constant 0 : index
    %2 = vector.load %arg4[%c0_3, %c0_4] : memref<1x32xf32, #tpu.memory_space<vmem>>, vector<1x32xf32>
    %cst = arith.constant dense<0.000000e+00> : vector<16xf32>
    %3 = vector.multi_reduction <add>, %0, %cst [1] : vector<16x32xf32> to vector<16xf32>
    %4 = vector.shape_cast %3 : vector<16xf32> to vector<16x1xf32>
    %cst_5 = arith.constant 3.200000e+01 : f32
    %5 = vector.broadcast %cst_5 : f32 to vector<16x1xf32>
    %6 = arith.divf %4, %5 : vector<16x1xf32>
    %7 = vector.broadcast %6 : vector<16x1xf32> to vector<16x32xf32>
    %8 = arith.subf %0, %7 : vector<16x32xf32>
    %9 = arith.mulf %8, %8 : vector<16x32xf32>
    %cst_6 = arith.constant dense<0.000000e+00> : vector<16xf32>
    %10 = vector.multi_reduction <add>, %9, %cst_6 [1] : vector<16x32xf32> to vector<16xf32>
    %11 = vector.shape_cast %10 : vector<16xf32> to vector<16x1xf32>
    %cst_7 = arith.constant 3.200000e+01 : f32
    %12 = vector.broadcast %cst_7 : f32 to vector<16x1xf32>
    %13 = arith.divf %11, %12 : vector<16x1xf32>
    %cst_8 = arith.constant 9.99999974E-6 : f32
    %14 = vector.broadcast %cst_8 : f32 to vector<16x1xf32>
    %15 = arith.addf %13, %14 : vector<16x1xf32>
    %16 = math.rsqrt %15 : vector<16x1xf32>
    %17 = vector.broadcast %16 : vector<16x1xf32> to vector<16x32xf32>
    %18 = arith.mulf %8, %17 : vector<16x32xf32>
    %19 = vector.broadcast %1 : vector<1x32xf32> to vector<16x32xf32>
    %20 = arith.mulf %18, %19 : vector<16x32xf32>
    %21 = vector.broadcast %2 : vector<1x32xf32> to vector<16x32xf32>
    %22 = arith.addf %20, %21 : vector<16x32xf32>
    %23 = arith.truncf %22 : vector<16x32xf32> to vector<16x32xbf16>
    %c0_9 = arith.constant 0 : index
    %c0_10 = arith.constant 0 : index
    %24 = vector.load %arg5[%c0_9, %c0_10] : memref<32x128xbf16, #tpu.memory_space<vmem>>, vector<32x128xbf16>
    %cst_11 = arith.constant dense<0.000000e+00> : vector<16x128xf32>
    %25 = tpu.matmul %23, %24, %cst_11 {dimension_numbers = #tpu.dot_dimension_numbers<[1], [0], [0], [1], [0, 0, 1, 1], [], []>} : vector<16x32xbf16>, vector<32x128xbf16>, vector<16x128xf32> -> vector<16x128xf32>
    %c0_12 = arith.constant 0 : index
    %c0_13 = arith.constant 0 : index
    %26 = vector.load %arg7[%c0_12, %c0_13] : memref<1x128xf32, #tpu.memory_space<vmem>>, vector<1x128xf32>
    %27 = vector.broadcast %26 : vector<1x128xf32> to vector<16x128xf32>
    %28 = arith.addf %25, %27 : vector<16x128xf32>
    %c0_14 = arith.constant 0 : index
    %c0_15 = arith.constant 0 : index
    %29 = vector.load %arg6[%c0_14, %c0_15] : memref<32x128xbf16, #tpu.memory_space<vmem>>, vector<32x128xbf16>
    %cst_16 = arith.constant dense<0.000000e+00> : vector<16x128xf32>
    %30 = tpu.matmul %23, %29, %cst_16 {dimension_numbers = #tpu.dot_dimension_numbers<[1], [0], [0], [1], [0, 0, 1, 1], [], []>} : vector<16x32xbf16>, vector<32x128xbf16>, vector<16x128xf32> -> vector<16x128xf32>
    %c0_17 = arith.constant 0 : index
    %c0_18 = arith.constant 0 : index
    %31 = vector.load %arg8[%c0_17, %c0_18] : memref<1x128xf32, #tpu.memory_space<vmem>>, vector<1x128xf32>
    %32 = vector.broadcast %31 : vector<1x128xf32> to vector<16x128xf32>
    %33 = arith.addf %30, %32 : vector<16x128xf32>
    %cst_19 = arith.constant 5.000000e-01 : f32
    %34 = vector.broadcast %cst_19 : f32 to vector<16x128xf32>
    %35 = arith.mulf %34, %33 : vector<16x128xf32>
    %cst_20 = arith.constant 0.707106769 : f32
    %36 = vector.broadcast %cst_20 : f32 to vector<16x128xf32>
    %37 = arith.mulf %33, %36 : vector<16x128xf32>
    %cst_21 = arith.constant 0.000000e+00 : f32
    %38 = vector.broadcast %cst_21 : f32 to vector<16x128xf32>
    %39 = arith.cmpf olt, %37, %38 : vector<16x128xf32>
    %cst_22 = arith.constant -1.000000e+00 : f32
    %cst_23 = arith.constant 1.000000e+00 : f32
    %40 = vector.broadcast %cst_22 : f32 to vector<16x128xf32>
    %41 = vector.broadcast %cst_23 : f32 to vector<16x128xf32>
    %42 = arith.select %39, %40, %41 : vector<16x128xi1>, vector<16x128xf32>
    %43 = math.absf %37 : vector<16x128xf32>
    %cst_24 = arith.constant 0.327591091 : f32
    %44 = vector.broadcast %cst_24 : f32 to vector<16x128xf32>
    %45 = arith.mulf %44, %43 : vector<16x128xf32>
    %cst_25 = arith.constant 1.000000e+00 : f32
    %46 = vector.broadcast %cst_25 : f32 to vector<16x128xf32>
    %47 = arith.addf %46, %45 : vector<16x128xf32>
    %48 = tpu.reciprocal %47 {approx = true} : vector<16x128xf32> -> vector<16x128xf32>
    %cst_26 = arith.constant 1.06140542 : f32
    %49 = vector.broadcast %cst_26 : f32 to vector<16x128xf32>
    %50 = arith.mulf %49, %48 : vector<16x128xf32>
    %cst_27 = arith.constant -1.45315206 : f32
    %51 = vector.broadcast %cst_27 : f32 to vector<16x128xf32>
    %52 = arith.addf %50, %51 : vector<16x128xf32>
    %53 = arith.mulf %52, %48 : vector<16x128xf32>
    %cst_28 = arith.constant 1.42141378 : f32
    %54 = vector.broadcast %cst_28 : f32 to vector<16x128xf32>
    %55 = arith.addf %53, %54 : vector<16x128xf32>
    %56 = arith.mulf %55, %48 : vector<16x128xf32>
    %cst_29 = arith.constant -0.284496725 : f32
    %57 = vector.broadcast %cst_29 : f32 to vector<16x128xf32>
    %58 = arith.addf %56, %57 : vector<16x128xf32>
    %59 = arith.mulf %58, %48 : vector<16x128xf32>
    %cst_30 = arith.constant 0.254829586 : f32
    %60 = vector.broadcast %cst_30 : f32 to vector<16x128xf32>
    %61 = arith.addf %59, %60 : vector<16x128xf32>
    %62 = arith.mulf %61, %48 : vector<16x128xf32>
    %cst_31 = arith.constant 0.000000e+00 : f32
    %63 = vector.broadcast %cst_31 : f32 to vector<16x128xf32>
    %64 = arith.subf %63, %43 : vector<16x128xf32>
    %65 = arith.mulf %64, %43 : vector<16x128xf32>
    %66 = math.exp %65 : vector<16x128xf32>
    %67 = arith.mulf %62, %66 : vector<16x128xf32>
    %cst_32 = arith.constant 1.000000e+00 : f32
    %68 = vector.broadcast %cst_32 : f32 to vector<16x128xf32>
    %69 = arith.subf %68, %67 : vector<16x128xf32>
    %70 = arith.mulf %42, %69 : vector<16x128xf32>
    %cst_33 = arith.constant 1.000000e+00 : f32
    %71 = vector.broadcast %cst_33 : f32 to vector<16x128xf32>
    %72 = arith.addf %71, %70 : vector<16x128xf32>
    %73 = arith.mulf %35, %72 : vector<16x128xf32>
    %74 = arith.mulf %28, %73 : vector<16x128xf32>
    %75 = arith.truncf %74 : vector<16x128xf32> to vector<16x128xbf16>
    %c0_34 = arith.constant 0 : index
    %c0_35 = arith.constant 0 : index
    %76 = vector.load %arg9[%c0_34, %c0_35] : memref<16x128xbf16, #tpu.memory_space<vmem>>, vector<16x128xbf16>
    tpu.vector_store %arg9[%c0_34, %c0_35], %75 {strides = array<i32>} : memref<16x128xbf16, #tpu.memory_space<vmem>>, vector<16x128xbf16>,
    return
  }
  func.func @transform_0(%arg0: i32, %arg1: i32) -> (i32, i32) {
    %c0_i32 = arith.constant 0 : i32
    %c0_i32_0 = arith.constant 0 : i32
    return %arg0, %c0_i32 : i32, i32
  }
  func.func @transform_1(%arg0: i32, %arg1: i32) -> (i32, i32) {
    %c0_i32 = arith.constant 0 : i32
    %c0_i32_0 = arith.constant 0 : i32
    %c0_i32_1 = arith.constant 0 : i32
    return %c0_i32, %c0_i32_0 : i32, i32
  }
  func.func @transform_2(%arg0: i32, %arg1: i32) -> (i32, i32) {
    %c0_i32 = arith.constant 0 : i32
    %c0_i32_0 = arith.constant 0 : i32
    %c0_i32_1 = arith.constant 0 : i32
    return %c0_i32, %c0_i32_0 : i32, i32
  }
  func.func @transform_3(%arg0: i32, %arg1: i32) -> (i32, i32) {
    %c0_i32 = arith.constant 0 : i32
    %c0_i32_0 = arith.constant 0 : i32
    return %c0_i32, %arg1 : i32, i32
  }
  func.func @transform_4(%arg0: i32, %arg1: i32) -> (i32, i32) {
    %c0_i32 = arith.constant 0 : i32
    %c0_i32_0 = arith.constant 0 : i32
    return %c0_i32, %arg1 : i32, i32
  }
  func.func @transform_5(%arg0: i32, %arg1: i32) -> (i32, i32) {
    %c0_i32 = arith.constant 0 : i32
    %c0_i32_0 = arith.constant 0 : i32
    return %c0_i32, %arg1 : i32, i32
  }
  func.func @transform_6(%arg0: i32, %arg1: i32) -> (i32, i32) {
    %c0_i32 = arith.constant 0 : i32
    %c0_i32_0 = arith.constant 0 : i32
    return %c0_i32, %arg1 : i32, i32
  }
  func.func @transform_7(%arg0: i32, %arg1: i32) -> (i32, i32) {
    %c0_i32 = arith.constant 0 : i32
    return %arg0, %arg1 : i32, i32
  }
}

module attributes {stable_mosaic.version = 11 : i64} {
  func.func @ff_out_kernel(%arg0: i32, %arg1: i32, %arg2: memref<16x128xbf16, #tpu.memory_space<vmem>>, %arg3: memref<128x32xbf16, #tpu.memory_space<vmem>>, %arg4: memref<1x32xf32, #tpu.memory_space<vmem>>, %arg5: memref<16x32xf32, #tpu.memory_space<vmem>>, %arg6: memref<16x32xf32, #tpu.memory_space<vmem>>, %arg7: memref<16x32xf32, #tpu.memory_space<vmem>>) attributes {dimension_semantics = [#tpu.dimension_semantics<parallel>, #tpu.dimension_semantics<arbitrary>], iteration_bounds = array<i64: 1, 1>, scalar_prefetch = 0 : i64, scratch_operands = 1 : i64, tpu.core_type = #tpu.core_type<tc>, window_params = [{transform_indices = @transform_0, window_bounds = array<i64: 16, 128>}, {transform_indices = @transform_1, window_bounds = array<i64: 128, 32>}, {pipeline_mode = #tpu.pipeline_mode<synchronous>, transform_indices = @transform_2, window_bounds = array<i64: 1, 32>}, {transform_indices = @transform_3, window_bounds = array<i64: 16, 32>}, {transform_indices = @transform_4, window_bounds = array<i64: 16, 32>}]} {
    %c0_i32 = arith.constant 0 : i32
    %0 = arith.cmpi eq, %arg1, %c0_i32 : i32
    %1 = arith.extui %0 : i1 to i32
    %c0_i32_0 = arith.constant 0 : i32
    %2 = arith.cmpi ne, %1, %c0_i32_0 : i32
    scf.if %2 {
      %cst_10 = arith.constant 0.000000e+00 : f32
      %12 = vector.broadcast %cst_10 : f32 to vector<16x32xf32>
      %c0_11 = arith.constant 0 : index
      %c0_12 = arith.constant 0 : index
      %13 = vector.load %arg7[%c0_11, %c0_12] : memref<16x32xf32, #tpu.memory_space<vmem>>, vector<16x32xf32>
      tpu.vector_store %arg7[%c0_11, %c0_12], %12 {strides = array<i32>} : memref<16x32xf32, #tpu.memory_space<vmem>>, vector<16x32xf32>,
    } else {
    }
    %c0 = arith.constant 0 : index
    %c0_1 = arith.constant 0 : index
    %3 = vector.load %arg7[%c0, %c0_1] : memref<16x32xf32, #tpu.memory_space<vmem>>, vector<16x32xf32>
    %c0_2 = arith.constant 0 : index
    %c0_3 = arith.constant 0 : index
    %4 = vector.load %arg2[%c0_2, %c0_3] : memref<16x128xbf16, #tpu.memory_space<vmem>>, vector<16x128xbf16>
    %c0_4 = arith.constant 0 : index
    %c0_5 = arith.constant 0 : index
    %5 = vector.load %arg3[%c0_4, %c0_5] : memref<128x32xbf16, #tpu.memory_space<vmem>>, vector<128x32xbf16>
    %cst = arith.constant dense<0.000000e+00> : vector<16x32xf32>
    %6 = tpu.matmul %4, %5, %cst {dimension_numbers = #tpu.dot_dimension_numbers<[1], [0], [0], [1], [0, 0, 1, 1], [], []>} : vector<16x128xbf16>, vector<128x32xbf16>, vector<16x32xf32> -> vector<16x32xf32>
    %7 = arith.addf %3, %6 : vector<16x32xf32>
    %c0_6 = arith.constant 0 : index
    %c0_7 = arith.constant 0 : index
    %8 = vector.load %arg7[%c0_6, %c0_7] : memref<16x32xf32, #tpu.memory_space<vmem>>, vector<16x32xf32>
    tpu.vector_store %arg7[%c0_6, %c0_7], %7 {strides = array<i32>} : memref<16x32xf32, #tpu.memory_space<vmem>>, vector<16x32xf32>,
    %c0_i32_8 = arith.constant 0 : i32
    %9 = arith.cmpi eq, %arg1, %c0_i32_8 : i32
    %10 = arith.extui %9 : i1 to i32
    %c0_i32_9 = arith.constant 0 : i32
    %11 = arith.cmpi ne, %10, %c0_i32_9 : i32
    scf.if %11 {
      %c0_10 = arith.constant 0 : index
      %c0_11 = arith.constant 0 : index
      %12 = vector.load %arg7[%c0_10, %c0_11] : memref<16x32xf32, #tpu.memory_space<vmem>>, vector<16x32xf32>
      %c0_12 = arith.constant 0 : index
      %c0_13 = arith.constant 0 : index
      %13 = vector.load %arg4[%c0_12, %c0_13] : memref<1x32xf32, #tpu.memory_space<vmem>>, vector<1x32xf32>
      %14 = vector.broadcast %13 : vector<1x32xf32> to vector<16x32xf32>
      %15 = arith.addf %12, %14 : vector<16x32xf32>
      %c0_14 = arith.constant 0 : index
      %c0_15 = arith.constant 0 : index
      %16 = vector.load %arg5[%c0_14, %c0_15] : memref<16x32xf32, #tpu.memory_space<vmem>>, vector<16x32xf32>
      %17 = arith.addf %15, %16 : vector<16x32xf32>
      %c0_16 = arith.constant 0 : index
      %c0_17 = arith.constant 0 : index
      %18 = vector.load %arg6[%c0_16, %c0_17] : memref<16x32xf32, #tpu.memory_space<vmem>>, vector<16x32xf32>
      tpu.vector_store %arg6[%c0_16, %c0_17], %17 {strides = array<i32>} : memref<16x32xf32, #tpu.memory_space<vmem>>, vector<16x32xf32>,
    } else {
    }
    return
  }
  func.func @transform_0(%arg0: i32, %arg1: i32) -> (i32, i32) {
    %c0_i32 = arith.constant 0 : i32
    return %arg0, %arg1 : i32, i32
  }
  func.func @transform_1(%arg0: i32, %arg1: i32) -> (i32, i32) {
    %c0_i32 = arith.constant 0 : i32
    %c0_i32_0 = arith.constant 0 : i32
    return %arg1, %c0_i32 : i32, i32
  }
  func.func @transform_2(%arg0: i32, %arg1: i32) -> (i32, i32) {
    %c0_i32 = arith.constant 0 : i32
    %c0_i32_0 = arith.constant 0 : i32
    %c0_i32_1 = arith.constant 0 : i32
    return %c0_i32, %c0_i32_0 : i32, i32
  }
  func.func @transform_3(%arg0: i32, %arg1: i32) -> (i32, i32) {
    %c0_i32 = arith.constant 0 : i32
    %c0_i32_0 = arith.constant 0 : i32
    return %arg0, %c0_i32 : i32, i32
  }
  func.func @transform_4(%arg0: i32, %arg1: i32) -> (i32, i32) {
    %c0_i32 = arith.constant 0 : i32
    %c0_i32_0 = arith.constant 0 : i32
    return %arg0, %c0_i32 : i32, i32
  }
}

</mosaic_0001>

<bundles_post_ra>
// kernel: basic_transformer_block.11
= control target key start
LH: loop header
LB: loop body
LE: loop exit
PB: predicated region body
PF: predicated region fallthrough
CT: control target
= control target key end

     0   :  { %s689_s15 = smov 0   ;;  %s691_s16 = smov 0   ;;  %s752_s0 = inlined_call_operand.vmem [shape: bf16[2,4,8,8], index: 0, kind: input, shape index: {}]   ;;  %s753_s1 = inlined_call_operand.vmem [shape: bf16[4,8,32], index: 1, kind: input, shape index: {}]   ;;  %s754_s2 = inlined_call_operand.vmem [shape: f32[1,32], index: 2, kind: input, shape index: {}]   ;;  %s755_s3 = inlined_call_operand.vmem [shape: f32[16,32], index: 3, kind: input, shape index: {}, may-alias: {3,4}]   ;;  %s756_s4 = inlined_call_operand.vmem [shape: f32[16,32], index: 4, kind: output, shape index: {}, may-alias: {3,4}]  }
   0x1   :  { %s693_s17 = smov 0  }
   0x2 LB: > { %s26_s18 = sadd.s32 1, %s656_s16  ;;  %p551_p0 = scmp.ge.s32.totalorder %s660_s17, 1  ;;  %s660_s17 = sphi %s693_s17, %s14_s17   ;;  %s656_s16 = sphi %s691_s16, %s758_s16   ;;  %s652_s15 = sphi %s689_s15, %s757_s15  }
   0x3   : > { %p28_p1 = scmp.ge.s32.totalorder %s26_s18, 2  ;;  %p194_p2 = scmp.lt.s32.totalorder %s660_s17, 3 }
   0x5   : > { %s760_s18 = smov (%p28_p1, %s26_s18), 0  ;;  %p195_p3 = pnand %p551_p0, %p194_p2 }
   0x6   : > { %v259_v0 = vld [vmem:[%s753_s1] sm:$0xf] (!%p195_p3)  ;;  %vm264_vm0 = vcmask (!%p195_p3), 1043456   ;;  %v562_v1 = vld [vmem:[%s753_s1 + $0x8] sm:$0xf] (!%p195_p3)  ;;  %v662_v2 = vmov (!%p195_p3), 0.0  }
   0x7   : > { %198 = sbr.rel (%p195_p3) target bundleno = 247 (0xf7), region = 36  ;;  %578 = vmatprep.subr.bf16.mxu1 (!%p195_p3), %v662_v2  ;;  %v266_v3 = vsel (!%p195_p3), %vm264_vm0, %v259_v0, 0  ;;  %590 = vmatprep.subr.bf16.mxu0 (!%p195_p3), %v662_v2  ;;  %v368_v4 = vsel (!%p195_p3), %vm264_vm0, %v562_v1, 0  ;;  %p228_p4 = scmp.lt.s32.totalorder (!%p195_p3), %s652_s15, 1  ;;  %vm663_vm1 = vmmov (!%p195_p3), 0   ;;  %vm260_vm2 = vcmask (!%p195_p3), 64512  }
   0x8   : > { %579 = vmatpush3.bf16.msra.mxu1 (!%p195_p3), %v266_v3  ;;  %591 = vmatpush3.bf16.msra.mxu0 (!%p195_p3), %v368_v4  ;;  %v559_v5 = vld [vmem:[%s753_s1 + $0x4] sm:$0xf] (!%p195_p3)  ;;  %v565_v6 = vld [vmem:[%s753_s1 + $0xc] sm:$0xf] (!%p195_p3)  ;;  %v556_v14 = vld [vmem:[%s754_s2] ss:$0 sm:$0xff] (!%p195_p3) }
   0x9   : > { %580 = vmatprep.mubr.msk.bf16.mxu1 (!%p195_p3), %vm663_vm1, %v662_v2  ;;  %584 = vmatprep.subr.bf16.mxu1 (!%p195_p3), %v662_v2  ;;  %v317_v7 = vsel (!%p195_p3), %vm264_vm0, %v559_v5, 0  ;;  %v419_v8 = vsel (!%p195_p3), %vm264_vm0, %v565_v6, 0  ;;  %vm462_vm3 = vcmask (!%p195_p3), 261120  }
   0xa   : > { %592 = vmatprep.mubr.msk.bf16.mxu0 (!%p195_p3), %vm663_vm1, %v662_v2  ;;  %596 = vmatprep.subr.bf16.mxu0 (!%p195_p3), %v662_v2 }
   0xe   : > { %s762_s15 = smov (!%p228_p4, %s652_s15), 1 }
   0xf   : > { %s569_s27 = sshll.u32 %s762_s15, 4  ;;  %s554_s5 = sshll.u32 %s762_s15, 3 }
  0x10   : > { %s235_s30 = scalar_lea.vmem %s752_s0, %s569_s27  ;;  %s240_s8 = scalar_lea.vmem %s755_s3, %s554_s5 }
  0x11   : > { %v258_v9 = vld [vmem:[%s235_s30] sm:$0xf]  ;;  %v561_v10 = vld [vmem:[%s235_s30 + $0x8] sm:$0xf]  ;;  %v558_v11 = vld [vmem:[%s235_s30 + $0x4] sm:$0xf]  ;;  %s246_s13 = scalar_lea.vmem %s756_s4, %s554_s5 }
  0x12   : > { %581 = vmatmul.mubr.msk.bf16.vlgmr.msra.gmra.mrb[0].mxu1 %vm260_vm2, %v258_v9  ;;  %593 = vmatmul.mubr.msk.bf16.vlgmr.msra.gmra.mrb[0].mxu0 %vm260_vm2, %v561_v10  ;;  %v564_v12 = vld [vmem:[%s235_s30 + $0xc] sm:$0xf]  ;;  %v249_v13 = vld [vmem:[%s240_s8] sm:$0xff] }
  0x13   : > { %585 = vmatpush3.bf16.msra.mxu1 %v317_v7  ;;  %597 = vmatpush3.bf16.msra.mxu0 %v419_v8  ;;  %v257_v15 = vadd.f32 %v556_v14, %v249_v13 }
  0x14   : > { %586 = vmatprep.mubr.msk.bf16.mxu1 %vm663_vm1, %v662_v2  ;;  %598 = vmatprep.mubr.msk.bf16.mxu0 %vm663_vm1, %v662_v2 }
  0x1e   : > { %587 = vmatmul.mubr.msk.bf16.vlgmr.msra.gmra.mrb[0].mxu1 %vm260_vm2, %v558_v11  ;;  %599 = vmatmul.mubr.msk.bf16.vlgmr.msra.gmra.mrb[0].mxu0 %vm260_vm2, %v564_v12 }
  0xf1   : > { %v353_v16 = vpop.f32.mrb[0].mxu1  ;;  %v455_v17 = vpop.f32.mrb[0].mxu0 }
  0xf2   : > { %v602_v18 = vadd.f32 %v353_v16, %v257_v15  ;;  %v588_v19 = vpop.f32.mrb[1].mxu1  ;;  %v600_v20 = vpop.f32.mrb[1].mxu0 }
  0xf3   : > { %v356_v21 = vpop.f32.mrb[2].mxu1  ;;  %v458_v22 = vpop.f32.mrb[2].mxu0 }
  0xf4   : > { %v603_v23 = vadd.f32 %v602_v18, %v455_v17  ;;  %v589_v24 = vpop.f32.mrb[3].mxu1  ;;  %v601_v25 = vpop.f32.mrb[3].mxu0 }
  0xf6   : > { %463 = vst.msk [vmem:[%s246_s13] sm:$0xff] %vm462_vm3, %v603_v23 }
  0xf7 PF: > { %s14_s17 = sadd.s32 1, %s660_s17   ;;  %s757_s15 = smov %s656_s16 }
  0xf8   : > { %p11_p5 = scmp.ge.s32.totalorder %s14_s17, 4   ;;  %s758_s16 = smov %s760_s18 }
  0xfa   :  { %13 = sbr.rel (!%p11_p5) target bundleno = 2 (0x2), region = 75 }

// kernel: basic_transformer_block.10
= control target key start
LH: loop header
LB: loop body
LE: loop exit
PB: predicated region body
PF: predicated region fallthrough
CT: control target
= control target key end

     0   :  { %s1264_s12 = smov 0   ;;  %s1266_s13 = smov 0   ;;  %s1450_s0 = inlined_call_operand.vmem [shape: bf16[2,4,8,8], index: 0, kind: input, shape index: {}]   ;;  %s1451_s1 = inlined_call_operand.vmem [shape: bf16[2,4,8,8], index: 1, kind: input, shape index: {}]   ;;  %s1452_s2 = inlined_call_operand.vmem [shape: bf16[2,4,8,8], index: 2, kind: input, shape index: {}]   ;;  %s1453_s3 = inlined_call_operand.vmem [shape: bf16[2,4,8,8], index: 3, kind: output, shape index: {}]  }
   0x1   :  { %s1268_s14 = smov 0  }
   0x2 LB: > { %s39_s15 = sadd.s32 1, %s1234_s13  ;;  %p1075_p0 = scmp.ge.s32.totalorder %s1238_s14, 1  ;;  %s1238_s14 = sphi %s1268_s14, %s13_s14   ;;  %s1234_s13 = sphi %s1266_s13, %s1455_s13   ;;  %s1230_s12 = sphi %s1264_s12, %s1454_s12  }
   0x3   : > { %p41_p1 = scmp.ge.s32.totalorder %s39_s15, 2  ;;  %p223_p2 = scmp.lt.s32.totalorder %s1238_s14, 3 }
   0x5   : > { %s1457_s15 = smov (%p41_p1, %s39_s15), 0  ;;  %p224_p3 = pnand %p1075_p0, %p223_p2 }
   0x6   : > { %p286_p4 = scmp.lt.s32.totalorder (!%p224_p3), %s1230_s12, 1  ;;  %vm351_vm0 = vcmask (!%p224_p3), 64512   ;;  %v1240_v0 = vmov (!%p224_p3), 0.0   ;;  %vm1241_vm1 = vmmov (!%p224_p3), 0   ;;  %vm342_vm2 = vcmask (!%p224_p3), 7168  }
   0x7   : > { %227 = sbr.rel (%p224_p3) target bundleno = 835 (0x343), region = 32  ;;  %1114 = vmatprep.subr.bf16.mxu0 (!%p224_p3), %v1240_v0  ;;  %352 = vst.msk [vmem:[#allocation4] sm:$0xff] (!%p224_p3), %vm351_vm0, %v1240_v0  ;;  %353 = vst.msk [vmem:[#allocation4 + $0x8] sm:$0xff] (!%p224_p3), %vm351_vm0, %v1240_v0  ;;  %1120 = vmatprep.subr.bf16.mxu1 (!%p224_p3), %v1240_v0  ;;  %v1242_v13 = vmov (!%p224_p3), -inf   ;;  %v1243_v34 = vmov (!%p224_p3), 0   ;;  %vm653_vm3 = vcmask (!%p224_p3), 1043456  }
   0x8   : > { %354 = vst.msk [vmem:[#allocation4 + $0x10] sm:$0xff] (!%p224_p3), %vm351_vm0, %v1240_v0  ;;  %355 = vst.msk [vmem:[#allocation4 + $0x18] sm:$0xff] (!%p224_p3), %vm351_vm0, %v1240_v0  ;;  %1116 = vmatprep.mubr.msk.bf16.mxu0 (!%p224_p3), %vm1241_vm1, %v1240_v0  ;;  %1122 = vmatprep.mubr.msk.bf16.mxu1 (!%p224_p3), %vm1241_vm1, %v1240_v0  ;;  %vm918_vm4 = vcmask (!%p224_p3), 60416  }
   0x9   : > { %343 = vst.msk [vmem:[#allocation2] sm:$0xff] (!%p224_p3), %vm342_vm2, %v1242_v13  ;;  %344 = vst.msk [vmem:[#allocation2 + $0x8] sm:$0xff] (!%p224_p3), %vm342_vm2, %v1242_v13  ;;  %1190 = vset.pattern.permute.xlu0 (!%p224_p3), %v1243_v34  ;;  %1191 = vset.pattern.permute.xlu1 (!%p224_p3), %v1243_v34 }
   0xa   : > { %345 = vst.msk [vmem:[#allocation2 + $0x10] sm:$0xff] (!%p224_p3), %vm342_vm2, %v1242_v13  ;;  %346 = vst.msk [vmem:[#allocation2 + $0x18] sm:$0xff] (!%p224_p3), %vm342_vm2, %v1242_v13 }
   0xb   : > { %347 = vst.msk [vmem:[#allocation3] sm:$0xff] (!%p224_p3), %vm342_vm2, %v1240_v0  ;;  %348 = vst.msk [vmem:[#allocation3 + $0x8] sm:$0xff] (!%p224_p3), %vm342_vm2, %v1240_v0 }
   0xc   : > { %349 = vst.msk [vmem:[#allocation3 + $0x10] sm:$0xff] (!%p224_p3), %vm342_vm2, %v1240_v0  ;;  %350 = vst.msk [vmem:[#allocation3 + $0x18] sm:$0xff] (!%p224_p3), %vm342_vm2, %v1240_v0 }
   0xe   : > { %s1459_s12 = smov (!%p286_p4, %s1230_s12), 1 }
   0xf   : > { %s1296_s16 = sshll.u32 %s1459_s12, 4 }
  0x10   : > { %s309_s19 = scalar_lea.vmem %s1451_s1, %s1296_s16  ;;  %s296_s22 = scalar_lea.vmem %s1450_s0, %s1296_s16  ;;  %v1354_v35 = vld [vmem:[#allocation2] sm:$0xff]  ;;  %v1359_v38 = vld [vmem:[#allocation2 + $0x8] sm:$0xff] }
  0x11   : > { %v360_v1 = vld [vmem:[%s309_s19] sm:$0xf]  ;;  %v361_v2 = vld [vmem:[%s309_s19 + $0x4] sm:$0xf]  ;;  %v362_v5 = vld [vmem:[%s309_s19 + $0x8] sm:$0xf]  ;;  %s322_s25 = scalar_lea.vmem %s1452_s2, %s1296_s16  ;;  %s335_s28 = scalar_lea.vmem %s1453_s3, %s1296_s16 }
  0x12   : > { %v369_v3 = vsel %vm351_vm0, %v360_v1, 0  ;;  %v415_v4 = vsel %vm351_vm0, %v361_v2, 0  ;;  %v363_v6 = vld [vmem:[%s309_s19 + $0xc] sm:$0xf]  ;;  %v356_v7 = vld [vmem:[%s296_s22] sm:$0xf] }
  0x13   : > { %1115 = vmatpush3.bf16.xpose.msra.mxu0 %v369_v3  ;;  %1121 = vmatpush3.bf16.xpose.msra.mxu1 %v415_v4  ;;  %v357_v8 = vld [vmem:[%s296_s22 + $0x4] sm:$0xf]  ;;  %v461_v9 = vsel %vm351_vm0, %v362_v5, 0  ;;  %v507_v10 = vsel %vm351_vm0, %v363_v6, 0  ;;  %v358_v11 = vld [vmem:[%s296_s22 + $0x8] sm:$0xf] }
  0x14   : > { %1126 = vmatprep.subr.bf16.mxu0 %v1240_v0  ;;  %1132 = vmatprep.subr.bf16.mxu1 %v1240_v0  ;;  %v359_v12 = vld [vmem:[%s296_s22 + $0xc] sm:$0xf]  ;;  %v1369_v42 = vld [vmem:[#allocation2 + $0x10] sm:$0xff]  ;;  %v1379_v46 = vld [vmem:[#allocation2 + $0x18] sm:$0xff] }
  0x15   : > { %v646_v51 = vld [vmem:[%s322_s25] sm:$0xf]  ;;  %v647_v53 = vld [vmem:[%s322_s25 + $0x4] sm:$0xf]  ;;  %v648_v55 = vld [vmem:[%s322_s25 + $0x8] sm:$0xf] }
  0x16   : > { %v655_v52 = vsel %vm653_vm3, %v646_v51, 0  ;;  %v701_v54 = vsel %vm653_vm3, %v647_v53, 0  ;;  %v747_v56 = vsel %vm653_vm3, %v648_v55, 0  ;;  %v649_v57 = vld [vmem:[%s322_s25 + $0xc] sm:$0xf]  ;;  %v615_v34 = vld [vmem:[#allocation3 + $0x10] sm:$0xff] }
  0x17   : > { %v793_v58 = vsel %vm653_vm3, %v649_v57, 0  ;;  %v835_v51 = vld [vmem:[#allocation4] sm:$0xff] }
  0x1a   : > { %1117 = vmatmul.mubr.msk.bf16.vlgmr.msra.gmra.mrb[0].mxu0 %vm351_vm0, %v356_v7  ;;  %1123 = vmatmul.mubr.msk.bf16.vlgmr.msra.gmra.mrb[0].mxu1 %vm351_vm0, %v357_v8 }
  0x1b   : > { %1127 = vmatpush3.bf16.xpose.msra.mxu0 %v461_v9  ;;  %1133 = vmatpush3.bf16.xpose.msra.mxu1 %v507_v10 }
  0x1c   : > { %1128 = vmatprep.mubr.msk.bf16.mxu0 %vm1241_vm1, %v1240_v0  ;;  %1134 = vmatprep.mubr.msk.bf16.mxu1 %vm1241_vm1, %v1240_v0 }
  0x1d   : > { %1138 = vmatprep.subr.bf16.mxu0 %v1240_v0  ;;  %1144 = vmatprep.subr.bf16.mxu1 %v1240_v0 }
  0x22   : > { %1129 = vmatmul.mubr.msk.bf16.vlgmr.msra.gmra.mrb[4].mxu0 %vm351_vm0, %v358_v11  ;;  %1135 = vmatmul.mubr.msk.bf16.vlgmr.msra.gmra.mrb[4].mxu1 %vm351_vm0, %v359_v12 }
  0x23   : > { %1140 = vmatprep.mubr.msk.bf16.mxu0 %vm1241_vm1, %v1240_v0  ;;  %1146 = vmatprep.mubr.msk.bf16.mxu1 %vm1241_vm1, %v1240_v0 }
  0x24   : > { %1139 = vmatpush3.bf16.msra.mxu0 %v655_v52  ;;  %1145 = vmatpush3.bf16.msra.mxu1 %v701_v54  ;;  %v836_v54 = vld [vmem:[#allocation4 + $0x8] sm:$0xff] }
  0x25   : > { %1150 = vmatprep.subr.bf16.mxu0 %v1240_v0  ;;  %1156 = vmatprep.subr.bf16.mxu1 %v1240_v0 }
  0xed   : > { %v1338_v14 = vpop.f32.mrb[0].mxu0  ;;  %v1340_v15 = vpop.f32.mrb[0].mxu1 }
  0xee   : > { %v1118_v16 = vpop.f32.mrb[1].mxu0  ;;  %v553_v17 = vsel %vm351_vm0, %v1338_v14, -inf  ;;  %v1124_v18 = vpop.f32.mrb[1].mxu1  ;;  %v556_v23 = vsel %vm351_vm0, %v1340_v15, -inf }
  0xef   : > { %554 = vmax.xlane.f32.xlu0 %v553_v17  ;;  %v408_v19 = vpop.f32.mrb[2].mxu0  ;;  %v454_v20 = vpop.f32.mrb[2].mxu1 }
  0xf0   : > { %v1119_v21 = vpop.f32.mrb[3].mxu0  ;;  %v1125_v22 = vpop.f32.mrb[3].mxu1 }
  0xf3   : > { %557 = vmax.xlane.f32.xlu0 %v556_v23 }
  0xf5   : > { %v1346_v24 = vpop.f32.mrb[4].mxu0  ;;  %v1348_v25 = vpop.f32.mrb[4].mxu1 }
  0xf6   : > { %v1130_v26 = vpop.f32.mrb[5].mxu0  ;;  %v559_v27 = vsel %vm351_vm0, %v1346_v24, -inf  ;;  %v1136_v28 = vpop.f32.mrb[5].mxu1  ;;  %v562_v33 = vsel %vm351_vm0, %v1348_v25, -inf }
  0xf7   : > { %560 = vmax.xlane.f32.xlu1 %v559_v27  ;;  %v500_v29 = vpop.f32.mrb[6].mxu0  ;;  %v546_v30 = vpop.f32.mrb[6].mxu1  ;;  %v613_v27 = vld [vmem:[#allocation3] sm:$0xff] }
  0xf8   : > { %v1131_v31 = vpop.f32.mrb[7].mxu0  ;;  %v1137_v32 = vpop.f32.mrb[7].mxu1  ;;  %v614_v30 = vld [vmem:[#allocation3 + $0x8] sm:$0xff] }
  0xfb   : > { %563 = vmax.xlane.f32.xlu1 %v562_v33 }
 0x17c   : > { %v555_v36 = vpop.xlane.xlu0 %554 }
 0x17d   : > { %v1357_v37 = vmax.f32 %v1354_v35, %v555_v36 }
 0x17f   : > { %v569_v39 = vsub.f32 %v1354_v35, %v1357_v37  ;;  %871 = vst.msk [vmem:[#allocation2] sm:$0xff] %vm342_vm2, %v1357_v37  ;;  %583 = vperm.xlu0 %1190, %v1357_v37  }
 0x180   : > { %v558_v40 = vpop.xlane.xlu0 %557 }
 0x181   : > { %v1367_v41 = vmax.f32 %v1359_v38, %v558_v40 }
 0x183   : > { %v570_v43 = vsub.f32 %v1359_v38, %v1367_v41  ;;  %872 = vst.msk [vmem:[#allocation2 + $0x8] sm:$0xff] %vm342_vm2, %v1367_v41  ;;  %588 = vperm.xlu1 %1191, %v1367_v41   ;;  %v616_v38 = vld [vmem:[#allocation3 + $0x18] sm:$0xff] }
 0x184   : > { %v561_v44 = vpop.xlane.xlu1 %560 }
 0x185   : > { %v1377_v45 = vmax.f32 %v1369_v42, %v561_v44  ;;  %v575_v18 = vmul.f32 1.442695, %v570_v43 }
 0x187   : > { %v571_v47 = vsub.f32 %v1369_v42, %v1377_v45  ;;  %873 = vst.msk [vmem:[#allocation2 + $0x10] sm:$0xff] %vm342_vm2, %v1377_v45  ;;  %593 = vperm.xlu1 %1191, %v1377_v45  }
 0x188   : > { %v564_v48 = vpop.xlane.xlu1 %563 }
 0x189   : > { %v1387_v49 = vmax.f32 %v1379_v46, %v564_v48  ;;  %v577_v21 = vmul.f32 1.442695, %v571_v47 }
 0x18b   : > { %v572_v50 = vsub.f32 %v1379_v46, %v1387_v49  ;;  %874 = vst.msk [vmem:[#allocation2 + $0x18] sm:$0xff] %vm342_vm2, %v1387_v49  ;;  %598 = vperm.xlu1 %1191, %v1387_v49  }
 0x18d   : > { %v579_v22 = vmul.f32 1.442695, %v572_v50 }
 0x1fe   : > { %v584_v59 = vpop.permute.xlu0 %583 }
 0x1ff   : > { %v601_v60 = vsub.f32 %v1338_v14, %v584_v59 }
 0x201   : > { %v605_v61 = vmul.f32 1.442695, %v601_v60 }
 0x202   : > { %v589_v62 = vpop.permute.xlu1 %588 }
 0x203   : > { %1192 = vpow2.f32 %v605_v61  ;;  %v602_v63 = vsub.f32 %v1340_v15, %v589_v62 }
 0x205   : > { %v607_v1 = vmul.f32 1.442695, %v602_v63  ;;  %v837_v63 = vld [vmem:[#allocation4 + $0x10] sm:$0xff] }
 0x206   : > { %v594_v2 = vpop.permute.xlu1 %593 }
 0x207   : > { %1194 = vpow2.f32 %v607_v1  ;;  %v603_v3 = vsub.f32 %v1346_v24, %v594_v2 }
 0x209   : > { %v609_v4 = vmul.f32 1.442695, %v603_v3 }
 0x20a   : > { %v599_v5 = vpop.permute.xlu1 %598 }
 0x20b   : > { %1196 = vpow2.f32 %v609_v4  ;;  %v604_v6 = vsub.f32 %v1348_v25, %v599_v5 }
 0x20d   : > { %v1193_v7 = vpop.eup %1192  ;;  %v611_v8 = vmul.f32 1.442695, %v604_v6 }
 0x20e   : > { %v621_v9 = vsel %vm351_vm0, %v1193_v7, 0.0  ;;  %v642_v10 = vpack.c.bf16 %v1193_v7, %v1193_v7  ;;  %v838_v7 = vld [vmem:[#allocation4 + $0x18] sm:$0xff] }
 0x20f   : > { %1198 = vpow2.f32 %v611_v8  ;;  %622 = vadd.xlane.f32.xlu1 %v621_v9 }
 0x210   : > { %1141 = vmatmul.mubr.msk.bf16.vlgmr.msra.gmra.mrb[8].mxu0 %vm351_vm0, %v642_v10  ;;  %1200 = vpow2.f32 %v575_v18 }
 0x211   : > { %v1195_v11 = vpop.eup %1194  ;;  %1151 = vmatpush3.bf16.msra.mxu0 %v747_v56  ;;  %1152 = vmatprep.mubr.msk.bf16.mxu0 %vm1241_vm1, %v1240_v0 }
 0x212   : > { %v624_v12 = vsel %vm351_vm0, %v1195_v11, 0.0  ;;  %v643_v13 = vpack.c.bf16 %v1195_v11, %v1195_v11 }
 0x213   : > { %625 = vadd.xlane.f32.xlu0 %v624_v12 }
 0x214   : > { %1147 = vmatmul.mubr.msk.bf16.vlgmr.msra.gmra.mrb[8].mxu1 %vm351_vm0, %v643_v13 }
 0x215   : > { %v1197_v14 = vpop.eup %1196  ;;  %1157 = vmatpush3.bf16.msra.mxu1 %v793_v58  ;;  %1158 = vmatprep.mubr.msk.bf16.mxu1 %vm1241_vm1, %v1240_v0  ;;  %v573_v0 = vmul.f32 1.442695, %v569_v39 }
 0x216   : > { %v627_v15 = vsel %vm351_vm0, %v1197_v14, 0.0  ;;  %v644_v16 = vpack.c.bf16 %v1197_v14, %v1197_v14 }
 0x217   : > { %628 = vadd.xlane.f32.xlu1 %v627_v15  ;;  %1202 = vpow2.f32 %v573_v0 }
 0x218   : > { %1153 = vmatmul.mubr.msk.bf16.vlgmr.msra.gmra.mrb[12].mxu0 %vm351_vm0, %v644_v16  ;;  %1204 = vpow2.f32 %v577_v21 }
 0x219   : > { %v1199_v17 = vpop.eup %1198  ;;  %1206 = vpow2.f32 %v579_v22 }
 0x21a   : > { %v630_v19 = vsel %vm351_vm0, %v1199_v17, 0.0  ;;  %v645_v20 = vpack.c.bf16 %v1199_v17, %v1199_v17  ;;  %v1201_v23 = vpop.eup %1200 }
 0x21b   : > { %631 = vadd.xlane.f32.xlu1 %v630_v19  ;;  %v618_v32 = vmul.f32 %v1201_v23, %v614_v30 }
 0x21c   : > { %1159 = vmatmul.mubr.msk.bf16.vlgmr.msra.gmra.mrb[12].mxu1 %vm351_vm0, %v645_v20 }
 0x221   : > { %v1203_v24 = vpop.eup %1202 }
 0x222   : > { %v1205_v25 = vpop.eup %1204  ;;  %v617_v28 = vmul.f32 %v1203_v24, %v613_v27 }
 0x223   : > { %v1207_v26 = vpop.eup %1206  ;;  %v619_v36 = vmul.f32 %v1205_v25, %v615_v34 }
 0x224   : > { %v620_v41 = vmul.f32 %v1207_v26, %v616_v38 }
 0x229   : > { %846 = vperm.xlu0 %1190, %v1201_v23  }
 0x22c   : > { %841 = vperm.xlu1 %1191, %v1203_v24  }
 0x230   : > { %851 = vperm.xlu1 %1191, %v1205_v25  }
 0x234   : > { %856 = vperm.xlu1 %1191, %v1207_v26  }
 0x29c   : > { %v623_v29 = vpop.xlane.xlu1 %622 }
 0x29d   : > { %v633_v31 = vadd.f32 %v623_v29, %v617_v28 }
 0x29f   : > { %638 = vst.msk [vmem:[#allocation3] sm:$0xff] %vm342_vm2, %v633_v31 }
 0x2a0   : > { %v626_v33 = vpop.xlane.xlu0 %625 }
 0x2a1   : > { %v634_v35 = vadd.f32 %v626_v33, %v618_v32 }
 0x2a3   : > { %639 = vst.msk [vmem:[#allocation3 + $0x8] sm:$0xff] %vm342_vm2, %v634_v35 }
 0x2a4   : > { %v629_v37 = vpop.xlane.xlu1 %628 }
 0x2a5   : > { %v635_v39 = vadd.f32 %v629_v37, %v619_v36 }
 0x2a6   : > { %v878_v40 = vld [vmem:[#allocation3] sm:$0xff] }
 0x2a7   : > { %640 = vst.msk [vmem:[#allocation3 + $0x10] sm:$0xff] %vm342_vm2, %v635_v39  ;;  %1208 = vrcp.f32 %v878_v40 }
 0x2a8   : > { %v632_v42 = vpop.xlane.xlu1 %631  ;;  %v847_v55 = vpop.permute.xlu0 %846 }
 0x2a9   : > { %v636_v43 = vadd.f32 %v632_v42, %v620_v41  ;;  %v860_v61 = vmul.f32 %v847_v55, %v836_v54 }
 0x2aa   : > { %v879_v44 = vld [vmem:[#allocation3 + $0x8] sm:$0xff] }
 0x2ab   : > { %641 = vst.msk [vmem:[#allocation3 + $0x18] sm:$0xff] %vm342_vm2, %v636_v43  ;;  %1210 = vrcp.f32 %v879_v44 }
 0x2ac   : > { %v842_v52 = vpop.permute.xlu1 %841 }
 0x2ad   : > { %v859_v53 = vmul.f32 %v842_v52, %v835_v51 }
 0x2ae   : > { %v880_v45 = vld [vmem:[#allocation3 + $0x10] sm:$0xff] }
 0x2af   : > { %1212 = vrcp.f32 %v880_v45 }
 0x2b0   : > { %v852_v59 = vpop.permute.xlu1 %851 }
 0x2b1   : > { %v1209_v46 = vpop.eup %1208  ;;  %v861_v5 = vmul.f32 %v852_v59, %v837_v63 }
 0x2b2   : > { %892 = vperm.xlu1 %1191, %v1209_v46   ;;  %v881_v47 = vld [vmem:[#allocation3 + $0x18] sm:$0xff] }
 0x2b3   : > { %1214 = vrcp.f32 %v881_v47 }
 0x2b4   : > { %v857_v8 = vpop.permute.xlu1 %856 }
 0x2b5   : > { %v1211_v48 = vpop.eup %1210  ;;  %v862_v13 = vmul.f32 %v857_v8, %v838_v7 }
 0x2b6   : > { %897 = vperm.xlu0 %1190, %v1211_v48  }
 0x2b9   : > { %v1213_v49 = vpop.eup %1212 }
 0x2ba   : > { %902 = vperm.xlu1 %1191, %v1213_v49  }
 0x2bd   : > { %v1215_v50 = vpop.eup %1214 }
 0x2be   : > { %907 = vperm.xlu0 %1190, %v1215_v50  }
 0x2e3   : > { %v691_v56 = vpop.f32.mrb[8].mxu0 }
 0x2e4   : > { %v863_v57 = vadd.f32 %v859_v53, %v691_v56  ;;  %v1142_v58 = vpop.f32.mrb[9].mxu0 }
 0x2e5   : > { %v694_v60 = vpop.f32.mrb[10].mxu0 }
 0x2e6   : > { %867 = vst.msk [vmem:[#allocation4] sm:$0xff] %vm351_vm0, %v863_v57  ;;  %v1143_v62 = vpop.f32.mrb[11].mxu0 }
 0x2e7   : > { %v737_v1 = vpop.f32.mrb[8].mxu1 }
 0x2e8   : > { %v864_v2 = vadd.f32 %v860_v61, %v737_v1  ;;  %v1148_v3 = vpop.f32.mrb[9].mxu1 }
 0x2e9   : > { %v740_v4 = vpop.f32.mrb[10].mxu1 }
 0x2ea   : > { %868 = vst.msk [vmem:[#allocation4 + $0x8] sm:$0xff] %vm351_vm0, %v864_v2  ;;  %v1149_v6 = vpop.f32.mrb[11].mxu1 }
 0x2eb   : > { %v783_v9 = vpop.f32.mrb[12].mxu0 }
 0x2ec   : > { %v865_v10 = vadd.f32 %v861_v5, %v783_v9  ;;  %v1154_v11 = vpop.f32.mrb[13].mxu0 }
 0x2ed   : > { %v786_v12 = vpop.f32.mrb[14].mxu0  ;;  %v886_v0 = vld [vmem:[#allocation4] sm:$0xff] }
 0x2ee   : > { %869 = vst.msk [vmem:[#allocation4 + $0x10] sm:$0xff] %vm351_vm0, %v865_v10  ;;  %v1155_v14 = vpop.f32.mrb[15].mxu0 }
 0x2ef   : > { %v829_v15 = vpop.f32.mrb[12].mxu1 }
 0x2f0   : > { %v866_v16 = vadd.f32 %v862_v13, %v829_v15  ;;  %v1160_v17 = vpop.f32.mrb[13].mxu1 }
 0x2f1   : > { %v832_v18 = vpop.f32.mrb[14].mxu1  ;;  %v887_v23 = vld [vmem:[#allocation4 + $0x8] sm:$0xff] }
 0x2f2   : > { %870 = vst.msk [vmem:[#allocation4 + $0x18] sm:$0xff] %vm351_vm0, %v866_v16  ;;  %v1161_v19 = vpop.f32.mrb[15].mxu1 }
 0x2f5   : > { %v888_v28 = vld [vmem:[#allocation4 + $0x10] sm:$0xff] }
 0x2f9   : > { %v889_v32 = vld [vmem:[#allocation4 + $0x18] sm:$0xff] }
 0x331   : > { %v893_v20 = vpop.permute.xlu1 %892 }
 0x332   : > { %v910_v21 = vmul.f32 %v893_v20, %v886_v0 }
 0x334   : > { %v914_v22 = vpack.c.bf16 %v910_v21, %v910_v21 }
 0x335   : > { %v898_v24 = vpop.permute.xlu0 %897 }
 0x336   : > { %919 = vst.msk [vmem:[%s335_s28] sm:$0xf] %vm918_vm4, %v914_v22  ;;  %v911_v25 = vmul.f32 %v898_v24, %v887_v23 }
 0x338   : > { %v915_v26 = vpack.c.bf16 %v911_v25, %v911_v25 }
 0x339   : > { %v903_v27 = vpop.permute.xlu1 %902 }
 0x33a   : > { %920 = vst.msk [vmem:[%s335_s28 + $0x4] sm:$0xf] %vm918_vm4, %v915_v26  ;;  %v912_v29 = vmul.f32 %v903_v27, %v888_v28 }
 0x33c   : > { %v916_v30 = vpack.c.bf16 %v912_v29, %v912_v29 }
 0x33d   : > { %v908_v31 = vpop.permute.xlu0 %907 }
 0x33e   : > { %921 = vst.msk [vmem:[%s335_s28 + $0x8] sm:$0xf] %vm918_vm4, %v916_v30  ;;  %v913_v33 = vmul.f32 %v908_v31, %v889_v32 }
 0x340   : > { %v917_v34 = vpack.c.bf16 %v913_v33, %v913_v33 }
 0x342   : > { %922 = vst.msk [vmem:[%s335_s28 + $0xc] sm:$0xf] %vm918_vm4, %v917_v34 }
 0x343 PF: > { %s13_s14 = sadd.s32 1, %s1238_s14   ;;  %s1454_s12 = smov %s1234_s13 }
 0x344   : > { %p10_p5 = scmp.ge.s32.totalorder %s13_s14, 4   ;;  %s1455_s13 = smov %s1457_s15 }
 0x346   :  { %12 = sbr.rel (!%p10_p5) target bundleno = 2 (0x2), region = 76 }

// kernel: basic_transformer_block.9
= control target key start
LH: loop header
LB: loop body
LE: loop exit
PB: predicated region body
PF: predicated region fallthrough
CT: control target
= control target key end

     0   :  { %s804_s21 = smov 0   ;;  %s806_s22 = smov 0   ;;  %s885_s0 = inlined_call_operand.vmem [shape: f32[16,32], index: 0, kind: input, shape index: {}]   ;;  %s886_s1 = inlined_call_operand.vmem [shape: f32[1,32], index: 1, kind: input, shape index: {}]   ;;  %s887_s2 = inlined_call_operand.vmem [shape: f32[1,32], index: 2, kind: input, shape index: {}]   ;;  %s888_s3 = inlined_call_operand.vmem [shape: bf16[32,96], index: 3, kind: input, shape index: {}]   ;;  %s889_s4 = inlined_call_operand.vmem [shape: bf16[2,4,8,8], index: 4, kind: output, shape index: {0}]   ;;  %s890_s5 = inlined_call_operand.vmem [shape: bf16[2,4,8,8], index: 5, kind: output, shape index: {1}]   ;;  %s891_s6 = inlined_call_operand.vmem [shape: bf16[2,4,8,8], index: 6, kind: output, shape index: {2}]  }
   0x1   :  { %s808_s23 = smov 0  }
   0x2 LB: > { %s29_s24 = sadd.s32 1, %s750_s22  ;;  %p649_p0 = scmp.ge.s32.totalorder %s754_s23, 1  ;;  %s754_s23 = sphi %s808_s23, %s17_s23   ;;  %s750_s22 = sphi %s806_s22, %s893_s22   ;;  %s746_s21 = sphi %s804_s21, %s892_s21  }
   0x3   : > { %p31_p1 = scmp.ge.s32.totalorder %s29_s24, 2  ;;  %p238_p2 = scmp.lt.s32.totalorder %s754_s23, 3 }
   0x5   : > { %s895_s24 = smov (%p31_p1, %s29_s24), 0  ;;  %p239_p3 = pnand %p649_p0, %p238_p2 }
   0x6   : > { %p288_p4 = scmp.lt.s32.totalorder (!%p239_p3), %s746_s21, 1  ;;  %vm321_vm0 = vcmask (!%p239_p3), 261120   ;;  %v728_v7 = vld [vmem:[%s888_s3] sm:$0xff] (!%p239_p3)   ;;  %v756_v8 = vmov (!%p239_p3), 0.0   ;;  %vm757_vm1 = vmmov (!%p239_p3), 0   ;;  %v729_v9 = vld [vmem:[%s888_s3 + $0x8] sm:$0xff] (!%p239_p3)  }
   0x7   : > { %242 = sbr.rel (%p239_p3) target bundleno = 695 (0x2b7), region = 36  ;;  %683 = vmatprep.subr.bf16.mxu0 (!%p239_p3), %v756_v8  ;;  %687 = vmatprep.mubr.msk.bf16.mxu0 (!%p239_p3), %vm757_vm1, %v756_v8  ;;  %v657_v14 = vld [vmem:[%s886_s1] ss:$0 sm:$0xff] (!%p239_p3)  ;;  %vm412_vm2 = vcmask (!%p239_p3), 60416   ;;  %s758_s17 = smov (!%p239_p3), 96  }
   0x8   : > { %684 = vmatpush3.bf16.msra.mxu0 (!%p239_p3), %v728_v7  ;;  %v658_v16 = vld [vmem:[%s887_s2] ss:$0 sm:$0xff] (!%p239_p3)  ;;  %s759_s18 = smov (!%p239_p3), 120   ;;  %s760_s19 = smov (!%p239_p3), 64  }
   0x9   : > { %685 = vmatprep.subr.bf16.mxu0 (!%p239_p3), %v756_v8  ;;  %s761_s20 = smov (!%p239_p3), 72   ;;  %s764_s26 = smov (!%p239_p3), 80  }
   0xa   : > { %s765_s27 = smov (!%p239_p3), 48   ;;  %s767_s29 = smov (!%p239_p3), 104  }
   0xb   : > { %s768_s30 = smov (!%p239_p3), 40  }
   0xc   : > { %686 = vmatpush3.bf16.msra.mxu0 (!%p239_p3), %v729_v9 }
   0xe   : > { %s897_s21 = smov (!%p288_p4, %s746_s21), 1 }
   0xf   : > { %s650_s25 = sshll.u32 %s897_s21, 3  ;;  %s844_s13 = sshll.u32 %s897_s21, 4 }
  0x10   : > { %s291_s28 = scalar_lea.vmem %s885_s0, %s650_s25  ;;  %s850_s16 = scalar_lea.vmem %s889_s4, %s844_s13 }
  0x11   : > { %v318_v0 = vld [vmem:[%s291_s28] sm:$0xff]  ;;  %s762_s21 = smov 88   ;;  %s763_s25 = smov 56  }
  0x12   : > { %v322_v1 = vsel %vm321_vm0, %v318_v0, 0.0  ;;  %s766_s28 = smov 112   ;;  %s308_s9 = scalar_lea.vmem %s890_s5, %s844_s13 }
  0x13   : > { %323 = vadd.xlane.f32.xlu0 %v322_v1  ;;  %s316_s12 = scalar_lea.vmem %s891_s6, %s844_s13 }
  0xa0   : > { %v324_v2 = vpop.xlane.xlu0 %323 }
  0xa1   : > { %v326_v3 = vmul.f32 0.03125, %v324_v2 }
  0xa3   : > { %v327_v4 = vsub.f32 %v318_v0, %v326_v3 }
  0xa5   : > { %v328_v5 = vmul.f32 %v327_v4, %v327_v4 }
  0xa7   : > { %v329_v6 = vsel %vm321_vm0, %v328_v5, 0.0 }
  0xa8   : > { %330 = vadd.xlane.f32.xlu0 %v329_v6 }
 0x135   : > { %v331_v10 = vpop.xlane.xlu0 %330 }
 0x136   : > { %v332_v11 = vmul.f32 0.03125, %v331_v10 }
 0x138   : > { %v333_v12 = vadd.f32 1e-05, %v332_v11 }
 0x13a   : > { %730 = vrsqrt.f32 %v333_v12 }
 0x144   : > { %v731_v13 = vpop.eup %730 }
 0x145   : > { %v335_v15 = vmul.f32 %v731_v13, %v327_v4 }
 0x147   : > { %v342_v17 = vmul.f32 %v657_v14, %v335_v15 }
 0x149   : > { %v349_v18 = vadd.f32 %v658_v16, %v342_v17 }
 0x14b   : > { %v350_v19 = vpack.c.bf16 %v349_v18, %v349_v18 }
 0x14d   : > { %688 = vmatmul.mubr.msk.bf16.vlgmr.msra.gmra.mrb[0].mxu0 %vm321_vm0, %v350_v19 }
 0x220   : > { %v404_v20 = vpop.f32.mrb[0].mxu0 }
 0x221   : > { %v410_v21 = vmul.f32 0.35355338, %v404_v20  ;;  %v678_v22 = vpack.c.bf16 %v404_v20, %v404_v20  ;;  %v689_v23 = vpop.f32.mrb[1].mxu0 }
 0x222   : > { %v407_v24 = vpop.f32.mrb[2].mxu0 }
 0x223   : > { %v411_v25 = vpack.c.bf16 %v410_v21, %v410_v21  ;;  %418 = vrot.lane.b32.xlu1 %v678_v22, %s758_s17  ;;  %v690_v26 = vpop.f32.mrb[3].mxu0 }
 0x225   : > { %429 = vrot.lane.b32.xlu0 %v411_v25, %s759_s18  ;;  %413 = vst.msk [vmem:[%s850_s16] sm:$0xf] %vm412_vm2, %v411_v25 }
 0x227   : > { %422 = vrot.lane.b32.xlu1 %v678_v22, %s760_s19 }
 0x229   : > { %464 = vrot.lane.b32.xlu0 %v678_v22, %s761_s20 }
 0x22b   : > { %434 = vrot.lane.b32.xlu1 %v678_v22, %s762_s21 }
 0x22f   : > { %439 = vrot.lane.b32.xlu1 %v678_v22, %s763_s25 }
 0x233   : > { %449 = vrot.lane.b32.xlu1 %v678_v22, %s764_s26 }
 0x237   : > { %454 = vrot.lane.b32.xlu1 %v678_v22, %s765_s27 }
 0x23b   : > { %444 = vrot.lane.b32.xlu1 %v411_v25, %s766_s28 }
 0x23f   : > { %459 = vrot.lane.b32.xlu1 %v411_v25, %s767_s29 }
 0x243   : > { %469 = vrot.lane.b32.xlu1 %v678_v22, %s768_s30 }
 0x295   : > { %v419_v27 = vpop.permute.xlu1 %418 }
 0x296   : > { %421 = vst.msk [vmem:[%s308_s9] sm:$0xf] %vm412_vm2, %v419_v27 }
 0x297   : > { %v430_v28 = vpop.permute.xlu0 %429 }
 0x298   : > { %664 = vst.msk [vmem:[%s850_s16 + $0x4] sm:$0xf] %vm412_vm2, %v430_v28 }
 0x299   : > { %v423_v29 = vpop.permute.xlu1 %422 }
 0x29a   : > { %425 = vst.msk [vmem:[%s316_s12] sm:$0xf] %vm412_vm2, %v423_v29 }
 0x29b   : > { %v465_v30 = vpop.permute.xlu0 %464 }
 0x29c   : > { %671 = vst.msk [vmem:[%s308_s9 + $0xc] sm:$0xf] %vm412_vm2, %v465_v30 }
 0x29d   : > { %v435_v31 = vpop.permute.xlu1 %434 }
 0x29e   : > { %665 = vst.msk [vmem:[%s308_s9 + $0x4] sm:$0xf] %vm412_vm2, %v435_v31 }
 0x2a1   : > { %v440_v32 = vpop.permute.xlu1 %439 }
 0x2a2   : > { %666 = vst.msk [vmem:[%s316_s12 + $0x4] sm:$0xf] %vm412_vm2, %v440_v32 }
 0x2a5   : > { %v450_v33 = vpop.permute.xlu1 %449 }
 0x2a6   : > { %668 = vst.msk [vmem:[%s308_s9 + $0x8] sm:$0xf] %vm412_vm2, %v450_v33 }
 0x2a9   : > { %v455_v34 = vpop.permute.xlu1 %454 }
 0x2aa   : > { %669 = vst.msk [vmem:[%s316_s12 + $0x8] sm:$0xf] %vm412_vm2, %v455_v34 }
 0x2ad   : > { %v445_v35 = vpop.permute.xlu1 %444 }
 0x2ae   : > { %667 = vst.msk [vmem:[%s850_s16 + $0x8] sm:$0xf] %vm412_vm2, %v445_v35 }
 0x2b1   : > { %v460_v36 = vpop.permute.xlu1 %459 }
 0x2b2   : > { %670 = vst.msk [vmem:[%s850_s16 + $0xc] sm:$0xf] %vm412_vm2, %v460_v36 }
 0x2b5   : > { %v470_v37 = vpop.permute.xlu1 %469 }
 0x2b6   : > { %672 = vst.msk [vmem:[%s316_s12 + $0xc] sm:$0xf] %vm412_vm2, %v470_v37 }
 0x2b7 PF: > { %s17_s23 = sadd.s32 1, %s754_s23   ;;  %s892_s21 = smov %s750_s22 }
 0x2b8   : > { %p14_p5 = scmp.ge.s32.totalorder %s17_s23, 4   ;;  %s893_s22 = smov %s895_s24 }
 0x2ba   :  { %16 = sbr.rel (!%p14_p5) target bundleno = 2 (0x2), region = 99 }

// kernel: basic_transformer_block.12
= control target key start
LH: loop header
LB: loop body
LE: loop exit
PB: predicated region body
PF: predicated region fallthrough
CT: control target
= control target key end

     0   :  { %s533_s15 = smov 0   ;;  %s535_s16 = smov 0   ;;  %s585_s0 = inlined_call_operand.vmem [shape: f32[16,32], index: 0, kind: input, shape index: {}]   ;;  %s586_s1 = inlined_call_operand.vmem [shape: f32[1,32], index: 1, kind: input, shape index: {}]   ;;  %s587_s2 = inlined_call_operand.vmem [shape: f32[1,32], index: 2, kind: input, shape index: {}]   ;;  %s588_s3 = inlined_call_operand.vmem [shape: bf16[32,32], index: 3, kind: input, shape index: {}]   ;;  %s589_s4 = inlined_call_operand.vmem [shape: bf16[2,4,8,8], index: 4, kind: output, shape index: {}]  }
   0x1   :  { %s537_s17 = smov 0  }
   0x2 LB: > { %s26_s18 = sadd.s32 1, %s497_s16  ;;  %p418_p0 = scmp.ge.s32.totalorder %s501_s17, 1  ;;  %s501_s17 = sphi %s537_s17, %s14_s17   ;;  %s497_s16 = sphi %s535_s16, %s591_s16   ;;  %s493_s15 = sphi %s533_s15, %s590_s15  }
   0x3   : > { %p28_p1 = scmp.ge.s32.totalorder %s26_s18, 2  ;;  %p179_p2 = scmp.lt.s32.totalorder %s501_s17, 3 }
   0x5   : > { %s593_s18 = smov (%p28_p1, %s26_s18), 0  ;;  %p180_p3 = pnand %p418_p0, %p179_p2 }
   0x6   : > { %p209_p4 = scmp.lt.s32.totalorder (!%p180_p3), %s493_s15, 1  ;;  %vm226_vm0 = vcmask (!%p180_p3), 261120   ;;  %v475_v7 = vld [vmem:[%s588_s3] sm:$0xff] (!%p180_p3)   ;;  %v503_v8 = vmov (!%p180_p3), 0.0   ;;  %vm504_vm1 = vmmov (!%p180_p3), 0   ;;  %v476_v9 = vld [vmem:[%s588_s3 + $0x8] sm:$0xff] (!%p180_p3)  }
   0x7   : > { %183 = sbr.rel (%p180_p3) target bundleno = 669 (0x29d), region = 36  ;;  %438 = vmatprep.subr.bf16.mxu0 (!%p180_p3), %v503_v8  ;;  %442 = vmatprep.mubr.msk.bf16.mxu0 (!%p180_p3), %vm504_vm1, %v503_v8  ;;  %v422_v14 = vld [vmem:[%s586_s1] ss:$0 sm:$0xff] (!%p180_p3)  ;;  %vm317_vm2 = vcmask (!%p180_p3), 60416   ;;  %s505_s9 = smov (!%p180_p3), 104  }
   0x8   : > { %439 = vmatpush3.bf16.msra.mxu0 (!%p180_p3), %v475_v7  ;;  %v423_v16 = vld [vmem:[%s587_s2] ss:$0 sm:$0xff] (!%p180_p3)  ;;  %s506_s10 = smov (!%p180_p3), 120   ;;  %s507_s11 = smov (!%p180_p3), 112  }
   0x9   : > { %440 = vmatprep.subr.bf16.mxu0 (!%p180_p3), %v503_v8 }
   0xc   : > { %441 = vmatpush3.bf16.msra.mxu0 (!%p180_p3), %v476_v9 }
   0xe   : > { %s595_s15 = smov (!%p209_p4, %s493_s15), 1 }
   0xf   : > { %s419_s19 = sshll.u32 %s595_s15, 3  ;;  %s433_s5 = sshll.u32 %s595_s15, 4 }
  0x10   : > { %s212_s22 = scalar_lea.vmem %s585_s0, %s419_s19  ;;  %s221_s8 = scalar_lea.vmem %s589_s4, %s433_s5 }
  0x11   : > { %v223_v0 = vld [vmem:[%s212_s22] sm:$0xff] }
  0x12   : > { %v227_v1 = vsel %vm226_vm0, %v223_v0, 0.0 }
  0x13   : > { %228 = vadd.xlane.f32.xlu0 %v227_v1 }
  0xa0   : > { %v229_v2 = vpop.xlane.xlu0 %228 }
  0xa1   : > { %v231_v3 = vmul.f32 0.03125, %v229_v2 }
  0xa3   : > { %v232_v4 = vsub.f32 %v223_v0, %v231_v3 }
  0xa5   : > { %v233_v5 = vmul.f32 %v232_v4, %v232_v4 }
  0xa7   : > { %v234_v6 = vsel %vm226_vm0, %v233_v5, 0.0 }
  0xa8   : > { %235 = vadd.xlane.f32.xlu0 %v234_v6 }
 0x135   : > { %v236_v10 = vpop.xlane.xlu0 %235 }
 0x136   : > { %v237_v11 = vmul.f32 0.03125, %v236_v10 }
 0x138   : > { %v238_v12 = vadd.f32 1e-05, %v237_v11 }
 0x13a   : > { %477 = vrsqrt.f32 %v238_v12 }
 0x144   : > { %v478_v13 = vpop.eup %477 }
 0x145   : > { %v240_v15 = vmul.f32 %v478_v13, %v232_v4 }
 0x147   : > { %v247_v17 = vmul.f32 %v422_v14, %v240_v15 }
 0x149   : > { %v254_v18 = vadd.f32 %v423_v16, %v247_v17 }
 0x14b   : > { %v255_v19 = vpack.c.bf16 %v254_v18, %v254_v18 }
 0x14d   : > { %443 = vmatmul.mubr.msk.bf16.vlgmr.msra.gmra.mrb[0].mxu0 %vm226_vm0, %v255_v19 }
 0x220   : > { %v309_v20 = vpop.f32.mrb[0].mxu0 }
 0x221   : > { %v315_v21 = vmul.f32 0.35355338, %v309_v20  ;;  %v444_v22 = vpop.f32.mrb[1].mxu0 }
 0x222   : > { %v312_v23 = vpop.f32.mrb[2].mxu0 }
 0x223   : > { %v316_v24 = vpack.c.bf16 %v315_v21, %v315_v21  ;;  %v445_v25 = vpop.f32.mrb[3].mxu0 }
 0x225   : > { %332 = vrot.lane.b32.xlu0 %v316_v24, %s505_s9  ;;  %322 = vrot.lane.b32.xlu1 %v316_v24, %s506_s10  ;;  %318 = vst.msk [vmem:[%s221_s8] sm:$0xf] %vm317_vm2, %v316_v24 }
 0x229   : > { %327 = vrot.lane.b32.xlu1 %v316_v24, %s507_s11 }
 0x297   : > { %v333_v26 = vpop.permute.xlu0 %332  ;;  %v323_v27 = vpop.permute.xlu1 %322 }
 0x298   : > { %430 = vst.msk [vmem:[%s221_s8 + $0xc] sm:$0xf] %vm317_vm2, %v333_v26  ;;  %428 = vst.msk [vmem:[%s221_s8 + $0x4] sm:$0xf] %vm317_vm2, %v323_v27 }
 0x29b   : > { %v328_v28 = vpop.permute.xlu1 %327 }
 0x29c   : > { %429 = vst.msk [vmem:[%s221_s8 + $0x8] sm:$0xf] %vm317_vm2, %v328_v28 }
 0x29d PF: > { %s14_s17 = sadd.s32 1, %s501_s17   ;;  %s590_s15 = smov %s497_s16 }
 0x29e   : > { %p11_p5 = scmp.ge.s32.totalorder %s14_s17, 4   ;;  %s591_s16 = smov %s593_s18 }
 0x2a0   :  { %13 = sbr.rel (!%p11_p5) target bundleno = 2 (0x2), region = 69 }

// kernel: basic_transformer_block.13
= control target key start
LH: loop header
LB: loop body
LE: loop exit
PB: predicated region body
PF: predicated region fallthrough
CT: control target
= control target key end

     0   :  { %s629_s12 = smov 0   ;;  %s631_s13 = smov 0   ;;  %s709_s0 = inlined_call_operand.vmem [shape: f32[32,32], index: 0, kind: input, shape index: {}]   ;;  %s710_s1 = inlined_call_operand.vmem [shape: bf16[32,64], index: 1, kind: input, shape index: {}]   ;;  %s711_s2 = inlined_call_operand.vmem [shape: bf16[2,4,16,8], index: 2, kind: output, shape index: {0}]   ;;  %s712_s3 = inlined_call_operand.vmem [shape: bf16[2,4,16,8], index: 3, kind: output, shape index: {1}]  }
   0x1   :  { %s633_s14 = smov 0  }
   0x2 LB: > { %s26_s15 = sadd.s32 1, %s594_s13  ;;  %p500_p0 = scmp.ge.s32.totalorder %s598_s14, 1  ;;  %s598_s14 = sphi %s633_s14, %s14_s14   ;;  %s594_s13 = sphi %s631_s13, %s714_s13   ;;  %s590_s12 = sphi %s629_s12, %s713_s12  }
   0x3   : > { %p28_p1 = scmp.ge.s32.totalorder %s26_s15, 2  ;;  %p161_p2 = scmp.lt.s32.totalorder %s598_s14, 3 }
   0x5   : > { %s716_s15 = smov (%p28_p1, %s26_s15), 0  ;;  %p162_p3 = pnand %p500_p0, %p161_p2 }
   0x6   : > { %v574_v0 = vld [vmem:[%s710_s1] sm:$0xff] (!%p162_p3)   ;;  %v600_v1 = vmov (!%p162_p3), 0.0   ;;  %v575_v2 = vld [vmem:[%s710_s1 + $0x8] sm:$0xff] (!%p162_p3)   ;;  %vm601_vm0 = vmmov (!%p162_p3), 0   ;;  %s501_s20 = sshll.u32 (!%p162_p3), %s590_s12, 1  ;;  %vm247_vm1 = vcmask (!%p162_p3), 261120  }
   0x7   : > { %165 = sbr.rel (%p162_p3) target bundleno = 374 (0x176), region = 28  ;;  %533 = vmatprep.subr.bf16.mxu0 (!%p162_p3), %v600_v1  ;;  %537 = vmatprep.mubr.msk.bf16.mxu0 (!%p162_p3), %vm601_vm0, %v600_v1  ;;  %p201_p4 = scmp.lt.s32.totalorder (!%p162_p3), %s501_s20, 3  ;;  %vm300_vm2 = vcmask (!%p162_p3), 60416  }
   0x8   : > { %534 = vmatpush3.bf16.msra.mxu0 (!%p162_p3), %v574_v0  ;;  %p208_p5 = scmp.lt.s32.totalorder (!%p162_p3), %s590_s12, 1  ;;  %s602_s29 = smov (!%p162_p3), 120  }
   0x9   : > { %535 = vmatprep.subr.bf16.mxu0 (!%p162_p3), %v600_v1  ;;  %s603_s30 = smov (!%p162_p3), 96   ;;  %s604_s4 = smov (!%p162_p3), 88  }
   0xa   : > { %s605_s5 = smov (!%p162_p3), 112   ;;  %s606_s6 = smov (!%p162_p3), 80  }
   0xb   : > { %s607_s7 = smov (!%p162_p3), 104   ;;  %s608_s8 = smov (!%p162_p3), 72  }
   0xc   : > { %536 = vmatpush3.bf16.msra.mxu0 (!%p162_p3), %v575_v2 }
   0xe   : > { %s718_s20 = smov (!%p201_p4, %s501_s20), 3  ;;  %s720_s12 = smov (!%p208_p5, %s590_s12), 1 }
   0xf   : > { %s502_s21 = sshll.u32 %s718_s20, 3  ;;  %s526_s25 = sshll.u32 %s720_s12, 5 }
  0x10   : > { %s204_s24 = scalar_lea.vmem %s709_s0, %s502_s21  ;;  %s669_s28 = scalar_lea.vmem %s711_s2, %s526_s25 }
  0x11   : > { %v228_v3 = vld [vmem:[%s204_s24] sm:$0xff]  ;;  %v229_v4 = vld [vmem:[%s204_s24 + $0x8] sm:$0xff]  ;;  %s225_s11 = scalar_lea.vmem %s712_s3, %s526_s25 }
  0x12   : > { %v230_v5 = vpack.c.bf16 %v229_v4, %v228_v3 }
  0x14   : > { %538 = vmatmul.mubr.msk.bf16.vlgmr.msra.gmra.mrb[0].mxu0 %vm247_vm1, %v230_v5 }
  0xe7   : > { %v285_v6 = vpop.f32.mrb[0].mxu0 }
  0xe8   : > { %v528_v7 = vpack.c.bf16 %v285_v6, %v285_v6  ;;  %v539_v8 = vpop.f32.mrb[1].mxu0 }
  0xe9   : > { %v288_v9 = vpop.f32.mrb[2].mxu0 }
  0xea   : > { %v529_v10 = vpack.c.bf16 %v288_v9, %v288_v9  ;;  %311 = vrot.lane.b32.xlu1 %v528_v7, %s602_s29  ;;  %303 = vrot.lane.b32.xlu0 %v528_v7, %s603_s30  ;;  %v540_v11 = vpop.f32.mrb[3].mxu0  ;;  %301 = vst.msk [vmem:[%s669_s28] sm:$0xf] %vm300_vm2, %v528_v7 }
  0xec   : > { %302 = vst.msk [vmem:[%s669_s28 + $0x4] sm:$0xf] %vm300_vm2, %v529_v10 }
  0xee   : > { %320 = vrot.lane.b32.xlu0 %v528_v7, %s604_s4  ;;  %313 = vrot.lane.b32.xlu1 %v529_v10, %s602_s29 }
  0xf2   : > { %329 = vrot.lane.b32.xlu0 %v528_v7, %s605_s5  ;;  %322 = vrot.lane.b32.xlu1 %v529_v10, %s604_s4 }
  0xf6   : > { %338 = vrot.lane.b32.xlu0 %v528_v7, %s606_s6  ;;  %331 = vrot.lane.b32.xlu1 %v529_v10, %s605_s5 }
  0xfa   : > { %347 = vrot.lane.b32.xlu0 %v528_v7, %s607_s7  ;;  %340 = vrot.lane.b32.xlu1 %v529_v10, %s606_s6 }
  0xfe   : > { %349 = vrot.lane.b32.xlu1 %v529_v10, %s607_s7  ;;  %305 = vrot.lane.b32.xlu0 %v529_v10, %s603_s30 }
 0x102   : > { %358 = vrot.lane.b32.xlu1 %v529_v10, %s608_s8  ;;  %356 = vrot.lane.b32.xlu0 %v528_v7, %s608_s8 }
 0x15c   : > { %v312_v12 = vpop.permute.xlu1 %311  ;;  %v304_v13 = vpop.permute.xlu0 %303 }
 0x15d   : > { %512 = vst.msk [vmem:[%s669_s28 + $0x8] sm:$0xf] %vm300_vm2, %v312_v12  ;;  %309 = vst.msk [vmem:[%s225_s11] sm:$0xf] %vm300_vm2, %v304_v13 }
 0x160   : > { %v321_v14 = vpop.permute.xlu0 %320  ;;  %v314_v15 = vpop.permute.xlu1 %313 }
 0x161   : > { %514 = vst.msk [vmem:[%s225_s11 + $0x8] sm:$0xf] %vm300_vm2, %v321_v14  ;;  %513 = vst.msk [vmem:[%s669_s28 + $0xc] sm:$0xf] %vm300_vm2, %v314_v15 }
 0x164   : > { %v330_v16 = vpop.permute.xlu0 %329  ;;  %v323_v17 = vpop.permute.xlu1 %322 }
 0x165   : > { %516 = vst.msk [vmem:[%s669_s28 + $0x10] sm:$0xf] %vm300_vm2, %v330_v16  ;;  %515 = vst.msk [vmem:[%s225_s11 + $0xc] sm:$0xf] %vm300_vm2, %v323_v17 }
 0x168   : > { %v339_v18 = vpop.permute.xlu0 %338  ;;  %v332_v19 = vpop.permute.xlu1 %331 }
 0x169   : > { %518 = vst.msk [vmem:[%s225_s11 + $0x10] sm:$0xf] %vm300_vm2, %v339_v18  ;;  %517 = vst.msk [vmem:[%s669_s28 + $0x14] sm:$0xf] %vm300_vm2, %v332_v19 }
 0x16c   : > { %v348_v20 = vpop.permute.xlu0 %347  ;;  %v341_v21 = vpop.permute.xlu1 %340 }
 0x16d   : > { %520 = vst.msk [vmem:[%s669_s28 + $0x18] sm:$0xf] %vm300_vm2, %v348_v20  ;;  %519 = vst.msk [vmem:[%s225_s11 + $0x14] sm:$0xf] %vm300_vm2, %v341_v21 }
 0x170   : > { %v350_v22 = vpop.permute.xlu1 %349  ;;  %v306_v23 = vpop.permute.xlu0 %305 }
 0x171   : > { %521 = vst.msk [vmem:[%s669_s28 + $0x1c] sm:$0xf] %vm300_vm2, %v350_v22  ;;  %310 = vst.msk [vmem:[%s225_s11 + $0x4] sm:$0xf] %vm300_vm2, %v306_v23 }
 0x174   : > { %v359_v24 = vpop.permute.xlu1 %358  ;;  %v357_v25 = vpop.permute.xlu0 %356 }
 0x175   : > { %523 = vst.msk [vmem:[%s225_s11 + $0x1c] sm:$0xf] %vm300_vm2, %v359_v24  ;;  %522 = vst.msk [vmem:[%s225_s11 + $0x18] sm:$0xf] %vm300_vm2, %v357_v25 }
 0x176 PF: > { %s14_s14 = sadd.s32 1, %s598_s14   ;;  %s713_s12 = smov %s594_s13 }
 0x177   : > { %p11_p6 = scmp.ge.s32.totalorder %s14_s14, 4   ;;  %s714_s13 = smov %s716_s15 }
 0x179   :  { %13 = sbr.rel (!%p11_p6) target bundleno = 2 (0x2), region = 76 }

// kernel: basic_transformer_block.16
= control target key start
LH: loop header
LB: loop body
LE: loop exit
PB: predicated region body
PF: predicated region fallthrough
CT: control target
= control target key end

     0   :  { %vm31_vm0 = vcmask 261120   ;;  %v335_v15 = vmov 0.0   ;;  %vm336_vm1 = vmmov 0   ;;  %s423_s0 = inlined_call_operand.vmem [shape: f32[16,32], index: 0, kind: input, shape index: {}]   ;;  %s424_s3 = inlined_call_operand.vmem [shape: bf16[32,128], index: 3, kind: input, shape index: {}]   ;;  %s425_s4 = inlined_call_operand.vmem [shape: bf16[32,128], index: 4, kind: input, shape index: {}]   ;;  %s426_s1 = inlined_call_operand.vmem [shape: f32[1,32], index: 1, kind: input, shape index: {}]   ;;  %s427_s2 = inlined_call_operand.vmem [shape: f32[1,32], index: 2, kind: input, shape index: {}]   ;;  %s428_s6 = inlined_call_operand.vmem [shape: f32[1,128], index: 6, kind: input, shape index: {}]   ;;  %s429_s5 = inlined_call_operand.vmem [shape: f32[1,128], index: 5, kind: input, shape index: {}]   ;;  %s430_s7 = inlined_call_operand.vmem [shape: bf16[16,128], index: 7, kind: output, shape index: {}]  }
   0x1   :  { %v27_v0 = vld [vmem:[%s423_s0] sm:$0xff]  ;;  %v28_v1 = vld [vmem:[%s423_s0 + $0x8] sm:$0xff]  ;;  %300 = vmatprep.subr.bf16.mxu0 %v335_v15  ;;  %308 = vmatprep.subr.bf16.mxu1 %v335_v15 }
   0x2   :  { %v32_v2 = vsel %vm31_vm0, %v27_v0, 0.0  ;;  %v35_v3 = vsel %vm31_vm0, %v28_v1, 0.0  ;;  %v319_v14 = vld [vmem:[%s424_s3] sm:$0xff]   ;;  %v321_v17 = vld [vmem:[%s424_s3 + $0x8] sm:$0xff]   ;;  %304 = vmatprep.mubr.msk.bf16.mxu0 %vm336_vm1, %v335_v15  ;;  %312 = vmatprep.mubr.msk.bf16.mxu1 %vm336_vm1, %v335_v15 }
   0x3   :  { %33 = vadd.xlane.f32.xlu0 %v32_v2  ;;  %v320_v16 = vld [vmem:[%s425_s4] sm:$0xff]   ;;  %301 = vmatpush3.bf16.msra.mxu0 %v319_v14  ;;  %v322_v18 = vld [vmem:[%s425_s4 + $0x8] sm:$0xff]  }
   0x4   :  { %309 = vmatpush3.bf16.msra.mxu1 %v320_v16  ;;  %302 = vmatprep.subr.bf16.mxu0 %v335_v15  ;;  %v275_v27 = vld [vmem:[%s426_s1] ss:$0 sm:$0xff] }
   0x5   :  { %310 = vmatprep.subr.bf16.mxu1 %v335_v15  ;;  %v276_v31 = vld [vmem:[%s427_s2] ss:$0 sm:$0xff] }
   0x6   :  { %v281_v36 = vld [vmem:[%s428_s6] ss:$0 sm:$0xff] }
   0x7   :  { %36 = vadd.xlane.f32.xlu0 %v35_v3  ;;  %303 = vmatpush3.bf16.msra.mxu0 %v321_v17 }
   0x8   :  { %311 = vmatpush3.bf16.msra.mxu1 %v322_v18 }
  0x90   :  { %v34_v4 = vpop.xlane.xlu0 %33 }
  0x91   :  { %v39_v5 = vmul.f32 0.03125, %v34_v4 }
  0x93   :  { %v41_v6 = vsub.f32 %v27_v0, %v39_v5 }
  0x94   :  { %v37_v7 = vpop.xlane.xlu0 %36 }
  0x95   :  { %v40_v8 = vmul.f32 0.03125, %v37_v7  ;;  %v43_v9 = vmul.f32 %v41_v6, %v41_v6 }
  0x97   :  { %v42_v10 = vsub.f32 %v28_v1, %v40_v8  ;;  %v45_v11 = vsel %vm31_vm0, %v43_v9, 0.0 }
  0x98   :  { %46 = vadd.xlane.f32.xlu1 %v45_v11 }
  0x99   :  { %v44_v12 = vmul.f32 %v42_v10, %v42_v10 }
  0x9b   :  { %v48_v13 = vsel %vm31_vm0, %v44_v12, 0.0 }
  0x9c   :  { %49 = vadd.xlane.f32.xlu1 %v48_v13 }
 0x125   :  { %v47_v19 = vpop.xlane.xlu1 %46 }
 0x126   :  { %v51_v20 = vmul.f32 0.03125, %v47_v19 }
 0x128   :  { %v53_v21 = vadd.f32 1e-05, %v51_v20 }
 0x129   :  { %v50_v22 = vpop.xlane.xlu1 %49 }
 0x12a   :  { %323 = vrsqrt.f32 %v53_v21  ;;  %v52_v23 = vmul.f32 0.03125, %v50_v22  ;;  %v337_v21 = vmov 1.0  }
 0x12c   :  { %v54_v24 = vadd.f32 1e-05, %v52_v23 }
 0x12e   :  { %325 = vrsqrt.f32 %v54_v24 }
 0x134   :  { %v324_v25 = vpop.eup %323 }
 0x135   :  { %v57_v26 = vmul.f32 %v324_v25, %v41_v6  ;;  %v277_v25 = vld [vmem:[%s429_s5] ss:$0 sm:$0xff] }
 0x137   :  { %v65_v30 = vmul.f32 %v275_v27, %v57_v26 }
 0x138   :  { %v326_v28 = vpop.eup %325 }
 0x139   :  { %v58_v29 = vmul.f32 %v326_v28, %v42_v10  ;;  %v73_v33 = vadd.f32 %v276_v31, %v65_v30 }
 0x13b   :  { %v66_v32 = vmul.f32 %v275_v27, %v58_v29 }
 0x13d   :  { %v74_v34 = vadd.f32 %v276_v31, %v66_v32 }
 0x13f   :  { %v75_v35 = vpack.c.bf16 %v74_v34, %v73_v33 }
 0x141   :  { %305 = vmatmul.mubr.msk.bf16.vlgmr.msra.gmra.mrb[0].mxu0 %vm31_vm0, %v75_v35  ;;  %313 = vmatmul.mubr.msk.bf16.vlgmr.msra.gmra.mrb[0].mxu1 %vm31_vm0, %v75_v35 }
 0x214   :  { %v411_v37 = vpop.f32.mrb[0].mxu0  ;;  %v200_v38 = vpop.f32.mrb[0].mxu1 }
 0x215   :  { %v201_v39 = vadd.f32 %v281_v36, %v200_v38  ;;  %v306_v40 = vpop.f32.mrb[1].mxu0  ;;  %v314_v41 = vpop.f32.mrb[1].mxu1  ;;  %v137_v31 = vadd.f32 %v277_v25, %v411_v37 }
 0x216   :  { %v413_v42 = vpop.f32.mrb[2].mxu0  ;;  %v203_v43 = vpop.f32.mrb[2].mxu1 }
 0x217   :  { %v209_v44 = vmul.f32 0.70710677, %v201_v39  ;;  %v204_v45 = vadd.f32 %v281_v36, %v203_v43  ;;  %v307_v46 = vpop.f32.mrb[3].mxu0  ;;  %v315_v47 = vpop.f32.mrb[3].mxu1  ;;  %v207_v27 = vmul.f32 0.5, %v201_v39  ;;  %v140_v36 = vadd.f32 %v277_v25, %v413_v42 }
 0x219   :  { %v215_v48 = vand.u32 2147483647, %v209_v44  ;;  %v210_v49 = vmul.f32 0.70710677, %v204_v45  ;;  %vm211_vm2 = vcmp.lt.f32.partialorder %v209_v44, 0.0  ;;  %v208_v33 = vmul.f32 0.5, %v204_v45 }
 0x21a   :  { %v213_v22 = vsel %vm211_vm2, -1.0, %v337_v21 }
 0x21b   :  { %v217_v50 = vmul.f32 0.3275911, %v215_v48  ;;  %v216_v51 = vand.u32 2147483647, %v210_v49  ;;  %v241_v55 = vsub.f32 0.0, %v215_v48  ;;  %vm212_vm3 = vcmp.lt.f32.partialorder %v210_v49, 0.0 }
 0x21c   :  { %v214_v29 = vsel %vm212_vm3, -1.0, %v337_v21 }
 0x21d   :  { %v219_v52 = vadd.f32 1.0, %v217_v50  ;;  %v218_v53 = vmul.f32 0.3275911, %v216_v51  ;;  %v242_v56 = vsub.f32 0.0, %v216_v51  ;;  %v243_v58 = vmul.f32 %v241_v55, %v215_v48 }
 0x21f   :  { %327 = vrcp.f32 %v219_v52  ;;  %v220_v54 = vadd.f32 1.0, %v218_v53  ;;  %v244_v62 = vmul.f32 %v242_v56, %v216_v51  ;;  %v245_v63 = vmul.f32 1.442695, %v243_v58 }
 0x221   :  { %329 = vrcp.f32 %v220_v54  ;;  %v247_v4 = vmul.f32 1.442695, %v244_v62 }
 0x222   :  { %331 = vpow2.f32 %v245_v63 }
 0x223   :  { %333 = vpow2.f32 %v247_v4 }
 0x229   :  { %v328_v57 = vpop.eup %327 }
 0x22a   :  { %v223_v59 = vmul.f32 1.0614054, %v328_v57 }
 0x22b   :  { %v330_v60 = vpop.eup %329 }
 0x22c   :  { %v225_v61 = vadd.f32 -1.4531521, %v223_v59  ;;  %v224_v0 = vmul.f32 1.0614054, %v330_v60  ;;  %v332_v15 = vpop.eup %331 }
 0x22d   :  { %v334_v19 = vpop.eup %333 }
 0x22e   :  { %v227_v1 = vmul.f32 %v328_v57, %v225_v61  ;;  %v226_v2 = vadd.f32 -1.4531521, %v224_v0 }
 0x230   :  { %v229_v3 = vadd.f32 1.4214138, %v227_v1  ;;  %v228_v5 = vmul.f32 %v330_v60, %v226_v2 }
 0x232   :  { %v231_v6 = vmul.f32 %v328_v57, %v229_v3  ;;  %v230_v7 = vadd.f32 1.4214138, %v228_v5 }
 0x234   :  { %v233_v8 = vadd.f32 -0.28449672, %v231_v6  ;;  %v232_v9 = vmul.f32 %v330_v60, %v230_v7 }
 0x236   :  { %v235_v10 = vmul.f32 %v328_v57, %v233_v8  ;;  %v234_v11 = vadd.f32 -0.28449672, %v232_v9 }
 0x238   :  { %v237_v12 = vadd.f32 0.2548296, %v235_v10  ;;  %v236_v13 = vmul.f32 %v330_v60, %v234_v11 }
 0x23a   :  { %v239_v14 = vmul.f32 %v328_v57, %v237_v12  ;;  %v238_v16 = vadd.f32 0.2548296, %v236_v13 }
 0x23c   :  { %v249_v17 = vmul.f32 %v332_v15, %v239_v14  ;;  %v240_v18 = vmul.f32 %v330_v60, %v238_v16 }
 0x23e   :  { %v251_v20 = vsub.f32 1.0, %v249_v17  ;;  %v250_v23 = vmul.f32 %v334_v19, %v240_v18 }
 0x240   :  { %v253_v24 = vmul.f32 %v251_v20, %v213_v22  ;;  %v252_v26 = vsub.f32 1.0, %v250_v23 }
 0x242   :  { %v255_v28 = vadd.f32 1.0, %v253_v24  ;;  %v254_v30 = vmul.f32 %v252_v26, %v214_v29 }
 0x244   :  { %v257_v32 = vmul.f32 %v255_v28, %v207_v27  ;;  %v256_v34 = vadd.f32 1.0, %v254_v30 }
 0x246   :  { %v259_v35 = vmul.f32 %v257_v32, %v137_v31  ;;  %v258_v38 = vmul.f32 %v256_v34, %v208_v33 }
 0x248   :  { %v260_v40 = vmul.f32 %v258_v38, %v140_v36 }
 0x24a   :  { %v292_v41 = vpack.c.bf16 %v260_v40, %v259_v35 }
 0x24c   :  { %293 = vst [vmem:[%s430_s7] sm:$0xff] %v292_v41  }

// kernel: basic_transformer_block.17
= control target key start
LH: loop header
LB: loop body
LE: loop exit
PB: predicated region body
PF: predicated region fallthrough
CT: control target
= control target key end

     0   :  { %vm22_vm0 = vcmask 261120   ;;  %v219_v0 = vmov 0.0   ;;  %vm220_vm1 = vmmov 0   ;;  %s294_s1 = inlined_call_operand.vmem [shape: bf16[128,32], index: 1, kind: input, shape index: {}]   ;;  %s295_s0 = inlined_call_operand.vmem [shape: bf16[16,128], index: 0, kind: input, shape index: {}]   ;;  %s296_s2 = inlined_call_operand.vmem [shape: f32[1,32], index: 2, kind: input, shape index: {}]   ;;  %s297_s3 = inlined_call_operand.vmem [shape: f32[16,32], index: 3, kind: input, shape index: {}, may-alias: {3,4}]   ;;  %s298_s4 = inlined_call_operand.vmem [shape: f32[16,32], index: 4, kind: output, shape index: {}, may-alias: {3,4}]  }
   0x1   :  { %188 = vmatprep.subr.bf16.mxu0 %v219_v0  ;;  %v210_v1 = vld [vmem:[%s294_s1] sm:$0xff]   ;;  %204 = vmatprep.mubr.msk.bf16.mxu0 %vm220_vm1, %v219_v0  ;;  %23 = vst.msk [vmem:[#allocation2] sm:$0xff] %vm22_vm0, %v219_v0  ;;  %24 = vst.msk [vmem:[#allocation2 + $0x8] sm:$0xff] %vm22_vm0, %v219_v0  ;;  %v211_v2 = vld [vmem:[%s294_s1 + $0x8] sm:$0xff]  }
   0x2   :  { %189 = vmatpush3.bf16.msra.mxu0 %v210_v1  ;;  %v212_v3 = vld [vmem:[%s294_s1 + $0x10] sm:$0xff]   ;;  %v213_v4 = vld [vmem:[%s294_s1 + $0x18] sm:$0xff]   ;;  %v214_v5 = vld [vmem:[%s294_s1 + $0x20] sm:$0xff]  }
   0x3   :  { %190 = vmatprep.subr.bf16.mxu0 %v219_v0  ;;  %v215_v6 = vld [vmem:[%s294_s1 + $0x28] sm:$0xff]   ;;  %v216_v7 = vld [vmem:[%s294_s1 + $0x30] sm:$0xff]   ;;  %v217_v8 = vld [vmem:[%s294_s1 + $0x38] sm:$0xff]  }
   0x4   :  { %v218_v9 = vld [vmem:[%s295_s0] sm:$0xff]   ;;  %v160_v22 = vld [vmem:[%s297_s3 + $0x8] sm:$0xff] }
   0x5   :  { %v178_v18 = vld [vmem:[%s296_s2] ss:$0 sm:$0xff] }
   0x6   :  { %191 = vmatpush3.bf16.msra.mxu0 %v211_v2  ;;  %v159_v20 = vld [vmem:[%s297_s3] sm:$0xff] }
   0x7   :  { %192 = vmatprep.subr.bf16.mxu0 %v219_v0 }
   0x8   :  { %v25_v10 = vld [vmem:[#allocation2] sm:$0xff]  ;;  %v26_v12 = vld [vmem:[#allocation2 + $0x8] sm:$0xff] }
   0xa   :  { %193 = vmatpush3.bf16.msra.mxu0 %v212_v3 }
   0xb   :  { %194 = vmatprep.subr.bf16.mxu0 %v219_v0 }
   0xe   :  { %195 = vmatpush3.bf16.msra.mxu0 %v213_v4 }
   0xf   :  { %196 = vmatprep.subr.bf16.mxu0 %v219_v0 }
  0x12   :  { %197 = vmatpush3.bf16.msra.mxu0 %v214_v5 }
  0x13   :  { %198 = vmatprep.subr.bf16.mxu0 %v219_v0 }
  0x16   :  { %199 = vmatpush3.bf16.msra.mxu0 %v215_v6 }
  0x17   :  { %200 = vmatprep.subr.bf16.mxu0 %v219_v0 }
  0x1a   :  { %201 = vmatpush3.bf16.msra.mxu0 %v216_v7 }
  0x1b   :  { %202 = vmatprep.subr.bf16.mxu0 %v219_v0 }
  0x1e   :  { %203 = vmatpush3.bf16.msra.mxu0 %v217_v8 }
  0x21   :  { %205 = vmatmul.mubr.bf16.vlgmr.msra.gmra.mrb[0].mxu0 %v218_v9 }
  0xf4   :  { %v133_v11 = vpop.f32.mrb[0].mxu0 }
  0xf5   :  { %v140_v13 = vadd.f32 %v133_v11, %v25_v10  ;;  %v206_v14 = vpop.f32.mrb[1].mxu0 }
  0xf6   :  { %v136_v15 = vpop.f32.mrb[2].mxu0 }
  0xf7   :  { %143 = vst.msk [vmem:[#allocation2] sm:$0xff] %vm22_vm0, %v140_v13  ;;  %v141_v16 = vadd.f32 %v136_v15, %v26_v12  ;;  %v207_v17 = vpop.f32.mrb[3].mxu0 }
  0xf9   :  { %144 = vst.msk [vmem:[#allocation2 + $0x8] sm:$0xff] %vm22_vm0, %v141_v16 }
  0xfe   :  { %v148_v19 = vld [vmem:[#allocation2] sm:$0xff] }
  0xff   :  { %v157_v21 = vadd.f32 %v178_v18, %v148_v19 }
 0x100   :  { %v149_v23 = vld [vmem:[#allocation2 + $0x8] sm:$0xff] }
 0x101   :  { %v161_v24 = vadd.f32 %v159_v20, %v157_v21  ;;  %v158_v25 = vadd.f32 %v178_v18, %v149_v23 }
 0x103   :  { %163 = vst.msk [vmem:[%s298_s4] sm:$0xff] %vm22_vm0, %v161_v24  ;;  %v162_v26 = vadd.f32 %v160_v22, %v158_v25 }
 0x105   :  { %164 = vst.msk [vmem:[%s298_s4 + $0x8] sm:$0xff] %vm22_vm0, %v162_v26 }

// kernel: basic_transformer_block.14
= control target key start
LH: loop header
LB: loop body
LE: loop exit
PB: predicated region body
PF: predicated region fallthrough
CT: control target
= control target key end

     0   :  { %s1342_s12 = smov 0   ;;  %s1344_s13 = smov 0   ;;  %s1499_s0 = inlined_call_operand.vmem [shape: bf16[2,4,8,8], index: 0, kind: input, shape index: {}]   ;;  %s1500_s1 = inlined_call_operand.vmem [shape: bf16[2,4,16,8], index: 1, kind: input, shape index: {}]   ;;  %s1501_s2 = inlined_call_operand.vmem [shape: bf16[2,4,16,8], index: 2, kind: input, shape index: {}]   ;;  %s1502_s3 = inlined_call_operand.vmem [shape: bf16[2,4,8,8], index: 3, kind: output, shape index: {}]  }
   0x1   :  { %s1346_s14 = smov 0  }
   0x2 LB: > { %s39_s15 = sadd.s32 1, %s1312_s13  ;;  %p1137_p0 = scmp.ge.s32.totalorder %s1316_s14, 1  ;;  %s1316_s14 = sphi %s1346_s14, %s13_s14   ;;  %s1312_s13 = sphi %s1344_s13, %s1504_s13   ;;  %s1308_s12 = sphi %s1342_s12, %s1503_s12  }
   0x3   : > { %p41_p1 = scmp.ge.s32.totalorder %s39_s15, 2  ;;  %p229_p2 = scmp.lt.s32.totalorder %s1316_s14, 3 }
   0x5   : > { %s1506_s15 = smov (%p41_p1, %s39_s15), 0  ;;  %p230_p3 = pnand %p1137_p0, %p229_p2 }
   0x6   : > { %p296_p4 = scmp.lt.s32.totalorder (!%p230_p3), %s1308_s12, 1  ;;  %vm367_vm0 = vcmask (!%p230_p3), 64512   ;;  %v1318_v0 = vmov (!%p230_p3), 0.0   ;;  %vm1319_vm1 = vmmov (!%p230_p3), 0   ;;  %vm358_vm2 = vcmask (!%p230_p3), 7168  }
   0x7   : > { %233 = sbr.rel (%p230_p3) target bundleno = 835 (0x343), region = 32  ;;  %1184 = vmatprep.subr.bf16.mxu0 (!%p230_p3), %v1318_v0  ;;  %368 = vst.msk [vmem:[#allocation4] sm:$0xff] (!%p230_p3), %vm367_vm0, %v1318_v0  ;;  %369 = vst.msk [vmem:[#allocation4 + $0x8] sm:$0xff] (!%p230_p3), %vm367_vm0, %v1318_v0  ;;  %1190 = vmatprep.subr.bf16.mxu1 (!%p230_p3), %v1318_v0  ;;  %v1320_v13 = vmov (!%p230_p3), -inf   ;;  %vm593_vm3 = vcmask (!%p230_p3), 130048   ;;  %v1321_v34 = vmov (!%p230_p3), 0  }
   0x8   : > { %370 = vst.msk [vmem:[#allocation4 + $0x10] sm:$0xff] (!%p230_p3), %vm367_vm0, %v1318_v0  ;;  %371 = vst.msk [vmem:[#allocation4 + $0x18] sm:$0xff] (!%p230_p3), %vm367_vm0, %v1318_v0  ;;  %1186 = vmatprep.mubr.msk.bf16.mxu0 (!%p230_p3), %vm1319_vm1, %v1318_v0  ;;  %1192 = vmatprep.mubr.msk.bf16.mxu1 (!%p230_p3), %vm1319_vm1, %v1318_v0  ;;  %vm974_vm4 = vcmask (!%p230_p3), 60416  }
   0x9   : > { %359 = vst.msk [vmem:[#allocation2] sm:$0xff] (!%p230_p3), %vm358_vm2, %v1320_v13  ;;  %360 = vst.msk [vmem:[#allocation2 + $0x8] sm:$0xff] (!%p230_p3), %vm358_vm2, %v1320_v13  ;;  %1260 = vset.pattern.permute.xlu0 (!%p230_p3), %v1321_v34  ;;  %1261 = vset.pattern.permute.xlu1 (!%p230_p3), %v1321_v34 }
   0xa   : > { %361 = vst.msk [vmem:[#allocation2 + $0x10] sm:$0xff] (!%p230_p3), %vm358_vm2, %v1320_v13  ;;  %362 = vst.msk [vmem:[#allocation2 + $0x18] sm:$0xff] (!%p230_p3), %vm358_vm2, %v1320_v13 }
   0xb   : > { %363 = vst.msk [vmem:[#allocation3] sm:$0xff] (!%p230_p3), %vm358_vm2, %v1318_v0  ;;  %364 = vst.msk [vmem:[#allocation3 + $0x8] sm:$0xff] (!%p230_p3), %vm358_vm2, %v1318_v0 }
   0xc   : > { %365 = vst.msk [vmem:[#allocation3 + $0x10] sm:$0xff] (!%p230_p3), %vm358_vm2, %v1318_v0  ;;  %366 = vst.msk [vmem:[#allocation3 + $0x18] sm:$0xff] (!%p230_p3), %vm358_vm2, %v1318_v0 }
   0xe   : > { %s1508_s12 = smov (!%p296_p4, %s1308_s12), 1 }
   0xf   : > { %s1165_s16 = sshll.u32 %s1508_s12, 5  ;;  %s1164_s20 = sshll.u32 %s1508_s12, 4 }
  0x10   : > { %s321_s19 = scalar_lea.vmem %s1500_s1, %s1165_s16  ;;  %s306_s23 = scalar_lea.vmem %s1499_s0, %s1164_s20  ;;  %v1427_v35 = vld [vmem:[#allocation2] sm:$0xff]  ;;  %v1432_v38 = vld [vmem:[#allocation2 + $0x8] sm:$0xff] }
  0x11   : > { %v1262_v1 = vld [vmem:[%s321_s19] sm:$0xff]   ;;  %v1263_v2 = vld [vmem:[%s321_s19 + $0x8] sm:$0xff]   ;;  %v1264_v5 = vld [vmem:[%s321_s19 + $0x10] sm:$0xff]   ;;  %s1392_s26 = scalar_lea.vmem %s1501_s2, %s1165_s16  ;;  %s351_s29 = scalar_lea.vmem %s1502_s3, %s1164_s20 }
  0x12   : > { %v394_v3 = vsel %vm367_vm0, %v1262_v1, 0  ;;  %v445_v4 = vsel %vm367_vm0, %v1263_v2, 0  ;;  %v372_v6 = vld [vmem:[%s306_s23] sm:$0xf]  ;;  %v1265_v7 = vld [vmem:[%s321_s19 + $0x18] sm:$0xff]   ;;  %v496_v9 = vsel %vm367_vm0, %v1264_v5, 0 }
  0x13   : > { %1185 = vmatpush3.bf16.xpose.msra.mxu0 %v394_v3  ;;  %1191 = vmatpush3.bf16.xpose.msra.mxu1 %v445_v4  ;;  %v373_v8 = vld [vmem:[%s306_s23 + $0x4] sm:$0xf]  ;;  %v547_v10 = vsel %vm367_vm0, %v1265_v7, 0  ;;  %v374_v11 = vld [vmem:[%s306_s23 + $0x8] sm:$0xf]  ;;  %v1440_v42 = vld [vmem:[#allocation2 + $0x10] sm:$0xff] }
  0x14   : > { %1196 = vmatprep.subr.bf16.mxu0 %v1318_v0  ;;  %1202 = vmatprep.subr.bf16.mxu1 %v1318_v0  ;;  %v375_v12 = vld [vmem:[%s306_s23 + $0xc] sm:$0xf]  ;;  %v1445_v46 = vld [vmem:[#allocation2 + $0x18] sm:$0xff]  ;;  %v1266_v51 = vld [vmem:[%s1392_s26] sm:$0xff]  }
  0x15   : > { %v1267_v52 = vld [vmem:[%s1392_s26 + $0x8] sm:$0xff]   ;;  %v1268_v3 = vld [vmem:[%s1392_s26 + $0x10] sm:$0xff]   ;;  %v1269_v7 = vld [vmem:[%s1392_s26 + $0x18] sm:$0xff]  }
  0x16   : > { %v657_v34 = vld [vmem:[#allocation3 + $0x18] sm:$0xff] }
  0x1a   : > { %1187 = vmatmul.mubr.msk.bf16.vlgmr.msra.gmra.mrb[0].mxu0 %vm367_vm0, %v372_v6  ;;  %1193 = vmatmul.mubr.msk.bf16.vlgmr.msra.gmra.mrb[0].mxu1 %vm367_vm0, %v373_v8 }
  0x1b   : > { %1197 = vmatpush3.bf16.xpose.msra.mxu0 %v496_v9  ;;  %1203 = vmatpush3.bf16.xpose.msra.mxu1 %v547_v10 }
  0x1c   : > { %1198 = vmatprep.mubr.msk.bf16.mxu0 %vm1319_vm1, %v1318_v0  ;;  %1204 = vmatprep.mubr.msk.bf16.mxu1 %vm1319_vm1, %v1318_v0 }
  0x1d   : > { %1208 = vmatprep.subr.bf16.mxu0 %v1318_v0  ;;  %1214 = vmatprep.subr.bf16.mxu1 %v1318_v0 }
  0x22   : > { %1199 = vmatmul.mubr.msk.bf16.vlgmr.msra.gmra.mrb[4].mxu0 %vm367_vm0, %v374_v11  ;;  %1205 = vmatmul.mubr.msk.bf16.vlgmr.msra.gmra.mrb[4].mxu1 %vm367_vm0, %v375_v12 }
  0x23   : > { %1210 = vmatprep.mubr.msk.bf16.mxu0 %vm1319_vm1, %v1318_v0  ;;  %1216 = vmatprep.mubr.msk.bf16.mxu1 %vm1319_vm1, %v1318_v0 }
  0x24   : > { %1209 = vmatpush3.bf16.msra.mxu0 %v1266_v51  ;;  %1215 = vmatpush3.bf16.msra.mxu1 %v1267_v52 }
  0x25   : > { %1220 = vmatprep.subr.bf16.mxu0 %v1318_v0  ;;  %1226 = vmatprep.subr.bf16.mxu1 %v1318_v0 }
  0xed   : > { %v430_v14 = vpop.f32.mrb[0].mxu0  ;;  %v481_v16 = vpop.f32.mrb[0].mxu1 }
  0xee   : > { %v1188_v15 = vpop.f32.mrb[1].mxu0  ;;  %v594_v17 = vsel %vm593_vm3, %v430_v14, -inf  ;;  %v1194_v19 = vpop.f32.mrb[1].mxu1  ;;  %v597_v22 = vsel %vm593_vm3, %v481_v16, -inf }
  0xef   : > { %595 = vmax.xlane.f32.xlu0 %v594_v17  ;;  %v433_v18 = vpop.f32.mrb[2].mxu0  ;;  %v484_v21 = vpop.f32.mrb[2].mxu1 }
  0xf0   : > { %v1189_v20 = vpop.f32.mrb[3].mxu0  ;;  %v1195_v23 = vpop.f32.mrb[3].mxu1 }
  0xf1   : > { %v654_v23 = vld [vmem:[#allocation3] sm:$0xff] }
  0xf3   : > { %598 = vmax.xlane.f32.xlu0 %v597_v22 }
  0xf5   : > { %v532_v24 = vpop.f32.mrb[4].mxu0  ;;  %v583_v26 = vpop.f32.mrb[4].mxu1 }
  0xf6   : > { %v1200_v25 = vpop.f32.mrb[5].mxu0  ;;  %v600_v27 = vsel %vm593_vm3, %v532_v24, -inf  ;;  %v1206_v29 = vpop.f32.mrb[5].mxu1  ;;  %v603_v32 = vsel %vm593_vm3, %v583_v26, -inf }
  0xf7   : > { %601 = vmax.xlane.f32.xlu1 %v600_v27  ;;  %v535_v28 = vpop.f32.mrb[6].mxu0  ;;  %v586_v31 = vpop.f32.mrb[6].mxu1 }
  0xf8   : > { %v1201_v30 = vpop.f32.mrb[7].mxu0  ;;  %v1207_v33 = vpop.f32.mrb[7].mxu1 }
  0xf9   : > { %v656_v30 = vld [vmem:[#allocation3 + $0x10] sm:$0xff] }
  0xfb   : > { %604 = vmax.xlane.f32.xlu1 %v603_v32 }
 0x17c   : > { %v596_v36 = vpop.xlane.xlu0 %595 }
 0x17d   : > { %v1430_v37 = vmax.f32 %v1427_v35, %v596_v36 }
 0x17f   : > { %v610_v39 = vsub.f32 %v1427_v35, %v1430_v37  ;;  %927 = vst.msk [vmem:[#allocation2] sm:$0xff] %vm358_vm2, %v1430_v37  ;;  %624 = vperm.xlu0 %1260, %v1430_v37  }
 0x180   : > { %v599_v40 = vpop.xlane.xlu0 %598 }
 0x181   : > { %v607_v41 = vmax.f32 %v1432_v38, %v599_v40  ;;  %v614_v17 = vmul.f32 1.442695, %v610_v39 }
 0x183   : > { %v611_v43 = vsub.f32 %v1432_v38, %v607_v41  ;;  %928 = vst.msk [vmem:[#allocation2 + $0x8] sm:$0xff] %vm358_vm2, %v607_v41  ;;  %629 = vperm.xlu1 %1261, %v607_v41  }
 0x184   : > { %v602_v44 = vpop.xlane.xlu1 %601 }
 0x185   : > { %v608_v45 = vmax.f32 %v1440_v42, %v602_v44 }
 0x187   : > { %v612_v47 = vsub.f32 %v1440_v42, %v608_v45  ;;  %929 = vst.msk [vmem:[#allocation2 + $0x10] sm:$0xff] %vm358_vm2, %v608_v45  ;;  %634 = vperm.xlu1 %1261, %v608_v45  }
 0x188   : > { %v605_v48 = vpop.xlane.xlu1 %604 }
 0x189   : > { %v609_v49 = vmax.f32 %v1445_v46, %v605_v48 }
 0x18b   : > { %v613_v50 = vsub.f32 %v1445_v46, %v609_v49  ;;  %930 = vst.msk [vmem:[#allocation2 + $0x18] sm:$0xff] %vm358_vm2, %v609_v49  ;;  %639 = vperm.xlu1 %1261, %v609_v49  }
 0x18d   : > { %v620_v18 = vmul.f32 1.442695, %v613_v50  ;;  %v892_v50 = vld [vmem:[#allocation4 + $0x8] sm:$0xff] }
 0x1fe   : > { %v625_v53 = vpop.permute.xlu0 %624 }
 0x1ff   : > { %v642_v54 = vsub.f32 %v430_v14, %v625_v53  ;;  %v616_v14 = vmul.f32 1.442695, %v611_v43 }
 0x201   : > { %v646_v55 = vmul.f32 1.442695, %v642_v54 }
 0x202   : > { %v630_v56 = vpop.permute.xlu1 %629 }
 0x203   : > { %1270 = vpow2.f32 %v646_v55  ;;  %v643_v57 = vsub.f32 %v481_v16, %v630_v56 }
 0x205   : > { %v648_v58 = vmul.f32 1.442695, %v643_v57 }
 0x206   : > { %v635_v59 = vpop.permute.xlu1 %634 }
 0x207   : > { %1272 = vpow2.f32 %v648_v58  ;;  %v644_v60 = vsub.f32 %v532_v24, %v635_v59  ;;  %v893_v59 = vld [vmem:[#allocation4 + $0x10] sm:$0xff] }
 0x209   : > { %v650_v61 = vmul.f32 1.442695, %v644_v60 }
 0x20a   : > { %v640_v62 = vpop.permute.xlu1 %639 }
 0x20b   : > { %1274 = vpow2.f32 %v650_v61  ;;  %v645_v63 = vsub.f32 %v583_v26, %v640_v62  ;;  %v655_v26 = vld [vmem:[#allocation3 + $0x8] sm:$0xff] }
 0x20d   : > { %v1271_v1 = vpop.eup %1270  ;;  %v652_v2 = vmul.f32 1.442695, %v645_v63 }
 0x20e   : > { %v662_v4 = vsel %vm593_vm3, %v1271_v1, 0.0  ;;  %v683_v5 = vpack.c.bf16 %v1271_v1, %v1271_v1 }
 0x20f   : > { %1276 = vpow2.f32 %v652_v2  ;;  %663 = vadd.xlane.f32.xlu1 %v662_v4 }
 0x210   : > { %1211 = vmatmul.mubr.msk.bf16.vlgmr.msra.gmra.mrb[8].mxu0 %vm593_vm3, %v683_v5  ;;  %1278 = vpow2.f32 %v616_v14 }
 0x211   : > { %v1273_v6 = vpop.eup %1272  ;;  %1221 = vmatpush3.bf16.msra.mxu0 %v1268_v3  ;;  %1222 = vmatprep.mubr.msk.bf16.mxu0 %vm1319_vm1, %v1318_v0  ;;  %1280 = vpow2.f32 %v614_v17  ;;  %v894_v3 = vld [vmem:[#allocation4 + $0x18] sm:$0xff] }
 0x212   : > { %v665_v8 = vsel %vm593_vm3, %v1273_v6, 0.0  ;;  %v684_v9 = vpack.c.bf16 %v1273_v6, %v1273_v6 }
 0x213   : > { %666 = vadd.xlane.f32.xlu0 %v665_v8 }
 0x214   : > { %1217 = vmatmul.mubr.msk.bf16.vlgmr.msra.gmra.mrb[8].mxu1 %vm593_vm3, %v684_v9 }
 0x215   : > { %v1275_v10 = vpop.eup %1274  ;;  %1227 = vmatpush3.bf16.msra.mxu1 %v1269_v7  ;;  %1228 = vmatprep.mubr.msk.bf16.mxu1 %vm1319_vm1, %v1318_v0  ;;  %v618_v0 = vmul.f32 1.442695, %v612_v47  ;;  %v891_v47 = vld [vmem:[#allocation4] sm:$0xff] }
 0x216   : > { %v668_v11 = vsel %vm593_vm3, %v1275_v10, 0.0  ;;  %v685_v12 = vpack.c.bf16 %v1275_v10, %v1275_v10 }
 0x217   : > { %669 = vadd.xlane.f32.xlu1 %v668_v11  ;;  %1282 = vpow2.f32 %v618_v0 }
 0x218   : > { %1223 = vmatmul.mubr.msk.bf16.vlgmr.msra.gmra.mrb[12].mxu0 %vm593_vm3, %v685_v12  ;;  %1284 = vpow2.f32 %v620_v18 }
 0x219   : > { %v1277_v13 = vpop.eup %1276 }
 0x21a   : > { %v671_v15 = vsel %vm593_vm3, %v1277_v13, 0.0  ;;  %v686_v16 = vpack.c.bf16 %v1277_v13, %v1277_v13  ;;  %v1279_v19 = vpop.eup %1278 }
 0x21b   : > { %672 = vadd.xlane.f32.xlu1 %v671_v15  ;;  %v1281_v20 = vpop.eup %1280  ;;  %v659_v28 = vmul.f32 %v1279_v19, %v655_v26 }
 0x21c   : > { %1229 = vmatmul.mubr.msk.bf16.vlgmr.msra.gmra.mrb[12].mxu1 %vm593_vm3, %v686_v16  ;;  %v658_v24 = vmul.f32 %v1281_v20, %v654_v23 }
 0x221   : > { %v1283_v21 = vpop.eup %1282 }
 0x222   : > { %v1285_v22 = vpop.eup %1284  ;;  %v660_v32 = vmul.f32 %v1283_v21, %v656_v30 }
 0x223   : > { %v661_v37 = vmul.f32 %v1285_v22, %v657_v34 }
 0x229   : > { %902 = vperm.xlu0 %1260, %v1279_v19  }
 0x22c   : > { %897 = vperm.xlu1 %1261, %v1281_v20  }
 0x230   : > { %907 = vperm.xlu1 %1261, %v1283_v21  }
 0x234   : > { %912 = vperm.xlu1 %1261, %v1285_v22  }
 0x29c   : > { %v664_v25 = vpop.xlane.xlu1 %663 }
 0x29d   : > { %v674_v27 = vadd.f32 %v664_v25, %v658_v24 }
 0x29f   : > { %679 = vst.msk [vmem:[#allocation3] sm:$0xff] %vm358_vm2, %v674_v27 }
 0x2a0   : > { %v667_v29 = vpop.xlane.xlu0 %666 }
 0x2a1   : > { %v675_v31 = vadd.f32 %v667_v29, %v659_v28 }
 0x2a3   : > { %680 = vst.msk [vmem:[#allocation3 + $0x8] sm:$0xff] %vm358_vm2, %v675_v31 }
 0x2a4   : > { %v670_v33 = vpop.xlane.xlu1 %669 }
 0x2a5   : > { %v676_v35 = vadd.f32 %v670_v33, %v660_v32 }
 0x2a6   : > { %v934_v36 = vld [vmem:[#allocation3] sm:$0xff] }
 0x2a7   : > { %681 = vst.msk [vmem:[#allocation3 + $0x10] sm:$0xff] %vm358_vm2, %v676_v35  ;;  %1286 = vrcp.f32 %v934_v36 }
 0x2a8   : > { %v673_v38 = vpop.xlane.xlu1 %672  ;;  %v903_v51 = vpop.permute.xlu0 %902 }
 0x2a9   : > { %v677_v39 = vadd.f32 %v673_v38, %v661_v37  ;;  %v916_v57 = vmul.f32 %v903_v51, %v892_v50 }
 0x2aa   : > { %v935_v40 = vld [vmem:[#allocation3 + $0x8] sm:$0xff] }
 0x2ab   : > { %682 = vst.msk [vmem:[#allocation3 + $0x18] sm:$0xff] %vm358_vm2, %v677_v39  ;;  %1288 = vrcp.f32 %v935_v40 }
 0x2ac   : > { %v898_v48 = vpop.permute.xlu1 %897 }
 0x2ad   : > { %v915_v49 = vmul.f32 %v898_v48, %v891_v47 }
 0x2ae   : > { %v936_v41 = vld [vmem:[#allocation3 + $0x10] sm:$0xff] }
 0x2af   : > { %1290 = vrcp.f32 %v936_v41 }
 0x2b0   : > { %v908_v55 = vpop.permute.xlu1 %907 }
 0x2b1   : > { %v1287_v42 = vpop.eup %1286  ;;  %v917_v1 = vmul.f32 %v908_v55, %v893_v59 }
 0x2b2   : > { %948 = vperm.xlu1 %1261, %v1287_v42   ;;  %v937_v43 = vld [vmem:[#allocation3 + $0x18] sm:$0xff] }
 0x2b3   : > { %1292 = vrcp.f32 %v937_v43 }
 0x2b4   : > { %v913_v4 = vpop.permute.xlu1 %912 }
 0x2b5   : > { %v1289_v44 = vpop.eup %1288  ;;  %v918_v9 = vmul.f32 %v913_v4, %v894_v3 }
 0x2b6   : > { %953 = vperm.xlu0 %1260, %v1289_v44  }
 0x2b9   : > { %v1291_v45 = vpop.eup %1290 }
 0x2ba   : > { %958 = vperm.xlu1 %1261, %v1291_v45  }
 0x2bd   : > { %v1293_v46 = vpop.eup %1292 }
 0x2be   : > { %963 = vperm.xlu0 %1260, %v1293_v46  }
 0x2e3   : > { %v738_v52 = vpop.f32.mrb[8].mxu0 }
 0x2e4   : > { %v919_v53 = vadd.f32 %v915_v49, %v738_v52  ;;  %v1212_v54 = vpop.f32.mrb[9].mxu0 }
 0x2e5   : > { %v741_v56 = vpop.f32.mrb[10].mxu0 }
 0x2e6   : > { %923 = vst.msk [vmem:[#allocation4] sm:$0xff] %vm367_vm0, %v919_v53  ;;  %v1213_v58 = vpop.f32.mrb[11].mxu0 }
 0x2e7   : > { %v787_v60 = vpop.f32.mrb[8].mxu1 }
 0x2e8   : > { %v920_v61 = vadd.f32 %v916_v57, %v787_v60  ;;  %v1218_v62 = vpop.f32.mrb[9].mxu1 }
 0x2e9   : > { %v790_v63 = vpop.f32.mrb[10].mxu1 }
 0x2ea   : > { %924 = vst.msk [vmem:[#allocation4 + $0x8] sm:$0xff] %vm367_vm0, %v920_v61  ;;  %v1219_v2 = vpop.f32.mrb[11].mxu1 }
 0x2eb   : > { %v836_v5 = vpop.f32.mrb[12].mxu0 }
 0x2ec   : > { %v921_v6 = vadd.f32 %v917_v1, %v836_v5  ;;  %v1224_v7 = vpop.f32.mrb[13].mxu0 }
 0x2ed   : > { %v839_v8 = vpop.f32.mrb[14].mxu0  ;;  %v942_v17 = vld [vmem:[#allocation4] sm:$0xff] }
 0x2ee   : > { %925 = vst.msk [vmem:[#allocation4 + $0x10] sm:$0xff] %vm367_vm0, %v921_v6  ;;  %v1225_v10 = vpop.f32.mrb[15].mxu0 }
 0x2ef   : > { %v885_v11 = vpop.f32.mrb[12].mxu1 }
 0x2f0   : > { %v922_v12 = vadd.f32 %v918_v9, %v885_v11  ;;  %v1230_v13 = vpop.f32.mrb[13].mxu1 }
 0x2f1   : > { %v888_v14 = vpop.f32.mrb[14].mxu1  ;;  %v943_v19 = vld [vmem:[#allocation4 + $0x8] sm:$0xff] }
 0x2f2   : > { %926 = vst.msk [vmem:[#allocation4 + $0x18] sm:$0xff] %vm367_vm0, %v922_v12  ;;  %v1231_v15 = vpop.f32.mrb[15].mxu1 }
 0x2f5   : > { %v944_v24 = vld [vmem:[#allocation4 + $0x10] sm:$0xff] }
 0x2f9   : > { %v945_v28 = vld [vmem:[#allocation4 + $0x18] sm:$0xff] }
 0x331   : > { %v949_v16 = vpop.permute.xlu1 %948 }
 0x332   : > { %v966_v0 = vmul.f32 %v949_v16, %v942_v17 }
 0x334   : > { %v970_v18 = vpack.c.bf16 %v966_v0, %v966_v0 }
 0x335   : > { %v954_v20 = vpop.permute.xlu0 %953 }
 0x336   : > { %975 = vst.msk [vmem:[%s351_s29] sm:$0xf] %vm974_vm4, %v970_v18  ;;  %v967_v21 = vmul.f32 %v954_v20, %v943_v19 }
 0x338   : > { %v971_v22 = vpack.c.bf16 %v967_v21, %v967_v21 }
 0x339   : > { %v959_v23 = vpop.permute.xlu1 %958 }
 0x33a   : > { %976 = vst.msk [vmem:[%s351_s29 + $0x4] sm:$0xf] %vm974_vm4, %v971_v22  ;;  %v968_v25 = vmul.f32 %v959_v23, %v944_v24 }
 0x33c   : > { %v972_v26 = vpack.c.bf16 %v968_v25, %v968_v25 }
 0x33d   : > { %v964_v27 = vpop.permute.xlu0 %963 }
 0x33e   : > { %977 = vst.msk [vmem:[%s351_s29 + $0x8] sm:$0xf] %vm974_vm4, %v972_v26  ;;  %v969_v29 = vmul.f32 %v964_v27, %v945_v28 }
 0x340   : > { %v973_v30 = vpack.c.bf16 %v969_v29, %v969_v29 }
 0x342   : > { %978 = vst.msk [vmem:[%s351_s29 + $0xc] sm:$0xf] %vm974_vm4, %v973_v30 }
 0x343 PF: > { %s13_s14 = sadd.s32 1, %s1316_s14   ;;  %s1503_s12 = smov %s1312_s13 }
 0x344   : > { %p10_p5 = scmp.ge.s32.totalorder %s13_s14, 4   ;;  %s1504_s13 = smov %s1506_s15 }
 0x346   :  { %12 = sbr.rel (!%p10_p5) target bundleno = 2 (0x2), region = 76 }

</bundles_post_ra>
